<compile_context>
chip_gen: v7x
topology: tpu7x:2x2x1
jax: 0.10.0
libtpu: 0.0.40
codegen_flags: <defaults>
</compile_context>

<pallas_src>
import numpy as np
import jax
import jax.numpy as jnp
from jax import lax
from jax.experimental import pallas as pl
from jax.experimental.pallas import tpu as pltpu

WIDTH = 32
DEPTH = 4
KER_IN = 6            # edge_attr = [x_i, y_i, x_j, y_j, a_i, a_j]
KER_IN_PAD = 8        # padded to a sublane-friendly size (zero features)
IN_WIDTH = 1
KER_HIDDEN = WIDTH // 4   # 8
TILE_E = 128          # edge tile (edges on the 128-lane axis)


def _round_up(x, m):
    return (x + m - 1) // m * m


def gkn_kernel(src_ref, dst_ref,                       # scalar prefetch (SMEM, int32 [E_pad])
               x0_ref, eaT_ref,
               k1wT_ref, k1bT_ref, k2wT_ref, k2bT_ref,
               root_ref, convb_ref, invdeg_ref,
               out_ref,
               x_scr, agg_scr, xs_scr, m_scr):
    d = pl.program_id(0)
    et = pl.program_id(1)
    n_et = pl.num_programs(1)

    @pl.when(jnp.logical_and(d == 0, et == 0))
    def _init_x():
        x_scr[...] = x0_ref[...]                       # fc1 output (padded), from wrapper

    @pl.when(et == 0)
    def _zero_agg():
        agg_scr[...] = jnp.zeros_like(agg_scr)

    # ---- fused per-edge kernel MLP, transposed / lane-dense (edges on lanes) ----------
    ea_t = eaT_ref[...]                                                    # [8, TILE_E]
    h_t = jnp.maximum(
        jnp.dot(k1wT_ref[...], ea_t, preferred_element_type=jnp.float32)
        + k1bT_ref[...], 0.0)                                              # [8, TILE_E]
    wflat_t = (jnp.dot(k2wT_ref[...], h_t, preferred_element_type=jnp.float32)
               + k2bT_ref[...])                                            # [W*W, TILE_E]

    # ---- index-based gather of x[src] for this edge tile -------------------------------
    e0 = et * TILE_E

    def gather_body(e, carry):
        s = src_ref[e0 + e]
        xs_scr[pl.ds(e, 1), :] = x_scr[pl.ds(s, 1), :]
        return carry

    lax.fori_loop(0, TILE_E, gather_body, 0)

    xs_t = jnp.transpose(xs_scr[...])                                      # [W, TILE_E]

    # ---- per-edge messages m[e,:] = x[src(e),:] @ W_e, computed lane-dense -------------
    # W_e[cin, cout] = wflat[e, cin*W + cout]  (row-major .view(W, W), as in PyG NNConv)
    m_t = jnp.zeros((WIDTH, TILE_E), jnp.float32)
    for cin in range(WIDTH):   # static unroll: 32 full-lane VPU multiply-adds
        m_t = m_t + xs_t[cin:cin + 1, :] * wflat_t[cin * WIDTH:(cin + 1) * WIDTH, :]
    m_scr[...] = jnp.transpose(m_t)                                        # [TILE_E, W]

    # ---- index-based scatter-add into the per-node accumulator -------------------------
    def scatter_body(e, carry):
        t = dst_ref[e0 + e]
        agg_scr[pl.ds(t, 1), :] = agg_scr[pl.ds(t, 1), :] + m_scr[pl.ds(e, 1), :]
        return carry

    lax.fori_loop(0, TILE_E, scatter_body, 0)

    # ---- end of edge sweep: mean-aggregate, root transform, ReLU -----------------------
    @pl.when(et == n_et - 1)
    def _layer_update():
        agg_mean = agg_scr[...] * invdeg_ref[...]                          # [N_pad, W]
        x_new = jnp.maximum(
            jnp.dot(x_scr[...], root_ref[...], preferred_element_type=jnp.float32)
            + agg_mean + convb_ref[...], 0.0)
        x_scr[...] = x_new
        out_ref[...] = x_new                                               # final d wins


def kernel_nn_forward(x, edge_index, edge_attr, params, num_nodes, depth=DEPTH):
    src, dst = edge_index[0].astype(jnp.int32), edge_index[1].astype(jnp.int32)
    E = edge_attr.shape[0]
    E_pad = _round_up(max(E, 1), TILE_E)
    N_pad = _round_up(num_nodes + 1, 8)        # >= one padding row absorbs padded edges
    pad_node = num_nodes                       # padded edges read/write this dummy row
    pad_e = E_pad - E

    # glue: fc1 in the wrapper (tiny [N, in_width] @ [in_width, W]); generic in in_width
    x0 = x @ params["fc1_w"] + params["fc1_b"]                              # [N, W]
    x0 = jnp.concatenate(
        [x0, jnp.zeros((N_pad - num_nodes, WIDTH), jnp.float32)], axis=0)   # [N_pad, W]

    # pad edges: point them at the dummy node so they never touch real rows
    src_p = jnp.concatenate([src, jnp.full((pad_e,), pad_node, jnp.int32)])
    dst_p = jnp.concatenate([dst, jnp.full((pad_e,), pad_node, jnp.int32)])

    # edge attributes: pad feature dim 6 -> 8 and E -> E_pad, transpose (edges on lanes)
    ea = jnp.concatenate(
        [edge_attr, jnp.zeros((E, KER_IN_PAD - KER_IN), jnp.float32)], axis=1)
    ea = jnp.concatenate([ea, jnp.zeros((pad_e, KER_IN_PAD), jnp.float32)], axis=0)
    ea_t = ea.T                                                             # [8, E_pad]

    # transposed kernel-MLP params (zero-padded for the padded feature rows)
    k1wT = jnp.concatenate(
        [params["k1_w"].T,
         jnp.zeros((KER_HIDDEN, KER_IN_PAD - KER_IN), jnp.float32)], axis=1)  # [8, 8]
    k1bT = params["k1_b"].reshape(KER_HIDDEN, 1)                              # [8, 1]
    k2wT = params["k2_w"].T                                                   # [W*W, 8]
    k2bT = params["k2_b"].reshape(WIDTH * WIDTH, 1)                           # [W*W, 1]

    # mean-aggregation degrees (real edges only; padded rows get 1)
    deg = jnp.zeros((N_pad,), jnp.float32).at[dst].add(1.0)
    inv_deg = (1.0 / jnp.maximum(deg, 1.0)).reshape(N_pad, 1)                 # [N_pad, 1]

    n_et = E_pad // TILE_E
    const2 = lambda d, et, s, t: (0, 0)

    grid_spec = pltpu.PrefetchScalarGridSpec(
        num_scalar_prefetch=2,
        grid=(depth, n_et),
        in_specs=[
            pl.BlockSpec((N_pad, WIDTH), const2),                              # x0
            pl.BlockSpec((KER_IN_PAD, TILE_E), lambda d, et, s, t: (0, et)),   # ea_t tile
            pl.BlockSpec((KER_HIDDEN, KER_IN_PAD), const2),                    # k1wT
            pl.BlockSpec((KER_HIDDEN, 1), const2),                             # k1bT
            pl.BlockSpec((WIDTH * WIDTH, KER_HIDDEN), const2),                 # k2wT
            pl.BlockSpec((WIDTH * WIDTH, 1), const2),                          # k2bT
            pl.BlockSpec((WIDTH, WIDTH), const2),                              # root
            pl.BlockSpec((1, WIDTH), const2),                                  # conv bias
            pl.BlockSpec((N_pad, 1), const2),                                  # 1/deg
        ],
        out_specs=pl.BlockSpec((N_pad, WIDTH), const2),
        scratch_shapes=[
            pltpu.VMEM((N_pad, WIDTH), jnp.float32),    # node features (current layer)
            pltpu.VMEM((N_pad, WIDTH), jnp.float32),    # scatter accumulator
            pltpu.VMEM((TILE_E, WIDTH), jnp.float32),   # gathered x[src] tile
            pltpu.VMEM((TILE_E, WIDTH), jnp.float32),   # message tile
        ],
    )

    out_pad = pl.pallas_call(
        gkn_kernel,
        out_shape=jax.ShapeDtypeStruct((N_pad, WIDTH), jnp.float32),
        grid_spec=grid_spec,
        compiler_params=pltpu.CompilerParams(
            # depth axis and the edge-reduction axis are both sequential
            dimension_semantics=("arbitrary", "arbitrary"),
            vmem_limit_bytes=48 * 1024 * 1024,
        ),
    )(src_p, dst_p, x0, ea_t, k1wT, k1bT, k2wT, k2bT,
      params["root"], params["conv_b"], inv_deg)

    # glue: fc2 in the wrapper (avoids a masked [N, 1] store from the kernel)
    return out_pad[:num_nodes] @ params["fc2_w"] + params["fc2_b"]


def reference_forward(x, edge_index, edge_attr, params, num_nodes, depth=DEPTH):
    # Pure-JAX reference (same math, scatter via .at[].add) for correctness check.
    src, dst = edge_index[0], edge_index[1]
    h = jnp.maximum(edge_attr @ params["k1_w"] + params["k1_b"], 0.0)
    w3 = (h @ params["k2_w"] + params["k2_b"]).reshape(-1, WIDTH, WIDTH)
    xx = x @ params["fc1_w"] + params["fc1_b"]
    deg = jnp.maximum(jnp.zeros((num_nodes,), jnp.float32).at[dst].add(1.0), 1.0)
    for _ in range(depth):
        xs = xx[src]
        m = jnp.einsum("ec,eco->eo", xs, w3)
        agg = jnp.zeros((num_nodes, WIDTH), jnp.float32).at[dst].add(m) / deg[:, None]
        xx = jax.nn.relu(xx @ params["root"] + agg + params["conv_b"])
    return xx @ params["fc2_w"] + params["fc2_b"]


if __name__ == "__main__":
    key = jax.random.PRNGKey(0)

    # Small SquareMeshGenerator-like graph: s x s grid on [0,1]^2, ball connectivity.
    s = 5
    N = s * s
    radius = 0.3
    lin = np.linspace(0.0, 1.0, s)
    gx, gy = np.meshgrid(lin, lin, indexing="ij")
    pos = np.stack([gx.ravel(), gy.ravel()], axis=1).astype(np.float32)   # [N, 2]
    d = np.linalg.norm(pos[:, None, :] - pos[None, :, :], axis=-1)
    src_np, dst_np = np.nonzero(d <= radius)                              # includes self-loops
    edge_index = jnp.asarray(np.stack([src_np, dst_np], axis=0), dtype=jnp.int32)

    keys = jax.random.split(key, 6)
    a = jax.random.normal(keys[0], (N, IN_WIDTH), jnp.float32)            # node input feature
    pos_j = jnp.asarray(pos)
    edge_attr = jnp.concatenate(
        [pos_j[edge_index[0]], pos_j[edge_index[1]],
         a[edge_index[0]], a[edge_index[1]]], axis=1)                     # [E, 6]

    def init(k, shape, fan):
        return (jax.random.normal(k, shape, jnp.float32) / np.sqrt(fan)).astype(jnp.float32)

    params = {
        "fc1_w": init(keys[1], (IN_WIDTH, WIDTH), IN_WIDTH),
        "fc1_b": jnp.zeros((1, WIDTH), jnp.float32),
        "k1_w": init(keys[2], (KER_IN, KER_HIDDEN), KER_IN),
        "k1_b": 0.01 * jnp.ones((1, KER_HIDDEN), jnp.float32),
        "k2_w": init(keys[3], (KER_HIDDEN, WIDTH * WIDTH), KER_HIDDEN * WIDTH),
        "k2_b": jnp.zeros((1, WIDTH * WIDTH), jnp.float32),
        "root": init(keys[4], (WIDTH, WIDTH), WIDTH),
        "conv_b": 0.01 * jnp.ones((1, WIDTH), jnp.float32),
        "fc2_w": init(keys[5], (WIDTH, 1), WIDTH),
        "fc2_b": jnp.zeros((1, 1), jnp.float32),
    }

    out = kernel_nn_forward(a, edge_index, edge_attr, params, N)
    out = jax.block_until_ready(out)

    ref = reference_forward(a, edge_index, edge_attr, params, N)
    if not np.allclose(np.asarray(out), np.asarray(ref), rtol=1e-4, atol=1e-4):
        raise AssertionError("Pallas output mismatch vs JAX reference")
    print("KERNEL_OK")
</pallas_src>

<mosaic_0001>
module attributes {stable_mosaic.version = 11 : i64} {
  func.func @gkn_kernel(%arg0: i32, %arg1: i32, %arg2: memref<128xi32, #tpu.memory_space<smem>>, %arg3: memref<128xi32, #tpu.memory_space<smem>>, %arg4: memref<32x32xf32, #tpu.memory_space<vmem>>, %arg5: memref<8x128xf32, #tpu.memory_space<vmem>>, %arg6: memref<8x8xf32, #tpu.memory_space<vmem>>, %arg7: memref<8x1xf32, #tpu.memory_space<vmem>>, %arg8: memref<1024x8xf32, #tpu.memory_space<vmem>>, %arg9: memref<1024x1xf32, #tpu.memory_space<vmem>>, %arg10: memref<32x32xf32, #tpu.memory_space<vmem>>, %arg11: memref<1x32xf32, #tpu.memory_space<vmem>>, %arg12: memref<32x1xf32, #tpu.memory_space<vmem>>, %arg13: memref<32x32xf32, #tpu.memory_space<vmem>>, %arg14: memref<32x32xf32, #tpu.memory_space<vmem>>, %arg15: memref<32x32xf32, #tpu.memory_space<vmem>>, %arg16: memref<128x32xf32, #tpu.memory_space<vmem>>, %arg17: memref<128x32xf32, #tpu.memory_space<vmem>>) attributes {dimension_semantics = [#tpu.dimension_semantics<arbitrary>, #tpu.dimension_semantics<arbitrary>], iteration_bounds = array<i64: 4, 1>, scalar_prefetch = 2 : i64, scratch_operands = 4 : i64, tpu.core_type = #tpu.core_type<tc>, window_params = [{pipeline_mode = #tpu.pipeline_mode<synchronous>, transform_indices = @transform_0, window_bounds = array<i64: 32, 32>}, {transform_indices = @transform_1, window_bounds = array<i64: 8, 128>}, {pipeline_mode = #tpu.pipeline_mode<synchronous>, transform_indices = @transform_2, window_bounds = array<i64: 8, 8>}, {pipeline_mode = #tpu.pipeline_mode<synchronous>, transform_indices = @transform_3, window_bounds = array<i64: 8, 1>}, {pipeline_mode = #tpu.pipeline_mode<synchronous>, transform_indices = @transform_4, window_bounds = array<i64: 1024, 8>}, {pipeline_mode = #tpu.pipeline_mode<synchronous>, transform_indices = @transform_5, window_bounds = array<i64: 1024, 1>}, {pipeline_mode = #tpu.pipeline_mode<synchronous>, transform_indices = @transform_6, window_bounds = array<i64: 32, 32>}, {pipeline_mode = #tpu.pipeline_mode<synchronous>, transform_indices = @transform_7, window_bounds = array<i64: 1, 32>}, {pipeline_mode = #tpu.pipeline_mode<synchronous>, transform_indices = @transform_8, window_bounds = array<i64: 32, 1>}, {pipeline_mode = #tpu.pipeline_mode<synchronous>, transform_indices = @transform_9, window_bounds = array<i64: 32, 32>}]} {
    %c0_i32 = arith.constant 0 : i32
    %0 = arith.cmpi eq, %arg0, %c0_i32 : i32
    %c0_i32_0 = arith.constant 0 : i32
    %1 = arith.cmpi eq, %arg1, %c0_i32_0 : i32
    %2 = arith.andi %0, %1 : i1
    %3 = arith.extui %2 : i1 to i32
    %c0_i32_1 = arith.constant 0 : i32
    %4 = arith.cmpi ne, %3, %c0_i32_1 : i32
    scf.if %4 {
      %c0_29 = arith.constant 0 : index
      %c0_30 = arith.constant 0 : index
      %192 = vector.load %arg4[%c0_29, %c0_30] : memref<32x32xf32, #tpu.memory_space<vmem>>, vector<32x32xf32>
      %c0_31 = arith.constant 0 : index
      %c0_32 = arith.constant 0 : index
      %193 = vector.load %arg14[%c0_31, %c0_32] : memref<32x32xf32, #tpu.memory_space<vmem>>, vector<32x32xf32>
      tpu.vector_store %arg14[%c0_31, %c0_32], %192 {strides = array<i32>} : memref<32x32xf32, #tpu.memory_space<vmem>>, vector<32x32xf32>,
    } else {
    }
    %c0_i32_2 = arith.constant 0 : i32
    %5 = arith.cmpi eq, %arg1, %c0_i32_2 : i32
    %6 = arith.extui %5 : i1 to i32
    %c0_i32_3 = arith.constant 0 : i32
    %7 = arith.cmpi ne, %6, %c0_i32_3 : i32
    scf.if %7 {
      %cst_29 = arith.constant 0.000000e+00 : f32
      %192 = vector.broadcast %cst_29 : f32 to vector<32x32xf32>
      %c0_30 = arith.constant 0 : index
      %c0_31 = arith.constant 0 : index
      %193 = vector.load %arg15[%c0_30, %c0_31] : memref<32x32xf32, #tpu.memory_space<vmem>>, vector<32x32xf32>
      tpu.vector_store %arg15[%c0_30, %c0_31], %192 {strides = array<i32>} : memref<32x32xf32, #tpu.memory_space<vmem>>, vector<32x32xf32>,
    } else {
    }
    %c0 = arith.constant 0 : index
    %c0_4 = arith.constant 0 : index
    %8 = vector.load %arg5[%c0, %c0_4] : memref<8x128xf32, #tpu.memory_space<vmem>>, vector<8x128xf32>
    %c0_5 = arith.constant 0 : index
    %c0_6 = arith.constant 0 : index
    %9 = vector.load %arg6[%c0_5, %c0_6] : memref<8x8xf32, #tpu.memory_space<vmem>>, vector<8x8xf32>
    %cst = arith.constant dense<0.000000e+00> : vector<8x128xf32>
    %10 = tpu.matmul %9, %8, %cst {dimension_numbers = #tpu.dot_dimension_numbers<[1], [0], [0], [1], [0, 0, 1, 1], [], []>} : vector<8x8xf32>, vector<8x128xf32>, vector<8x128xf32> -> vector<8x128xf32>
    %c0_7 = arith.constant 0 : index
    %c0_8 = arith.constant 0 : index
    %11 = vector.load %arg7[%c0_7, %c0_8] : memref<8x1xf32, #tpu.memory_space<vmem>>, vector<8x1xf32>
    %12 = vector.broadcast %11 : vector<8x1xf32> to vector<8x128xf32>
    %13 = arith.addf %10, %12 : vector<8x128xf32>
    %cst_9 = arith.constant 0.000000e+00 : f32
    %14 = vector.broadcast %cst_9 : f32 to vector<8x128xf32>
    %15 = arith.maximumf %13, %14 : vector<8x128xf32>
    %c0_10 = arith.constant 0 : index
    %c0_11 = arith.constant 0 : index
    %16 = vector.load %arg8[%c0_10, %c0_11] : memref<1024x8xf32, #tpu.memory_space<vmem>>, vector<1024x8xf32>
    %cst_12 = arith.constant dense<0.000000e+00> : vector<1024x128xf32>
    %17 = tpu.matmul %16, %15, %cst_12 {dimension_numbers = #tpu.dot_dimension_numbers<[1], [0], [0], [1], [0, 0, 1, 1], [], []>} : vector<1024x8xf32>, vector<8x128xf32>, vector<1024x128xf32> -> vector<1024x128xf32>
    %c0_13 = arith.constant 0 : index
    %c0_14 = arith.constant 0 : index
    %18 = vector.load %arg9[%c0_13, %c0_14] : memref<1024x1xf32, #tpu.memory_space<vmem>>, vector<1024x1xf32>
    %19 = vector.broadcast %18 : vector<1024x1xf32> to vector<1024x128xf32>
    %20 = arith.addf %17, %19 : vector<1024x128xf32>
    %c128_i32 = arith.constant 128 : i32
    %21 = arith.muli %arg1, %c128_i32 : i32
    %c0_i32_15 = arith.constant 0 : i32
    %c128_i32_16 = arith.constant 128 : i32
    %22 = arith.addi %c0_i32_15, %c128_i32_16 : i32
    %c1_i32 = arith.constant 1 : i32
    scf.for %arg18 = %c0_i32_15 to %22 step %c1_i32  : i32 {
      %192 = arith.addi %21, %arg18 : i32
      %193 = arith.index_cast %192 : i32 to index
      %194 = memref.load %arg2[%193] : memref<128xi32, #tpu.memory_space<smem>>
      %195 = arith.index_cast %194 : i32 to index
      %c0_29 = arith.constant 0 : index
      %196 = vector.load %arg14[%195, %c0_29] : memref<32x32xf32, #tpu.memory_space<vmem>>, vector<1x32xf32>
      %197 = arith.index_cast %arg18 : i32 to index
      %c0_30 = arith.constant 0 : index
      %198 = vector.load %arg16[%197, %c0_30] : memref<128x32xf32, #tpu.memory_space<vmem>>, vector<1x32xf32>
      tpu.vector_store %arg16[%197, %c0_30], %196 {strides = array<i32>} : memref<128x32xf32, #tpu.memory_space<vmem>>, vector<1x32xf32>,
    }
    %c128_i32_17 = arith.constant 128 : i32
    %c0_18 = arith.constant 0 : index
    %c0_19 = arith.constant 0 : index
    %23 = vector.load %arg16[%c0_18, %c0_19] : memref<128x32xf32, #tpu.memory_space<vmem>>, vector<128x32xf32>
    %24 = tpu.transpose %23, [1, 0] : vector<128x32xf32> -> vector<32x128xf32>
    %cst_20 = arith.constant 0.000000e+00 : f32
    %25 = vector.broadcast %cst_20 : f32 to vector<32x128xf32>
    %26 = vector.extract_strided_slice %24 {offsets = [0, 0], sizes = [1, 128], strides = [1, 1]} : vector<32x128xf32> to vector<1x128xf32>
    %27 = vector.extract_strided_slice %20 {offsets = [0, 0], sizes = [32, 128], strides = [1, 1]} : vector<1024x128xf32> to vector<32x128xf32>
    %28 = vector.broadcast %26 : vector<1x128xf32> to vector<32x128xf32>
    %29 = arith.mulf %28, %27 : vector<32x128xf32>
    %30 = arith.addf %25, %29 : vector<32x128xf32>
    %31 = vector.extract_strided_slice %24 {offsets = [1, 0], sizes = [1, 128], strides = [1, 1]} : vector<32x128xf32> to vector<1x128xf32>
    %32 = vector.extract_strided_slice %20 {offsets = [32, 0], sizes = [32, 128], strides = [1, 1]} : vector<1024x128xf32> to vector<32x128xf32>
    %33 = vector.broadcast %31 : vector<1x128xf32> to vector<32x128xf32>
    %34 = arith.mulf %33, %32 : vector<32x128xf32>
    %35 = arith.addf %30, %34 : vector<32x128xf32>
    %36 = vector.extract_strided_slice %24 {offsets = [2, 0], sizes = [1, 128], strides = [1, 1]} : vector<32x128xf32> to vector<1x128xf32>
    %37 = vector.extract_strided_slice %20 {offsets = [64, 0], sizes = [32, 128], strides = [1, 1]} : vector<1024x128xf32> to vector<32x128xf32>
    %38 = vector.broadcast %36 : vector<1x128xf32> to vector<32x128xf32>
    %39 = arith.mulf %38, %37 : vector<32x128xf32>
    %40 = arith.addf %35, %39 : vector<32x128xf32>
    %41 = vector.extract_strided_slice %24 {offsets = [3, 0], sizes = [1, 128], strides = [1, 1]} : vector<32x128xf32> to vector<1x128xf32>
    %42 = vector.extract_strided_slice %20 {offsets = [96, 0], sizes = [32, 128], strides = [1, 1]} : vector<1024x128xf32> to vector<32x128xf32>
    %43 = vector.broadcast %41 : vector<1x128xf32> to vector<32x128xf32>
    %44 = arith.mulf %43, %42 : vector<32x128xf32>
    %45 = arith.addf %40, %44 : vector<32x128xf32>
    %46 = vector.extract_strided_slice %24 {offsets = [4, 0], sizes = [1, 128], strides = [1, 1]} : vector<32x128xf32> to vector<1x128xf32>
    %47 = vector.extract_strided_slice %20 {offsets = [128, 0], sizes = [32, 128], strides = [1, 1]} : vector<1024x128xf32> to vector<32x128xf32>
    %48 = vector.broadcast %46 : vector<1x128xf32> to vector<32x128xf32>
    %49 = arith.mulf %48, %47 : vector<32x128xf32>
    %50 = arith.addf %45, %49 : vector<32x128xf32>
    %51 = vector.extract_strided_slice %24 {offsets = [5, 0], sizes = [1, 128], strides = [1, 1]} : vector<32x128xf32> to vector<1x128xf32>
    %52 = vector.extract_strided_slice %20 {offsets = [160, 0], sizes = [32, 128], strides = [1, 1]} : vector<1024x128xf32> to vector<32x128xf32>
    %53 = vector.broadcast %51 : vector<1x128xf32> to vector<32x128xf32>
    %54 = arith.mulf %53, %52 : vector<32x128xf32>
    %55 = arith.addf %50, %54 : vector<32x128xf32>
    %56 = vector.extract_strided_slice %24 {offsets = [6, 0], sizes = [1, 128], strides = [1, 1]} : vector<32x128xf32> to vector<1x128xf32>
    %57 = vector.extract_strided_slice %20 {offsets = [192, 0], sizes = [32, 128], strides = [1, 1]} : vector<1024x128xf32> to vector<32x128xf32>
    %58 = vector.broadcast %56 : vector<1x128xf32> to vector<32x128xf32>
    %59 = arith.mulf %58, %57 : vector<32x128xf32>
    %60 = arith.addf %55, %59 : vector<32x128xf32>
    %61 = vector.extract_strided_slice %24 {offsets = [7, 0], sizes = [1, 128], strides = [1, 1]} : vector<32x128xf32> to vector<1x128xf32>
    %62 = vector.extract_strided_slice %20 {offsets = [224, 0], sizes = [32, 128], strides = [1, 1]} : vector<1024x128xf32> to vector<32x128xf32>
    %63 = vector.broadcast %61 : vector<1x128xf32> to vector<32x128xf32>
    %64 = arith.mulf %63, %62 : vector<32x128xf32>
    %65 = arith.addf %60, %64 : vector<32x128xf32>
    %66 = vector.extract_strided_slice %24 {offsets = [8, 0], sizes = [1, 128], strides = [1, 1]} : vector<32x128xf32> to vector<1x128xf32>
    %67 = vector.extract_strided_slice %20 {offsets = [256, 0], sizes = [32, 128], strides = [1, 1]} : vector<1024x128xf32> to vector<32x128xf32>
    %68 = vector.broadcast %66 : vector<1x128xf32> to vector<32x128xf32>
    %69 = arith.mulf %68, %67 : vector<32x128xf32>
    %70 = arith.addf %65, %69 : vector<32x128xf32>
    %71 = vector.extract_strided_slice %24 {offsets = [9, 0], sizes = [1, 128], strides = [1, 1]} : vector<32x128xf32> to vector<1x128xf32>
    %72 = vector.extract_strided_slice %20 {offsets = [288, 0], sizes = [32, 128], strides = [1, 1]} : vector<1024x128xf32> to vector<32x128xf32>
    %73 = vector.broadcast %71 : vector<1x128xf32> to vector<32x128xf32>
    %74 = arith.mulf %73, %72 : vector<32x128xf32>
    %75 = arith.addf %70, %74 : vector<32x128xf32>
    %76 = vector.extract_strided_slice %24 {offsets = [10, 0], sizes = [1, 128], strides = [1, 1]} : vector<32x128xf32> to vector<1x128xf32>
    %77 = vector.extract_strided_slice %20 {offsets = [320, 0], sizes = [32, 128], strides = [1, 1]} : vector<1024x128xf32> to vector<32x128xf32>
    %78 = vector.broadcast %76 : vector<1x128xf32> to vector<32x128xf32>
    %79 = arith.mulf %78, %77 : vector<32x128xf32>
    %80 = arith.addf %75, %79 : vector<32x128xf32>
    %81 = vector.extract_strided_slice %24 {offsets = [11, 0], sizes = [1, 128], strides = [1, 1]} : vector<32x128xf32> to vector<1x128xf32>
    %82 = vector.extract_strided_slice %20 {offsets = [352, 0], sizes = [32, 128], strides = [1, 1]} : vector<1024x128xf32> to vector<32x128xf32>
    %83 = vector.broadcast %81 : vector<1x128xf32> to vector<32x128xf32>
    %84 = arith.mulf %83, %82 : vector<32x128xf32>
    %85 = arith.addf %80, %84 : vector<32x128xf32>
    %86 = vector.extract_strided_slice %24 {offsets = [12, 0], sizes = [1, 128], strides = [1, 1]} : vector<32x128xf32> to vector<1x128xf32>
    %87 = vector.extract_strided_slice %20 {offsets = [384, 0], sizes = [32, 128], strides = [1, 1]} : vector<1024x128xf32> to vector<32x128xf32>
    %88 = vector.broadcast %86 : vector<1x128xf32> to vector<32x128xf32>
    %89 = arith.mulf %88, %87 : vector<32x128xf32>
    %90 = arith.addf %85, %89 : vector<32x128xf32>
    %91 = vector.extract_strided_slice %24 {offsets = [13, 0], sizes = [1, 128], strides = [1, 1]} : vector<32x128xf32> to vector<1x128xf32>
    %92 = vector.extract_strided_slice %20 {offsets = [416, 0], sizes = [32, 128], strides = [1, 1]} : vector<1024x128xf32> to vector<32x128xf32>
    %93 = vector.broadcast %91 : vector<1x128xf32> to vector<32x128xf32>
    %94 = arith.mulf %93, %92 : vector<32x128xf32>
    %95 = arith.addf %90, %94 : vector<32x128xf32>
    %96 = vector.extract_strided_slice %24 {offsets = [14, 0], sizes = [1, 128], strides = [1, 1]} : vector<32x128xf32> to vector<1x128xf32>
    %97 = vector.extract_strided_slice %20 {offsets = [448, 0], sizes = [32, 128], strides = [1, 1]} : vector<1024x128xf32> to vector<32x128xf32>
    %98 = vector.broadcast %96 : vector<1x128xf32> to vector<32x128xf32>
    %99 = arith.mulf %98, %97 : vector<32x128xf32>
    %100 = arith.addf %95, %99 : vector<32x128xf32>
    %101 = vector.extract_strided_slice %24 {offsets = [15, 0], sizes = [1, 128], strides = [1, 1]} : vector<32x128xf32> to vector<1x128xf32>
    %102 = vector.extract_strided_slice %20 {offsets = [480, 0], sizes = [32, 128], strides = [1, 1]} : vector<1024x128xf32> to vector<32x128xf32>
    %103 = vector.broadcast %101 : vector<1x128xf32> to vector<32x128xf32>
    %104 = arith.mulf %103, %102 : vector<32x128xf32>
    %105 = arith.addf %100, %104 : vector<32x128xf32>
    %106 = vector.extract_strided_slice %24 {offsets = [16, 0], sizes = [1, 128], strides = [1, 1]} : vector<32x128xf32> to vector<1x128xf32>
    %107 = vector.extract_strided_slice %20 {offsets = [512, 0], sizes = [32, 128], strides = [1, 1]} : vector<1024x128xf32> to vector<32x128xf32>
    %108 = vector.broadcast %106 : vector<1x128xf32> to vector<32x128xf32>
    %109 = arith.mulf %108, %107 : vector<32x128xf32>
    %110 = arith.addf %105, %109 : vector<32x128xf32>
    %111 = vector.extract_strided_slice %24 {offsets = [17, 0], sizes = [1, 128], strides = [1, 1]} : vector<32x128xf32> to vector<1x128xf32>
    %112 = vector.extract_strided_slice %20 {offsets = [544, 0], sizes = [32, 128], strides = [1, 1]} : vector<1024x128xf32> to vector<32x128xf32>
    %113 = vector.broadcast %111 : vector<1x128xf32> to vector<32x128xf32>
    %114 = arith.mulf %113, %112 : vector<32x128xf32>
    %115 = arith.addf %110, %114 : vector<32x128xf32>
    %116 = vector.extract_strided_slice %24 {offsets = [18, 0], sizes = [1, 128], strides = [1, 1]} : vector<32x128xf32> to vector<1x128xf32>
    %117 = vector.extract_strided_slice %20 {offsets = [576, 0], sizes = [32, 128], strides = [1, 1]} : vector<1024x128xf32> to vector<32x128xf32>
    %118 = vector.broadcast %116 : vector<1x128xf32> to vector<32x128xf32>
    %119 = arith.mulf %118, %117 : vector<32x128xf32>
    %120 = arith.addf %115, %119 : vector<32x128xf32>
    %121 = vector.extract_strided_slice %24 {offsets = [19, 0], sizes = [1, 128], strides = [1, 1]} : vector<32x128xf32> to vector<1x128xf32>
    %122 = vector.extract_strided_slice %20 {offsets = [608, 0], sizes = [32, 128], strides = [1, 1]} : vector<1024x128xf32> to vector<32x128xf32>
    %123 = vector.broadcast %121 : vector<1x128xf32> to vector<32x128xf32>
    %124 = arith.mulf %123, %122 : vector<32x128xf32>
    %125 = arith.addf %120, %124 : vector<32x128xf32>
    %126 = vector.extract_strided_slice %24 {offsets = [20, 0], sizes = [1, 128], strides = [1, 1]} : vector<32x128xf32> to vector<1x128xf32>
    %127 = vector.extract_strided_slice %20 {offsets = [640, 0], sizes = [32, 128], strides = [1, 1]} : vector<1024x128xf32> to vector<32x128xf32>
    %128 = vector.broadcast %126 : vector<1x128xf32> to vector<32x128xf32>
    %129 = arith.mulf %128, %127 : vector<32x128xf32>
    %130 = arith.addf %125, %129 : vector<32x128xf32>
    %131 = vector.extract_strided_slice %24 {offsets = [21, 0], sizes = [1, 128], strides = [1, 1]} : vector<32x128xf32> to vector<1x128xf32>
    %132 = vector.extract_strided_slice %20 {offsets = [672, 0], sizes = [32, 128], strides = [1, 1]} : vector<1024x128xf32> to vector<32x128xf32>
    %133 = vector.broadcast %131 : vector<1x128xf32> to vector<32x128xf32>
    %134 = arith.mulf %133, %132 : vector<32x128xf32>
    %135 = arith.addf %130, %134 : vector<32x128xf32>
    %136 = vector.extract_strided_slice %24 {offsets = [22, 0], sizes = [1, 128], strides = [1, 1]} : vector<32x128xf32> to vector<1x128xf32>
    %137 = vector.extract_strided_slice %20 {offsets = [704, 0], sizes = [32, 128], strides = [1, 1]} : vector<1024x128xf32> to vector<32x128xf32>
    %138 = vector.broadcast %136 : vector<1x128xf32> to vector<32x128xf32>
    %139 = arith.mulf %138, %137 : vector<32x128xf32>
    %140 = arith.addf %135, %139 : vector<32x128xf32>
    %141 = vector.extract_strided_slice %24 {offsets = [23, 0], sizes = [1, 128], strides = [1, 1]} : vector<32x128xf32> to vector<1x128xf32>
    %142 = vector.extract_strided_slice %20 {offsets = [736, 0], sizes = [32, 128], strides = [1, 1]} : vector<1024x128xf32> to vector<32x128xf32>
    %143 = vector.broadcast %141 : vector<1x128xf32> to vector<32x128xf32>
    %144 = arith.mulf %143, %142 : vector<32x128xf32>
    %145 = arith.addf %140, %144 : vector<32x128xf32>
    %146 = vector.extract_strided_slice %24 {offsets = [24, 0], sizes = [1, 128], strides = [1, 1]} : vector<32x128xf32> to vector<1x128xf32>
    %147 = vector.extract_strided_slice %20 {offsets = [768, 0], sizes = [32, 128], strides = [1, 1]} : vector<1024x128xf32> to vector<32x128xf32>
    %148 = vector.broadcast %146 : vector<1x128xf32> to vector<32x128xf32>
    %149 = arith.mulf %148, %147 : vector<32x128xf32>
    %150 = arith.addf %145, %149 : vector<32x128xf32>
    %151 = vector.extract_strided_slice %24 {offsets = [25, 0], sizes = [1, 128], strides = [1, 1]} : vector<32x128xf32> to vector<1x128xf32>
    %152 = vector.extract_strided_slice %20 {offsets = [800, 0], sizes = [32, 128], strides = [1, 1]} : vector<1024x128xf32> to vector<32x128xf32>
    %153 = vector.broadcast %151 : vector<1x128xf32> to vector<32x128xf32>
    %154 = arith.mulf %153, %152 : vector<32x128xf32>
    %155 = arith.addf %150, %154 : vector<32x128xf32>
    %156 = vector.extract_strided_slice %24 {offsets = [26, 0], sizes = [1, 128], strides = [1, 1]} : vector<32x128xf32> to vector<1x128xf32>
    %157 = vector.extract_strided_slice %20 {offsets = [832, 0], sizes = [32, 128], strides = [1, 1]} : vector<1024x128xf32> to vector<32x128xf32>
    %158 = vector.broadcast %156 : vector<1x128xf32> to vector<32x128xf32>
    %159 = arith.mulf %158, %157 : vector<32x128xf32>
    %160 = arith.addf %155, %159 : vector<32x128xf32>
    %161 = vector.extract_strided_slice %24 {offsets = [27, 0], sizes = [1, 128], strides = [1, 1]} : vector<32x128xf32> to vector<1x128xf32>
    %162 = vector.extract_strided_slice %20 {offsets = [864, 0], sizes = [32, 128], strides = [1, 1]} : vector<1024x128xf32> to vector<32x128xf32>
    %163 = vector.broadcast %161 : vector<1x128xf32> to vector<32x128xf32>
    %164 = arith.mulf %163, %162 : vector<32x128xf32>
    %165 = arith.addf %160, %164 : vector<32x128xf32>
    %166 = vector.extract_strided_slice %24 {offsets = [28, 0], sizes = [1, 128], strides = [1, 1]} : vector<32x128xf32> to vector<1x128xf32>
    %167 = vector.extract_strided_slice %20 {offsets = [896, 0], sizes = [32, 128], strides = [1, 1]} : vector<1024x128xf32> to vector<32x128xf32>
    %168 = vector.broadcast %166 : vector<1x128xf32> to vector<32x128xf32>
    %169 = arith.mulf %168, %167 : vector<32x128xf32>
    %170 = arith.addf %165, %169 : vector<32x128xf32>
    %171 = vector.extract_strided_slice %24 {offsets = [29, 0], sizes = [1, 128], strides = [1, 1]} : vector<32x128xf32> to vector<1x128xf32>
    %172 = vector.extract_strided_slice %20 {offsets = [928, 0], sizes = [32, 128], strides = [1, 1]} : vector<1024x128xf32> to vector<32x128xf32>
    %173 = vector.broadcast %171 : vector<1x128xf32> to vector<32x128xf32>
    %174 = arith.mulf %173, %172 : vector<32x128xf32>
    %175 = arith.addf %170, %174 : vector<32x128xf32>
    %176 = vector.extract_strided_slice %24 {offsets = [30, 0], sizes = [1, 128], strides = [1, 1]} : vector<32x128xf32> to vector<1x128xf32>
    %177 = vector.extract_strided_slice %20 {offsets = [960, 0], sizes = [32, 128], strides = [1, 1]} : vector<1024x128xf32> to vector<32x128xf32>
    %178 = vector.broadcast %176 : vector<1x128xf32> to vector<32x128xf32>
    %179 = arith.mulf %178, %177 : vector<32x128xf32>
    %180 = arith.addf %175, %179 : vector<32x128xf32>
    %181 = vector.extract_strided_slice %24 {offsets = [31, 0], sizes = [1, 128], strides = [1, 1]} : vector<32x128xf32> to vector<1x128xf32>
    %182 = vector.extract_strided_slice %20 {offsets = [992, 0], sizes = [32, 128], strides = [1, 1]} : vector<1024x128xf32> to vector<32x128xf32>
    %183 = vector.broadcast %181 : vector<1x128xf32> to vector<32x128xf32>
    %184 = arith.mulf %183, %182 : vector<32x128xf32>
    %185 = arith.addf %180, %184 : vector<32x128xf32>
    %186 = tpu.transpose %185, [1, 0] : vector<32x128xf32> -> vector<128x32xf32>
    %c0_21 = arith.constant 0 : index
    %c0_22 = arith.constant 0 : index
    %187 = vector.load %arg17[%c0_21, %c0_22] : memref<128x32xf32, #tpu.memory_space<vmem>>, vector<128x32xf32>
    tpu.vector_store %arg17[%c0_21, %c0_22], %186 {strides = array<i32>} : memref<128x32xf32, #tpu.memory_space<vmem>>, vector<128x32xf32>,
    %c0_i32_23 = arith.constant 0 : i32
    %c128_i32_24 = arith.constant 128 : i32
    %188 = arith.addi %c0_i32_23, %c128_i32_24 : i32
    %c1_i32_25 = arith.constant 1 : i32
    scf.for %arg18 = %c0_i32_23 to %188 step %c1_i32_25  : i32 {
      %192 = arith.addi %21, %arg18 : i32
      %193 = arith.index_cast %192 : i32 to index
      %194 = memref.load %arg3[%193] : memref<128xi32, #tpu.memory_space<smem>>
      %195 = arith.index_cast %194 : i32 to index
      %c0_29 = arith.constant 0 : index
      %196 = vector.load %arg15[%195, %c0_29] : memref<32x32xf32, #tpu.memory_space<vmem>>, vector<1x32xf32>
      %197 = arith.index_cast %arg18 : i32 to index
      %c0_30 = arith.constant 0 : index
      %198 = vector.load %arg17[%197, %c0_30] : memref<128x32xf32, #tpu.memory_space<vmem>>, vector<1x32xf32>
      %199 = arith.addf %196, %198 : vector<1x32xf32>
      %200 = arith.index_cast %194 : i32 to index
      %c0_31 = arith.constant 0 : index
      %201 = vector.load %arg15[%200, %c0_31] : memref<32x32xf32, #tpu.memory_space<vmem>>, vector<1x32xf32>
      tpu.vector_store %arg15[%200, %c0_31], %199 {strides = array<i32>} : memref<32x32xf32, #tpu.memory_space<vmem>>, vector<1x32xf32>,
    }
    %c128_i32_26 = arith.constant 128 : i32
    %c0_i32_27 = arith.constant 0 : i32
    %189 = arith.cmpi eq, %arg1, %c0_i32_27 : i32
    %190 = arith.extui %189 : i1 to i32
    %c0_i32_28 = arith.constant 0 : i32
    %191 = arith.cmpi ne, %190, %c0_i32_28 : i32
    scf.if %191 {
      %c0_29 = arith.constant 0 : index
      %c0_30 = arith.constant 0 : index
      %192 = vector.load %arg15[%c0_29, %c0_30] : memref<32x32xf32, #tpu.memory_space<vmem>>, vector<32x32xf32>
      %c0_31 = arith.constant 0 : index
      %c0_32 = arith.constant 0 : index
      %193 = vector.load %arg12[%c0_31, %c0_32] : memref<32x1xf32, #tpu.memory_space<vmem>>, vector<32x1xf32>
      %194 = vector.broadcast %193 : vector<32x1xf32> to vector<32x32xf32>
      %195 = arith.mulf %192, %194 : vector<32x32xf32>
      %c0_33 = arith.constant 0 : index
      %c0_34 = arith.constant 0 : index
      %196 = vector.load %arg14[%c0_33, %c0_34] : memref<32x32xf32, #tpu.memory_space<vmem>>, vector<32x32xf32>
      %c0_35 = arith.constant 0 : index
      %c0_36 = arith.constant 0 : index
      %197 = vector.load %arg10[%c0_35, %c0_36] : memref<32x32xf32, #tpu.memory_space<vmem>>, vector<32x32xf32>
      %cst_37 = arith.constant dense<0.000000e+00> : vector<32x32xf32>
      %198 = tpu.matmul %196, %197, %cst_37 {dimension_numbers = #tpu.dot_dimension_numbers<[1], [0], [0], [1], [0, 0, 1, 1], [], []>} : vector<32x32xf32>, vector<32x32xf32>, vector<32x32xf32> -> vector<32x32xf32>
      %199 = arith.addf %198, %195 : vector<32x32xf32>
      %c0_38 = arith.constant 0 : index
      %c0_39 = arith.constant 0 : index
      %200 = vector.load %arg11[%c0_38, %c0_39] : memref<1x32xf32, #tpu.memory_space<vmem>>, vector<1x32xf32>
      %201 = vector.broadcast %200 : vector<1x32xf32> to vector<32x32xf32>
      %202 = arith.addf %199, %201 : vector<32x32xf32>
      %cst_40 = arith.constant 0.000000e+00 : f32
      %203 = vector.broadcast %cst_40 : f32 to vector<32x32xf32>
      %204 = arith.maximumf %202, %203 : vector<32x32xf32>
      %c0_41 = arith.constant 0 : index
      %c0_42 = arith.constant 0 : index
      %205 = vector.load %arg14[%c0_41, %c0_42] : memref<32x32xf32, #tpu.memory_space<vmem>>, vector<32x32xf32>
      tpu.vector_store %arg14[%c0_41, %c0_42], %204 {strides = array<i32>} : memref<32x32xf32, #tpu.memory_space<vmem>>, vector<32x32xf32>,
      %c0_43 = arith.constant 0 : index
      %c0_44 = arith.constant 0 : index
      %206 = vector.load %arg13[%c0_43, %c0_44] : memref<32x32xf32, #tpu.memory_space<vmem>>, vector<32x32xf32>
      tpu.vector_store %arg13[%c0_43, %c0_44], %204 {strides = array<i32>} : memref<32x32xf32, #tpu.memory_space<vmem>>, vector<32x32xf32>,
    } else {
    }
    return
  }
  func.func @transform_0(%arg0: i32, %arg1: i32, %arg2: memref<128xi32, #tpu.memory_space<smem>>, %arg3: memref<128xi32, #tpu.memory_space<smem>>) -> (i32, i32) {
    %c0_i32 = arith.constant 0 : i32
    %c0_i32_0 = arith.constant 0 : i32
    %c0_i32_1 = arith.constant 0 : i32
    return %c0_i32, %c0_i32_0 : i32, i32
  }
  func.func @transform_1(%arg0: i32, %arg1: i32, %arg2: memref<128xi32, #tpu.memory_space<smem>>, %arg3: memref<128xi32, #tpu.memory_space<smem>>) -> (i32, i32) {
    %c0_i32 = arith.constant 0 : i32
    %c0_i32_0 = arith.constant 0 : i32
    return %c0_i32, %arg1 : i32, i32
  }
  func.func @transform_2(%arg0: i32, %arg1: i32, %arg2: memref<128xi32, #tpu.memory_space<smem>>, %arg3: memref<128xi32, #tpu.memory_space<smem>>) -> (i32, i32) {
    %c0_i32 = arith.constant 0 : i32
    %c0_i32_0 = arith.constant 0 : i32
    %c0_i32_1 = arith.constant 0 : i32
    return %c0_i32, %c0_i32_0 : i32, i32
  }
  func.func @transform_3(%arg0: i32, %arg1: i32, %arg2: memref<128xi32, #tpu.memory_space<smem>>, %arg3: memref<128xi32, #tpu.memory_space<smem>>) -> (i32, i32) {
    %c0_i32 = arith.constant 0 : i32
    %c0_i32_0 = arith.constant 0 : i32
    %c0_i32_1 = arith.constant 0 : i32
    return %c0_i32, %c0_i32_0 : i32, i32
  }
  func.func @transform_4(%arg0: i32, %arg1: i32, %arg2: memref<128xi32, #tpu.memory_space<smem>>, %arg3: memref<128xi32, #tpu.memory_space<smem>>) -> (i32, i32) {
    %c0_i32 = arith.constant 0 : i32
    %c0_i32_0 = arith.constant 0 : i32
    %c0_i32_1 = arith.constant 0 : i32
    return %c0_i32, %c0_i32_0 : i32, i32
  }
  func.func @transform_5(%arg0: i32, %arg1: i32, %arg2: memref<128xi32, #tpu.memory_space<smem>>, %arg3: memref<128xi32, #tpu.memory_space<smem>>) -> (i32, i32) {
    %c0_i32 = arith.constant 0 : i32
    %c0_i32_0 = arith.constant 0 : i32
    %c0_i32_1 = arith.constant 0 : i32
    return %c0_i32, %c0_i32_0 : i32, i32
  }
  func.func @transform_6(%arg0: i32, %arg1: i32, %arg2: memref<128xi32, #tpu.memory_space<smem>>, %arg3: memref<128xi32, #tpu.memory_space<smem>>) -> (i32, i32) {
    %c0_i32 = arith.constant 0 : i32
    %c0_i32_0 = arith.constant 0 : i32
    %c0_i32_1 = arith.constant 0 : i32
    return %c0_i32, %c0_i32_0 : i32, i32
  }
  func.func @transform_7(%arg0: i32, %arg1: i32, %arg2: memref<128xi32, #tpu.memory_space<smem>>, %arg3: memref<128xi32, #tpu.memory_space<smem>>) -> (i32, i32) {
    %c0_i32 = arith.constant 0 : i32
    %c0_i32_0 = arith.constant 0 : i32
    %c0_i32_1 = arith.constant 0 : i32
    return %c0_i32, %c0_i32_0 : i32, i32
  }
  func.func @transform_8(%arg0: i32, %arg1: i32, %arg2: memref<128xi32, #tpu.memory_space<smem>>, %arg3: memref<128xi32, #tpu.memory_space<smem>>) -> (i32, i32) {
    %c0_i32 = arith.constant 0 : i32
    %c0_i32_0 = arith.constant 0 : i32
    %c0_i32_1 = arith.constant 0 : i32
    return %c0_i32, %c0_i32_0 : i32, i32
  }
  func.func @transform_9(%arg0: i32, %arg1: i32, %arg2: memref<128xi32, #tpu.memory_space<smem>>, %arg3: memref<128xi32, #tpu.memory_space<smem>>) -> (i32, i32) {
    %c0_i32 = arith.constant 0 : i32
    %c0_i32_0 = arith.constant 0 : i32
    %c0_i32_1 = arith.constant 0 : i32
    return %c0_i32, %c0_i32_0 : i32, i32
  }
}

</mosaic_0001>

<bundles_post_ra>
// kernel: tpu_custom_call.1
= control target key start
LH: loop header
LB: loop body
LE: loop exit
PB: predicated region body
PF: predicated region fallthrough
CT: control target
= control target key end

     0   :  { %s5788_s0 = inlined_call_operand.vmem [shape: s32[128], index: 0, kind: input, shape index: {}]   ;;  %s5789_s2 = inlined_call_operand.vmem [shape: f32[32,32], index: 2, kind: input, shape index: {}]   ;;  %s5790_s3 = inlined_call_operand.vmem [shape: f32[8,128], index: 3, kind: input, shape index: {}]   ;;  %s5791_s4 = inlined_call_operand.vmem [shape: f32[8,8], index: 4, kind: input, shape index: {}]   ;;  %s5792_s5 = inlined_call_operand.vmem [shape: f32[8,1], index: 5, kind: input, shape index: {}]   ;;  %s5793_s6 = inlined_call_operand.vmem [shape: f32[1024,8], index: 6, kind: input, shape index: {}]   ;;  %s5794_s7 = inlined_call_operand.vmem [shape: f32[1024,1], index: 7, kind: input, shape index: {}]   ;;  %s5795_s8 = inlined_call_operand.vmem [shape: f32[32,32], index: 8, kind: input, shape index: {}]   ;;  %s5796_s9 = inlined_call_operand.vmem [shape: f32[1,32], index: 9, kind: input, shape index: {}]   ;;  %s5797_s10 = inlined_call_operand.vmem [shape: f32[32,1], index: 10, kind: input, shape index: {}]   ;;  %s5798_s11 = inlined_call_operand.hbm [shape: f32[32,32], index: 11, kind: output, shape index: {}]   ;;  %s5799_s1 = inlined_call_operand.vmem [shape: s32[128], index: 1, kind: input, shape index: {}]  }
   0x1   :  { %s16_s19 = sshll.u32 %s5788_s0, 4  ;;  %s20_s22 = sshll.u32 %s5799_s1, 4  ;;  %s17_s19 = int_to_ptr.vmem [resolvable:$true] %s16_s19  ;;  %s21_s22 = int_to_ptr.vmem [resolvable:$true] %s20_s22 }
   0x2   :  { %s3742_s23 = scalar_lea.vmem %s17_s19, 16  ;;  %p3747_p1 = scmp.lt.s32.totalorder %s17_s19, %s17_s19 }
   0x3   :  { %p3743_p0 = scmp.ne.s32.totalorder %s17_s19, %s3742_s23  ;;  %p3748_p2 = scmp.lt.s32.totalorder %s3742_s23, %s3742_s23 }
   0x5   :  { %p3749_p3 = por %p3748_p2, %p3747_p1 }
   0x7   :  { %p3750_p4 = pnand %p3749_p3, %p3743_p0 }
   0x9   :  { %3753 = shalt.err (!%p3750_p4)  }
   0xa   :  { %s3838_s24 = smov [#allocation7]   ;;  %s3754_s25 = scalar_lea.vmem %s21_s22, 16 }
   0xb   :  { %19 = dma.vmem_to_smem %s17_s19, 16, %s3838_s24, [#allocation6] }
   0xc   :  { %p3755_p5 = scmp.ne.s32.totalorder %s21_s22, %s3754_s25  ;;  %p3759_p6 = scmp.lt.s32.totalorder %s21_s22, %s21_s22 }
   0xd   :  { %p3760_p7 = scmp.lt.s32.totalorder %s3754_s25, %s3754_s25 }
   0xf   :  { %p3761_p8 = por %p3760_p7, %p3759_p6 }
  0x11   :  { %p3762_p9 = pnand %p3761_p8, %p3755_p5 }
  0x13   :  { %3765 = shalt.err (!%p3762_p9)  }
  0x14   :  { %s3839_s0 = smov [#allocation8]  }
  0x15   :  { %23 = dma.vmem_to_smem %s21_s22, 16, %s3839_s0, [#allocation6] }
  0x16   :  { %3812 = dma.done.wait [#allocation6], 32 }
  0x17   :  { %3813 = vsyncadd [#allocation6], 4294967264 }
  0x18   :  { %25 = sfence }
  0x19   :  { %26 = vsyncpa [#allocation10], 0  ;;  %s3912_s1 = smov 0   ;;  %s3914_s26 = smov 0  }
  0x1a   :  { %s3916_s27 = smov 0  }
  0x1b LB: > { %s3178_s28 = sadd.s32 4294967295, %s3828_s27   ;;  %s44_s29 = sadd.s32 1, %s3824_s26  ;;  %s3828_s27 = sphi %s3916_s27, %s32_s27   ;;  %s3824_s26 = sphi %s3914_s26, %s6059_s26   ;;  %s3820_s1 = sphi %s3912_s1, %s6058_s1  }
  0x1c   : > { %p46_p10 = scmp.ge.s32.totalorder %s44_s29, 4  ;;  %p3181_p11 = scmp.ge.s32.totalorder %s3828_s27, 1 }
  0x1d   : > { %p306_p12 = scmp.lt.s32.totalorder %s3828_s27, 5 }
  0x1e   : > { %s6061_s29 = smov (%p46_p10, %s44_s29), 0 }
  0x1f   : > { %p307_p13 = pnand %p3181_p11, %p306_p12 }
  0x21   : > { %310 = sbr.rel (%p307_p13) target bundleno = 1279 (0x4ff), region = 56 }
  0x28   : > { %p340_p0 = scmp.eq.s32.totalorder %s3820_s1, 0 }
  0x29   : > { %v346_v0 = vld [vmem:[%s5789_s2] sm:$0xff] (%p340_p0)  ;;  %vm350_vm0 = vcmask (%p340_p0), 261120   ;;  %v347_v1 = vld [vmem:[%s5789_s2 + $0x8] sm:$0xff] (%p340_p0)  ;;  %v348_v2 = vld [vmem:[%s5789_s2 + $0x10] sm:$0xff] (%p340_p0) }
  0x2a   : > { %345 = sbr.rel (!%p340_p0) target bundleno = 49 (0x31), region = 60  ;;  %351 = vst.msk [vmem:[#allocation2] sm:$0xff] (%p340_p0), %vm350_vm0, %v346_v0  ;;  %352 = vst.msk [vmem:[#allocation2 + $0x8] sm:$0xff] (%p340_p0), %vm350_vm0, %v347_v1  ;;  %v349_v3 = vld [vmem:[%s5789_s2 + $0x18] sm:$0xff] (%p340_p0) }
  0x2b   : > { %353 = vst.msk [vmem:[#allocation2 + $0x10] sm:$0xff] (%p340_p0), %vm350_vm0, %v348_v2  ;;  %354 = vst.msk [vmem:[#allocation2 + $0x18] sm:$0xff] (%p340_p0), %vm350_vm0, %v349_v3 }
  0x31 PF: > { %vm358_vm1 = vcmask 261120   ;;  %v575_v4 = vld [vmem:[%s5794_s7 + $0x8] sm:$0xff]  ;;  %v365_v5 = vld [vmem:[%s5792_s5] sm:$0xff]  ;;  %v5800_v7 = vmov 0   ;;  %v3841_v8 = vmov 0.0   ;;  %vm371_vm2 = vcmask 64512  }
  0x32   : > { %v363_v6 = vld [vmem:[%s5790_s3] sm:$0xff]  ;;  %3739 = vset.pattern.permute.xlu1 %v5800_v7  ;;  %3738 = vset.pattern.permute.xlu0 %v5800_v7  ;;  %359 = vst.msk [vmem:[#allocation3] sm:$0xff] %vm358_vm1, %v3841_v8  ;;  %360 = vst.msk [vmem:[#allocation3 + $0x8] sm:$0xff] %vm358_vm1, %v3841_v8  ;;  %v576_v10 = vld [vmem:[%s5794_s7 + $0x10] sm:$0xff]  ;;  %vm3842_vm3 = vmmov 0   ;;  %s3830_s1 = smov 0  }
  0x33   : > { %361 = vst.msk [vmem:[#allocation3 + $0x10] sm:$0xff] %vm358_vm1, %v3841_v8  ;;  %362 = vst.msk [vmem:[#allocation3 + $0x18] sm:$0xff] %vm358_vm1, %v3841_v8  ;;  %3461 = vmatprep.subr.mxu0 %v3841_v8  ;;  %709 = vperm.xlu1 %3739, %v575_v4   ;;  %v364_v9 = vld [vmem:[%s5791_s4] sm:$0xff]  ;;  %v577_v13 = vld [vmem:[%s5794_s7 + $0x18] sm:$0xff] }
  0x34   : > { %368 = vperm.xlu0 %3738, %v365_v5   ;;  %3462 = vmatpush3.msra.mxu0 %v363_v6  ;;  %v574_v11 = vld [vmem:[%s5794_s7] sm:$0xff]  ;;  %v580_v14 = vld [vmem:[%s5794_s7 + $0x30] sm:$0xff]  ;;  %v579_v15 = vld [vmem:[%s5794_s7 + $0x28] sm:$0xff] }
  0x35   : > { %3463 = vmatprep.mubr.msk.f32.mxu0 %vm3842_vm3, %v3841_v8  ;;  %v578_v12 = vld [vmem:[%s5794_s7 + $0x20] sm:$0xff]  ;;  %v581_v17 = vld [vmem:[%s5794_s7 + $0x38] sm:$0xff]  ;;  %v584_v18 = vld [vmem:[%s5794_s7 + $0x50] sm:$0xff] }
  0x36   : > { %3464 = vmatmul.mubr.msk.f32.vlgmr.msra.gmra.mrb[0].mxu0 %vm371_vm2, %v364_v9  ;;  %v582_v16 = vld [vmem:[%s5794_s7 + $0x40] sm:$0xff]  ;;  %v583_v19 = vld [vmem:[%s5794_s7 + $0x48] sm:$0xff]  ;;  %v585_v21 = vld [vmem:[%s5794_s7 + $0x58] sm:$0xff] }
  0x37   : > { %714 = vperm.xlu1 %3739, %v576_v10   ;;  %v586_v20 = vld [vmem:[%s5794_s7 + $0x60] sm:$0xff]  ;;  %v588_v22 = vld [vmem:[%s5794_s7 + $0x70] sm:$0xff]  ;;  %v587_v23 = vld [vmem:[%s5794_s7 + $0x68] sm:$0xff] }
  0x38   : > { %704 = vperm.xlu0 %3738, %v574_v11   ;;  %v590_v24 = vld [vmem:[%s5794_s7 + $0x80] sm:$0xff]  ;;  %v589_v25 = vld [vmem:[%s5794_s7 + $0x78] sm:$0xff]  ;;  %v592_v26 = vld [vmem:[%s5794_s7 + $0x90] sm:$0xff] }
  0x39   : > { %v591_v27 = vld [vmem:[%s5794_s7 + $0x88] sm:$0xff]  ;;  %v594_v28 = vld [vmem:[%s5794_s7 + $0xa0] sm:$0xff]  ;;  %v593_v29 = vld [vmem:[%s5794_s7 + $0x98] sm:$0xff] }
  0x3a   : > { %v596_v30 = vld [vmem:[%s5794_s7 + $0xb0] sm:$0xff]  ;;  %v595_v31 = vld [vmem:[%s5794_s7 + $0xa8] sm:$0xff]  ;;  %v598_v32 = vld [vmem:[%s5794_s7 + $0xc0] sm:$0xff] }
  0x3b   : > { %724 = vperm.xlu1 %3739, %v578_v12   ;;  %v597_v33 = vld [vmem:[%s5794_s7 + $0xb8] sm:$0xff]  ;;  %v600_v34 = vld [vmem:[%s5794_s7 + $0xd0] sm:$0xff]  ;;  %v599_v35 = vld [vmem:[%s5794_s7 + $0xc8] sm:$0xff] }
  0x3c   : > { %719 = vperm.xlu0 %3738, %v577_v13   ;;  %v602_v36 = vld [vmem:[%s5794_s7 + $0xe0] sm:$0xff]  ;;  %v601_v37 = vld [vmem:[%s5794_s7 + $0xd8] sm:$0xff]  ;;  %v604_v38 = vld [vmem:[%s5794_s7 + $0xf0] sm:$0xff] }
  0x3d   : > { %v603_v39 = vld [vmem:[%s5794_s7 + $0xe8] sm:$0xff]  ;;  %v606_v40 = vld [vmem:[%s5794_s7 + $0x100] sm:$0xff]  ;;  %v605_v41 = vld [vmem:[%s5794_s7 + $0xf8] sm:$0xff] }
  0x3e   : > { %v608_v42 = vld [vmem:[%s5794_s7 + $0x110] sm:$0xff]  ;;  %v607_v43 = vld [vmem:[%s5794_s7 + $0x108] sm:$0xff]  ;;  %v610_v44 = vld [vmem:[%s5794_s7 + $0x120] sm:$0xff] }
  0x3f   : > { %734 = vperm.xlu1 %3739, %v580_v14   ;;  %v609_v45 = vld [vmem:[%s5794_s7 + $0x118] sm:$0xff]  ;;  %v612_v46 = vld [vmem:[%s5794_s7 + $0x130] sm:$0xff]  ;;  %v611_v47 = vld [vmem:[%s5794_s7 + $0x128] sm:$0xff] }
  0x40   : > { %729 = vperm.xlu0 %3738, %v579_v15   ;;  %v614_v48 = vld [vmem:[%s5794_s7 + $0x140] sm:$0xff]  ;;  %v613_v49 = vld [vmem:[%s5794_s7 + $0x138] sm:$0xff]  ;;  %v616_v50 = vld [vmem:[%s5794_s7 + $0x150] sm:$0xff] }
  0x41   : > { %v615_v51 = vld [vmem:[%s5794_s7 + $0x148] sm:$0xff]  ;;  %v618_v52 = vld [vmem:[%s5794_s7 + $0x160] sm:$0xff]  ;;  %v617_v53 = vld [vmem:[%s5794_s7 + $0x158] sm:$0xff] }
  0x42   : > { %v620_v54 = vld [vmem:[%s5794_s7 + $0x170] sm:$0xff]  ;;  %v619_v55 = vld [vmem:[%s5794_s7 + $0x168] sm:$0xff]  ;;  %v446_v56 = vld [vmem:[%s5793_s6] sm:$0xff] }
  0x43   : > { %744 = vperm.xlu1 %3739, %v582_v16   ;;  %v506_v57 = vld [vmem:[%s5793_s6 + $0x1e0] sm:$0xff]  ;;  %3468 = vmatprep.mubr.msk.f32.mxu0 %vm371_vm2, %v446_v56  ;;  %v621_v59 = vld [vmem:[%s5794_s7 + $0x178] sm:$0xff]  ;;  %v624_v60 = vld [vmem:[%s5794_s7 + $0x190] sm:$0xff] }
  0x44   : > { %739 = vperm.xlu0 %3738, %v581_v17   ;;  %v622_v58 = vld [vmem:[%s5794_s7 + $0x180] sm:$0xff]  ;;  %3558 = vmatprep.mubr.msk.f32.mxu1 %vm371_vm2, %v506_v57  ;;  %v623_v61 = vld [vmem:[%s5794_s7 + $0x188] sm:$0xff]  ;;  %v625_v63 = vld [vmem:[%s5794_s7 + $0x198] sm:$0xff] }
  0x45   : > { %v626_v62 = vld [vmem:[%s5794_s7 + $0x1a0] sm:$0xff]  ;;  %v628_v0 = vld [vmem:[%s5794_s7 + $0x1b0] sm:$0xff]  ;;  %v627_v1 = vld [vmem:[%s5794_s7 + $0x1a8] sm:$0xff] }
  0x46   : > { %v630_v2 = vld [vmem:[%s5794_s7 + $0x1c0] sm:$0xff]  ;;  %v629_v3 = vld [vmem:[%s5794_s7 + $0x1b8] sm:$0xff]  ;;  %v632_v4 = vld [vmem:[%s5794_s7 + $0x1d0] sm:$0xff] }
  0x47   : > { %754 = vperm.xlu1 %3739, %v584_v18   ;;  %v631_v5 = vld [vmem:[%s5794_s7 + $0x1c8] sm:$0xff]  ;;  %v634_v6 = vld [vmem:[%s5794_s7 + $0x1e0] sm:$0xff]  ;;  %v633_v8 = vld [vmem:[%s5794_s7 + $0x1d8] sm:$0xff] }
  0x48   : > { %749 = vperm.xlu0 %3738, %v583_v19   ;;  %v636_v9 = vld [vmem:[%s5794_s7 + $0x1f0] sm:$0xff]  ;;  %v635_v10 = vld [vmem:[%s5794_s7 + $0x1e8] sm:$0xff]  ;;  %v638_v11 = vld [vmem:[%s5794_s7 + $0x200] sm:$0xff] }
  0x49   : > { %v637_v12 = vld [vmem:[%s5794_s7 + $0x1f8] sm:$0xff]  ;;  %v640_v13 = vld [vmem:[%s5794_s7 + $0x210] sm:$0xff]  ;;  %v639_v14 = vld [vmem:[%s5794_s7 + $0x208] sm:$0xff] }
  0x4a   : > { %v642_v15 = vld [vmem:[%s5794_s7 + $0x220] sm:$0xff]  ;;  %v641_v16 = vld [vmem:[%s5794_s7 + $0x218] sm:$0xff]  ;;  %v644_v17 = vld [vmem:[%s5794_s7 + $0x230] sm:$0xff] }
  0x4b   : > { %764 = vperm.xlu1 %3739, %v586_v20   ;;  %v643_v18 = vld [vmem:[%s5794_s7 + $0x228] sm:$0xff]  ;;  %v646_v19 = vld [vmem:[%s5794_s7 + $0x240] sm:$0xff]  ;;  %v645_v20 = vld [vmem:[%s5794_s7 + $0x238] sm:$0xff] }
  0x4c   : > { %759 = vperm.xlu0 %3738, %v585_v21   ;;  %v648_v21 = vld [vmem:[%s5794_s7 + $0x250] sm:$0xff]  ;;  %v670_v56 = vld [vmem:[%s5794_s7 + $0x300] sm:$0xff]  ;;  %v669_v57 = vld [vmem:[%s5794_s7 + $0x2f8] sm:$0xff] }
  0x4f   : > { %774 = vperm.xlu1 %3739, %v588_v22   ;;  %v647_v22 = vld [vmem:[%s5794_s7 + $0x248] sm:$0xff] }
  0x50   : > { %769 = vperm.xlu0 %3738, %v587_v23   ;;  %v650_v23 = vld [vmem:[%s5794_s7 + $0x260] sm:$0xff] }
  0x53   : > { %784 = vperm.xlu1 %3739, %v590_v24   ;;  %v649_v24 = vld [vmem:[%s5794_s7 + $0x258] sm:$0xff] }
  0x54   : > { %779 = vperm.xlu0 %3738, %v589_v25  }
  0x57   : > { %794 = vperm.xlu1 %3739, %v592_v26   ;;  %v652_v26 = vld [vmem:[%s5794_s7 + $0x270] sm:$0xff] }
  0x58   : > { %789 = vperm.xlu0 %3738, %v591_v27   ;;  %v651_v27 = vld [vmem:[%s5794_s7 + $0x268] sm:$0xff] }
  0x5b   : > { %804 = vperm.xlu1 %3739, %v594_v28   ;;  %v654_v28 = vld [vmem:[%s5794_s7 + $0x280] sm:$0xff] }
  0x5c   : > { %799 = vperm.xlu0 %3738, %v593_v29   ;;  %v653_v29 = vld [vmem:[%s5794_s7 + $0x278] sm:$0xff] }
  0x5f   : > { %814 = vperm.xlu1 %3739, %v596_v30  }
  0x60   : > { %809 = vperm.xlu0 %3738, %v595_v31  }
  0x63   : > { %824 = vperm.xlu1 %3739, %v598_v32   ;;  %v656_v32 = vld [vmem:[%s5794_s7 + $0x290] sm:$0xff] }
  0x64   : > { %819 = vperm.xlu0 %3738, %v597_v33   ;;  %v655_v33 = vld [vmem:[%s5794_s7 + $0x288] sm:$0xff] }
  0x67   : > { %834 = vperm.xlu1 %3739, %v600_v34  }
  0x68   : > { %829 = vperm.xlu0 %3738, %v599_v35  }
  0x6b   : > { %844 = vperm.xlu1 %3739, %v602_v36   ;;  %v658_v36 = vld [vmem:[%s5794_s7 + $0x2a0] sm:$0xff] }
  0x6c   : > { %839 = vperm.xlu0 %3738, %v601_v37   ;;  %v657_v37 = vld [vmem:[%s5794_s7 + $0x298] sm:$0xff] }
  0x6f   : > { %854 = vperm.xlu1 %3739, %v604_v38   ;;  %v660_v38 = vld [vmem:[%s5794_s7 + $0x2b0] sm:$0xff] }
  0x70   : > { %849 = vperm.xlu0 %3738, %v603_v39   ;;  %v659_v39 = vld [vmem:[%s5794_s7 + $0x2a8] sm:$0xff] }
  0x73   : > { %864 = vperm.xlu1 %3739, %v606_v40  }
  0x74   : > { %859 = vperm.xlu0 %3738, %v605_v41  }
  0x77   : > { %874 = vperm.xlu1 %3739, %v608_v42   ;;  %v662_v42 = vld [vmem:[%s5794_s7 + $0x2c0] sm:$0xff] }
  0x78   : > { %869 = vperm.xlu0 %3738, %v607_v43   ;;  %v661_v43 = vld [vmem:[%s5794_s7 + $0x2b8] sm:$0xff] }
  0x7b   : > { %884 = vperm.xlu1 %3739, %v610_v44  }
  0x7c   : > { %879 = vperm.xlu0 %3738, %v609_v45  }
  0x7f   : > { %894 = vperm.xlu1 %3739, %v612_v46   ;;  %v664_v46 = vld [vmem:[%s5794_s7 + $0x2d0] sm:$0xff] }
  0x80   : > { %889 = vperm.xlu0 %3738, %v611_v47   ;;  %v663_v47 = vld [vmem:[%s5794_s7 + $0x2c8] sm:$0xff] }
  0x83   : > { %904 = vperm.xlu1 %3739, %v614_v48   ;;  %v666_v48 = vld [vmem:[%s5794_s7 + $0x2e0] sm:$0xff] }
  0x84   : > { %899 = vperm.xlu0 %3738, %v613_v49   ;;  %v665_v49 = vld [vmem:[%s5794_s7 + $0x2d8] sm:$0xff] }
  0x87   : > { %914 = vperm.xlu1 %3739, %v616_v50  }
  0x88   : > { %909 = vperm.xlu0 %3738, %v615_v51  }
  0x8b   : > { %924 = vperm.xlu1 %3739, %v618_v52   ;;  %v668_v52 = vld [vmem:[%s5794_s7 + $0x2f0] sm:$0xff] }
  0x8c   : > { %919 = vperm.xlu0 %3738, %v617_v53   ;;  %v667_v53 = vld [vmem:[%s5794_s7 + $0x2e8] sm:$0xff] }
  0x8f   : > { %934 = vperm.xlu1 %3739, %v620_v54  }
  0x90   : > { %929 = vperm.xlu0 %3738, %v619_v55  }
  0x93   : > { %944 = vperm.xlu1 %3739, %v622_v58   ;;  %v672_v58 = vld [vmem:[%s5794_s7 + $0x310] sm:$0xff] }
  0x94   : > { %939 = vperm.xlu0 %3738, %v621_v59   ;;  %v671_v59 = vld [vmem:[%s5794_s7 + $0x308] sm:$0xff] }
  0x97   : > { %954 = vperm.xlu1 %3739, %v624_v60  }
  0x98   : > { %949 = vperm.xlu0 %3738, %v623_v61  }
  0x9b   : > { %964 = vperm.xlu1 %3739, %v626_v62   ;;  %v674_v62 = vld [vmem:[%s5794_s7 + $0x320] sm:$0xff] }
  0x9c   : > { %959 = vperm.xlu0 %3738, %v625_v63   ;;  %v673_v63 = vld [vmem:[%s5794_s7 + $0x318] sm:$0xff] }
  0x9f   : > { %974 = vperm.xlu1 %3739, %v628_v0  }
  0xa0   : > { %969 = vperm.xlu0 %3738, %v627_v1  }
  0xa3   : > { %984 = vperm.xlu1 %3739, %v630_v2   ;;  %v676_v2 = vld [vmem:[%s5794_s7 + $0x330] sm:$0xff] }
  0xa4   : > { %979 = vperm.xlu0 %3738, %v629_v3   ;;  %v675_v3 = vld [vmem:[%s5794_s7 + $0x328] sm:$0xff] }
  0xa7   : > { %994 = vperm.xlu1 %3739, %v632_v4   ;;  %v678_v4 = vld [vmem:[%s5794_s7 + $0x340] sm:$0xff] }
  0xa8   : > { %989 = vperm.xlu0 %3738, %v631_v5   ;;  %v677_v5 = vld [vmem:[%s5794_s7 + $0x338] sm:$0xff] }
  0xab   : > { %1004 = vperm.xlu1 %3739, %v634_v6  }
  0xac   : > { %999 = vperm.xlu0 %3738, %v633_v8  }
  0xaf   : > { %1014 = vperm.xlu1 %3739, %v636_v9   ;;  %v680_v9 = vld [vmem:[%s5794_s7 + $0x350] sm:$0xff] }
  0xb0   : > { %1009 = vperm.xlu0 %3738, %v635_v10   ;;  %v679_v10 = vld [vmem:[%s5794_s7 + $0x348] sm:$0xff] }
  0xb2   : > { %v4212_v30 = vpop.permute.xlu1 %709 }
  0xb3   : > { %1024 = vperm.xlu1 %3739, %v638_v11   ;;  %v4198_v25 = vpop.permute.xlu0 %368 }
  0xb4   : > { %1019 = vperm.xlu0 %3738, %v637_v12  }
  0xb6   : > { %v4222_v34 = vpop.permute.xlu1 %714 }
  0xb7   : > { %1034 = vperm.xlu1 %3739, %v640_v13   ;;  %v4214_v31 = vpop.permute.xlu0 %704  ;;  %v682_v13 = vld [vmem:[%s5794_s7 + $0x360] sm:$0xff] }
  0xb8   : > { %1029 = vperm.xlu0 %3738, %v639_v14  }
  0xba   : > { %v4238_v40 = vpop.permute.xlu1 %724 }
  0xbb   : > { %1044 = vperm.xlu1 %3739, %v642_v15   ;;  %v4224_v35 = vpop.permute.xlu0 %719  ;;  %v681_v15 = vld [vmem:[%s5794_s7 + $0x358] sm:$0xff] }
  0xbc   : > { %1039 = vperm.xlu0 %3738, %v641_v16  }
  0xbe   : > { %v4248_v44 = vpop.permute.xlu1 %734 }
  0xbf   : > { %1054 = vperm.xlu1 %3739, %v644_v17   ;;  %v4240_v41 = vpop.permute.xlu0 %729 }
  0xc0   : > { %1049 = vperm.xlu0 %3738, %v643_v18  }
  0xc2   : > { %v4264_v50 = vpop.permute.xlu1 %744 }
  0xc3   : > { %1064 = vperm.xlu1 %3739, %v646_v19   ;;  %v4250_v45 = vpop.permute.xlu0 %739  ;;  %v447_v19 = vld [vmem:[%s5793_s6 + $0x8] sm:$0xff] }
  0xc4   : > { %1059 = vperm.xlu0 %3738, %v645_v20   ;;  %v507_v20 = vld [vmem:[%s5793_s6 + $0x1e8] sm:$0xff] }
  0xc6   : > { %v4274_v54 = vpop.permute.xlu1 %754 }
  0xc7   : > { %1074 = vperm.xlu1 %3739, %v648_v21   ;;  %v4266_v51 = vpop.permute.xlu0 %749 }
  0xc8   : > { %1069 = vperm.xlu0 %3738, %v647_v22  }
  0xca   : > { %v4290_v60 = vpop.permute.xlu1 %764 }
  0xcb   : > { %1084 = vperm.xlu1 %3739, %v650_v23   ;;  %v4276_v55 = vpop.permute.xlu0 %759  ;;  %v684_v23 = vld [vmem:[%s5794_s7 + $0x370] sm:$0xff] }
  0xcc   : > { %1079 = vperm.xlu0 %3738, %v649_v24   ;;  %v683_v24 = vld [vmem:[%s5794_s7 + $0x368] sm:$0xff] }
  0xce   : > { %v4300_v0 = vpop.permute.xlu1 %774 }
  0xcf   : > { %1094 = vperm.xlu1 %3739, %v652_v26   ;;  %v4292_v61 = vpop.permute.xlu0 %769  ;;  %v508_v26 = vld [vmem:[%s5793_s6 + $0x1f0] sm:$0xff] }
  0xd0   : > { %1089 = vperm.xlu0 %3738, %v651_v27   ;;  %v449_v27 = vld [vmem:[%s5793_s6 + $0x18] sm:$0xff] }
  0xd2   : > { %v4316_v6 = vpop.permute.xlu1 %784 }
  0xd3   : > { %1104 = vperm.xlu1 %3739, %v654_v28   ;;  %v4302_v1 = vpop.permute.xlu0 %779  ;;  %v509_v28 = vld [vmem:[%s5793_s6 + $0x1f8] sm:$0xff] }
  0xd4   : > { %1099 = vperm.xlu0 %3738, %v653_v29   ;;  %v686_v29 = vld [vmem:[%s5794_s7 + $0x380] sm:$0xff] }
  0xd6   : > { %v4326_v11 = vpop.permute.xlu1 %794 }
  0xd7   : > { %1114 = vperm.xlu1 %3739, %v656_v32   ;;  %v4318_v8 = vpop.permute.xlu0 %789  ;;  %v685_v32 = vld [vmem:[%s5794_s7 + $0x378] sm:$0xff] }
  0xd8   : > { %1109 = vperm.xlu0 %3738, %v655_v33   ;;  %v450_v33 = vld [vmem:[%s5793_s6 + $0x20] sm:$0xff] }
  0xda   : > { %v4343_v21 = vpop.permute.xlu1 %804 }
  0xdb   : > { %1124 = vperm.xlu1 %3739, %v658_v36   ;;  %v4328_v12 = vpop.permute.xlu0 %799  ;;  %v510_v36 = vld [vmem:[%s5793_s6 + $0x200] sm:$0xff] }
  0xdc   : > { %1119 = vperm.xlu0 %3738, %v657_v37  }
  0xde   : > { %v4381_v37 = vpop.permute.xlu1 %814 }
  0xdf   : > { %1134 = vperm.xlu1 %3739, %v660_v38   ;;  %v4345_v22 = vpop.permute.xlu0 %809 }
  0xe0   : > { %1129 = vperm.xlu0 %3738, %v659_v39   ;;  %v451_v39 = vld [vmem:[%s5793_s6 + $0x28] sm:$0xff] }
  0xe3   : > { %1144 = vperm.xlu1 %3739, %v662_v42   ;;  %v4383_v38 = vpop.permute.xlu0 %819  ;;  %v511_v42 = vld [vmem:[%s5793_s6 + $0x208] sm:$0xff] }
  0xe4   : > { %1139 = vperm.xlu0 %3738, %v661_v43   ;;  %v688_v43 = vld [vmem:[%s5794_s7 + $0x390] sm:$0xff] }
  0xe7   : > { %1154 = vperm.xlu1 %3739, %v664_v46   ;;  %v687_v46 = vld [vmem:[%s5794_s7 + $0x388] sm:$0xff] }
  0xe8   : > { %1149 = vperm.xlu0 %3738, %v663_v47   ;;  %v452_v47 = vld [vmem:[%s5793_s6 + $0x30] sm:$0xff] }
  0xeb   : > { %1164 = vperm.xlu1 %3739, %v666_v48   ;;  %v512_v48 = vld [vmem:[%s5793_s6 + $0x210] sm:$0xff] }
  0xec   : > { %1159 = vperm.xlu0 %3738, %v665_v49   ;;  %v453_v49 = vld [vmem:[%s5793_s6 + $0x38] sm:$0xff] }
  0xef   : > { %1174 = vperm.xlu1 %3739, %v668_v52   ;;  %v513_v52 = vld [vmem:[%s5793_s6 + $0x218] sm:$0xff] }
  0xf0   : > { %1169 = vperm.xlu0 %3738, %v667_v53   ;;  %v4415_v53 = vpop.permute.xlu1 %824 }
  0xf3   : > { %1184 = vperm.xlu1 %3739, %v670_v56   ;;  %v4417_v56 = vpop.permute.xlu0 %829 }
  0xf4   : > { %1179 = vperm.xlu0 %3738, %v669_v57   ;;  %v690_v57 = vld [vmem:[%s5794_s7 + $0x3a0] sm:$0xff] }
  0xf7   : > { %1194 = vperm.xlu1 %3739, %v672_v58   ;;  %v689_v58 = vld [vmem:[%s5794_s7 + $0x398] sm:$0xff] }
  0xf8   : > { %1189 = vperm.xlu0 %3738, %v671_v59   ;;  %v454_v59 = vld [vmem:[%s5793_s6 + $0x40] sm:$0xff] }
  0xfb   : > { %1204 = vperm.xlu1 %3739, %v674_v62   ;;  %v514_v62 = vld [vmem:[%s5793_s6 + $0x220] sm:$0xff] }
  0xfc   : > { %1199 = vperm.xlu0 %3738, %v673_v63   ;;  %v455_v63 = vld [vmem:[%s5793_s6 + $0x48] sm:$0xff] }
  0xff   : > { %1214 = vperm.xlu1 %3739, %v676_v2   ;;  %v515_v2 = vld [vmem:[%s5793_s6 + $0x228] sm:$0xff] }
 0x100   : > { %1209 = vperm.xlu0 %3738, %v675_v3   ;;  %v692_v3 = vld [vmem:[%s5794_s7 + $0x3b0] sm:$0xff] }
 0x103   : > { %1224 = vperm.xlu1 %3739, %v678_v4   ;;  %v691_v4 = vld [vmem:[%s5794_s7 + $0x3a8] sm:$0xff] }
 0x104   : > { %1219 = vperm.xlu0 %3738, %v677_v5   ;;  %v456_v5 = vld [vmem:[%s5793_s6 + $0x50] sm:$0xff] }
 0x107   : > { %1234 = vperm.xlu1 %3739, %v680_v9   ;;  %v516_v9 = vld [vmem:[%s5793_s6 + $0x230] sm:$0xff] }
 0x108   : > { %1229 = vperm.xlu0 %3738, %v679_v10   ;;  %v4455_v10 = vpop.permute.xlu1 %834 }
 0x109   : > { %v441_v14 = vpop.f32.mrb[0].mxu0  ;;  %5802 = vst [vmem:[#allocation13_spill] sm:$0xff] %v4455_v10 }
 0x10a   : > { %v442_v16 = vadd.f32 %v441_v14, %v4198_v25  ;;  %v3465_v17 = vpop.f32.mrb[1].mxu0  ;;  %v448_v25 = vld [vmem:[%s5793_s6 + $0x10] sm:$0xff]  ;;  %v457_v14 = vld [vmem:[%s5793_s6 + $0x58] sm:$0xff] }
 0x10b   : > { %1244 = vperm.xlu1 %3739, %v682_v13   ;;  %v4457_v13 = vpop.permute.xlu0 %839  ;;  %v693_v17 = vld [vmem:[%s5794_s7 + $0x3b8] sm:$0xff] }
 0x10c   : > { %v445_v18 = vmax.f32 %v442_v16, 0.0  ;;  %1239 = vperm.xlu0 %3738, %v681_v15   ;;  %5803 = vst [vmem:[#allocation14_spill] sm:$0xff] %v4457_v13  ;;  %v517_v15 = vld [vmem:[%s5793_s6 + $0x238] sm:$0xff]  ;;  %v694_v16 = vld [vmem:[%s5794_s7 + $0x3c0] sm:$0xff] }
 0x10e   : > { %3466 = vmatprep.subr.mxu0 %v445_v18  ;;  %3682 = vmatprep.subr.mxu1 %v445_v18 }
 0x10f   : > { %3467 = vmatpush3.msra.mxu0 %v445_v18  ;;  %3683 = vmatpush3.msra.mxu1 %v445_v18  ;;  %v458_v18 = vld [vmem:[%s5793_s6 + $0x60] sm:$0xff] }
 0x110   : > { %3469 = vmatmul.mubr.msk.f32.vlgmr.msra.gmra.mrb[2].mxu0 %vm371_vm2, %v447_v19  ;;  %3559 = vmatmul.mubr.msk.f32.vlgmr.msra.gmra.mrb[0].mxu1 %vm371_vm2, %v507_v20  ;;  %v518_v19 = vld [vmem:[%s5793_s6 + $0x240] sm:$0xff]  ;;  %v459_v20 = vld [vmem:[%s5793_s6 + $0x68] sm:$0xff] }
 0x111   : > { %1254 = vperm.xlu1 %3739, %v684_v23   ;;  %1249 = vperm.xlu0 %3738, %v683_v24   ;;  %v519_v23 = vld [vmem:[%s5793_s6 + $0x248] sm:$0xff]  ;;  %v4489_v24 = vpop.permute.xlu1 %844 }
 0x112   : > { %3471 = vmatprep.mubr.msk.f32.mxu0 %vm371_vm2, %v448_v25  ;;  %3561 = vmatprep.mubr.msk.f32.mxu1 %vm371_vm2, %v508_v26  ;;  %5804 = vst [vmem:[#allocation15_spill] sm:$0xff] %v4489_v24  ;;  %v4491_v25 = vpop.permute.xlu0 %849  ;;  %v696_v26 = vld [vmem:[%s5794_s7 + $0x3d0] sm:$0xff] }
 0x113   : > { %5805 = vst [vmem:[#allocation16_spill] sm:$0xff] %v4491_v25 }
 0x114   : > { %3472 = vmatmul.mubr.msk.f32.gmra.mrb[4].mxu0 %vm371_vm2, %v449_v27  ;;  %3562 = vmatmul.mubr.msk.f32.gmra.mrb[2].mxu1 %vm371_vm2, %v509_v28  ;;  %v695_v27 = vld [vmem:[%s5794_s7 + $0x3c8] sm:$0xff]  ;;  %v460_v28 = vld [vmem:[%s5793_s6 + $0x70] sm:$0xff] }
 0x115   : > { %1264 = vperm.xlu1 %3739, %v686_v29   ;;  %1259 = vperm.xlu0 %3738, %v685_v32   ;;  %v520_v29 = vld [vmem:[%s5793_s6 + $0x250] sm:$0xff]  ;;  %v461_v32 = vld [vmem:[%s5793_s6 + $0x78] sm:$0xff] }
 0x116   : > { %3474 = vmatprep.mubr.msk.f32.mxu0 %vm371_vm2, %v450_v33  ;;  %3564 = vmatprep.mubr.msk.f32.mxu1 %vm371_vm2, %v510_v36  ;;  %v521_v33 = vld [vmem:[%s5793_s6 + $0x258] sm:$0xff]  ;;  %v698_v36 = vld [vmem:[%s5794_s7 + $0x3e0] sm:$0xff] }
 0x118   : > { %3475 = vmatmul.mubr.msk.f32.gmra.mrb[6].mxu0 %vm371_vm2, %v451_v39  ;;  %3565 = vmatmul.mubr.msk.f32.gmra.mrb[4].mxu1 %vm371_vm2, %v511_v42  ;;  %v697_v39 = vld [vmem:[%s5794_s7 + $0x3d8] sm:$0xff]  ;;  %v462_v42 = vld [vmem:[%s5793_s6 + $0x80] sm:$0xff] }
 0x119   : > { %1274 = vperm.xlu1 %3739, %v688_v43   ;;  %1269 = vperm.xlu0 %3738, %v687_v46   ;;  %v522_v43 = vld [vmem:[%s5793_s6 + $0x260] sm:$0xff]  ;;  %v4529_v46 = vpop.permute.xlu1 %854 }
 0x11a   : > { %3477 = vmatprep.mubr.msk.f32.mxu0 %vm371_vm2, %v452_v47  ;;  %3567 = vmatprep.mubr.msk.f32.mxu1 %vm371_vm2, %v512_v48  ;;  %5806 = vst [vmem:[#allocation17_spill] sm:$0xff] %v4529_v46  ;;  %v4531_v47 = vpop.permute.xlu0 %859  ;;  %v463_v48 = vld [vmem:[%s5793_s6 + $0x88] sm:$0xff] }
 0x11b   : > { %5807 = vst [vmem:[#allocation18_spill] sm:$0xff] %v4531_v47 }
 0x11c   : > { %3478 = vmatmul.mubr.msk.f32.gmra.mrb[8].mxu0 %vm371_vm2, %v453_v49  ;;  %3568 = vmatmul.mubr.msk.f32.gmra.mrb[6].mxu1 %vm371_vm2, %v513_v52  ;;  %v523_v49 = vld [vmem:[%s5793_s6 + $0x268] sm:$0xff]  ;;  %v700_v52 = vld [vmem:[%s5794_s7 + $0x3f0] sm:$0xff] }
 0x11d   : > { %1284 = vperm.xlu1 %3739, %v690_v57   ;;  %1279 = vperm.xlu0 %3738, %v689_v58   ;;  %v699_v57 = vld [vmem:[%s5794_s7 + $0x3e8] sm:$0xff]  ;;  %v464_v58 = vld [vmem:[%s5793_s6 + $0x90] sm:$0xff] }
 0x11e   : > { %3480 = vmatprep.mubr.msk.f32.mxu0 %vm371_vm2, %v454_v59  ;;  %3570 = vmatprep.mubr.msk.f32.mxu1 %vm371_vm2, %v514_v62  ;;  %v524_v59 = vld [vmem:[%s5793_s6 + $0x270] sm:$0xff]  ;;  %v465_v62 = vld [vmem:[%s5793_s6 + $0x98] sm:$0xff] }
 0x120   : > { %3481 = vmatmul.mubr.msk.f32.gmra.mrb[10].mxu0 %vm371_vm2, %v455_v63  ;;  %3571 = vmatmul.mubr.msk.f32.gmra.mrb[8].mxu1 %vm371_vm2, %v515_v2  ;;  %v525_v63 = vld [vmem:[%s5793_s6 + $0x278] sm:$0xff]  ;;  %v4563_v2 = vpop.permute.xlu1 %864 }
 0x121   : > { %1294 = vperm.xlu1 %3739, %v692_v3   ;;  %1289 = vperm.xlu0 %3738, %v691_v4   ;;  %5808 = vst [vmem:[#allocation19_spill] sm:$0xff] %v4563_v2  ;;  %v4565_v3 = vpop.permute.xlu0 %869  ;;  %v701_v4 = vld [vmem:[%s5794_s7 + $0x3f8] sm:$0xff] }
 0x122   : > { %3483 = vmatprep.mubr.msk.f32.mxu0 %vm371_vm2, %v456_v5  ;;  %3573 = vmatprep.mubr.msk.f32.mxu1 %vm371_vm2, %v516_v9  ;;  %5809 = vst [vmem:[#allocation20_spill] sm:$0xff] %v4565_v3  ;;  %v466_v5 = vld [vmem:[%s5793_s6 + $0xa0] sm:$0xff] }
 0x123   : > { %v526_v9 = vld [vmem:[%s5793_s6 + $0x280] sm:$0xff] }
 0x124   : > { %3484 = vmatmul.mubr.msk.f32.gmra.mrb[12].mxu0 %vm371_vm2, %v457_v14  ;;  %3574 = vmatmul.mubr.msk.f32.gmra.mrb[10].mxu1 %vm371_vm2, %v517_v15  ;;  %v467_v14 = vld [vmem:[%s5793_s6 + $0xa8] sm:$0xff] }
 0x125   : > { %1304 = vperm.xlu1 %3739, %v694_v16   ;;  %1299 = vperm.xlu0 %3738, %v693_v17   ;;  %v527_v15 = vld [vmem:[%s5793_s6 + $0x288] sm:$0xff]  ;;  %v468_v16 = vld [vmem:[%s5793_s6 + $0xb0] sm:$0xff] }
 0x126   : > { %3486 = vmatprep.mubr.msk.f32.mxu0 %vm371_vm2, %v458_v18  ;;  %3576 = vmatprep.mubr.msk.f32.mxu1 %vm371_vm2, %v518_v19  ;;  %v528_v17 = vld [vmem:[%s5793_s6 + $0x290] sm:$0xff]  ;;  %v4594_v18 = vpop.permute.xlu1 %874  ;;  %v4596_v19 = vpop.permute.xlu0 %879 }
 0x127   : > { %5810 = vst [vmem:[#allocation21_spill] sm:$0xff] %v4594_v18  ;;  %5811 = vst [vmem:[#allocation22_spill] sm:$0xff] %v4596_v19 }
 0x128   : > { %3487 = vmatmul.mubr.msk.f32.gmra.mrb[14].mxu0 %vm371_vm2, %v459_v20  ;;  %3577 = vmatmul.mubr.msk.f32.gmra.mrb[12].mxu1 %vm371_vm2, %v519_v23  ;;  %v469_v20 = vld [vmem:[%s5793_s6 + $0xb8] sm:$0xff] }
 0x129   : > { %1314 = vperm.xlu1 %3739, %v696_v26   ;;  %1309 = vperm.xlu0 %3738, %v695_v27   ;;  %v529_v23 = vld [vmem:[%s5793_s6 + $0x298] sm:$0xff]  ;;  %v470_v26 = vld [vmem:[%s5793_s6 + $0xc0] sm:$0xff] }
 0x12a   : > { %3489 = vmatprep.mubr.msk.f32.mxu0 %vm371_vm2, %v460_v28  ;;  %3579 = vmatprep.mubr.msk.f32.mxu1 %vm371_vm2, %v520_v29  ;;  %v530_v27 = vld [vmem:[%s5793_s6 + $0x2a0] sm:$0xff]  ;;  %v471_v28 = vld [vmem:[%s5793_s6 + $0xc8] sm:$0xff] }
 0x12b   : > { %v531_v29 = vld [vmem:[%s5793_s6 + $0x2a8] sm:$0xff] }
 0x12c   : > { %3490 = vmatmul.mubr.msk.f32.gmra.mrb[16].mxu0 %vm371_vm2, %v461_v32  ;;  %3580 = vmatmul.mubr.msk.f32.gmra.mrb[14].mxu1 %vm371_vm2, %v521_v33  ;;  %v4624_v32 = vpop.permute.xlu1 %884  ;;  %v4626_v33 = vpop.permute.xlu0 %889 }
 0x12d   : > { %1324 = vperm.xlu1 %3739, %v698_v36   ;;  %1319 = vperm.xlu0 %3738, %v697_v39   ;;  %5812 = vst [vmem:[#allocation23_spill] sm:$0xff] %v4624_v32  ;;  %5813 = vst [vmem:[#allocation24_spill] sm:$0xff] %v4626_v33  ;;  %v472_v36 = vld [vmem:[%s5793_s6 + $0xd0] sm:$0xff] }
 0x12e   : > { %3492 = vmatprep.mubr.msk.f32.mxu0 %vm371_vm2, %v462_v42  ;;  %3582 = vmatprep.mubr.msk.f32.mxu1 %vm371_vm2, %v522_v43  ;;  %v532_v39 = vld [vmem:[%s5793_s6 + $0x2b0] sm:$0xff]  ;;  %v473_v42 = vld [vmem:[%s5793_s6 + $0xd8] sm:$0xff] }
 0x12f   : > { %v533_v43 = vld [vmem:[%s5793_s6 + $0x2b8] sm:$0xff] }
 0x130   : > { %3493 = vmatmul.mubr.msk.f32.gmra.mrb[18].mxu0 %vm371_vm2, %v463_v48  ;;  %3583 = vmatmul.mubr.msk.f32.gmra.mrb[16].mxu1 %vm371_vm2, %v523_v49  ;;  %v474_v48 = vld [vmem:[%s5793_s6 + $0xe0] sm:$0xff] }
 0x131   : > { %1334 = vperm.xlu1 %3739, %v700_v52   ;;  %1329 = vperm.xlu0 %3738, %v699_v57   ;;  %v534_v49 = vld [vmem:[%s5793_s6 + $0x2c0] sm:$0xff]  ;;  %v4650_v52 = vpop.permute.xlu1 %894  ;;  %v4652_v57 = vpop.permute.xlu0 %899 }
 0x132   : > { %3495 = vmatprep.mubr.msk.f32.mxu0 %vm371_vm2, %v464_v58  ;;  %3585 = vmatprep.mubr.msk.f32.mxu1 %vm371_vm2, %v524_v59  ;;  %5814 = vst [vmem:[#allocation25_spill] sm:$0xff] %v4650_v52  ;;  %5815 = vst [vmem:[#allocation26_spill] sm:$0xff] %v4652_v57  ;;  %v475_v58 = vld [vmem:[%s5793_s6 + $0xe8] sm:$0xff] }
 0x133   : > { %v535_v59 = vld [vmem:[%s5793_s6 + $0x2c8] sm:$0xff] }
 0x134   : > { %3496 = vmatmul.mubr.msk.f32.gmra.mrb[20].mxu0 %vm371_vm2, %v465_v62  ;;  %3586 = vmatmul.mubr.msk.f32.gmra.mrb[18].mxu1 %vm371_vm2, %v525_v63  ;;  %v476_v62 = vld [vmem:[%s5793_s6 + $0xf0] sm:$0xff] }
 0x135   : > { %1339 = vperm.xlu0 %3738, %v701_v4   ;;  %3498 = vmatprep.mubr.msk.f32.mxu0 %vm371_vm2, %v466_v5  ;;  %v536_v63 = vld [vmem:[%s5793_s6 + $0x2d0] sm:$0xff]  ;;  %v477_v4 = vld [vmem:[%s5793_s6 + $0xf8] sm:$0xff] }
 0x136   : > { %3588 = vmatprep.mubr.msk.f32.mxu1 %vm371_vm2, %v526_v9  ;;  %v537_v5 = vld [vmem:[%s5793_s6 + $0x2d8] sm:$0xff]  ;;  %v4680_v9 = vpop.permute.xlu1 %904 }
 0x137   : > { %5816 = vst [vmem:[#allocation27_spill] sm:$0xff] %v4680_v9 }
 0x138   : > { %3499 = vmatmul.mubr.msk.f32.gmra.mrb[22].mxu0 %vm371_vm2, %v467_v14  ;;  %3589 = vmatmul.mubr.msk.f32.gmra.mrb[20].mxu1 %vm371_vm2, %v527_v15  ;;  %v4682_v14 = vpop.permute.xlu0 %909  ;;  %v478_v15 = vld [vmem:[%s5793_s6 + $0x100] sm:$0xff] }
 0x139   : > { %3501 = vmatprep.mubr.msk.f32.mxu0 %vm371_vm2, %v468_v16  ;;  %3591 = vmatprep.mubr.msk.f32.mxu1 %vm371_vm2, %v528_v17  ;;  %5817 = vst [vmem:[#allocation28_spill] sm:$0xff] %v4682_v14  ;;  %v538_v16 = vld [vmem:[%s5793_s6 + $0x2e0] sm:$0xff]  ;;  %v479_v17 = vld [vmem:[%s5793_s6 + $0x108] sm:$0xff] }
 0x13c   : > { %3502 = vmatmul.mubr.msk.f32.gmra.mrb[24].mxu0 %vm371_vm2, %v469_v20  ;;  %3592 = vmatmul.mubr.msk.f32.gmra.mrb[22].mxu1 %vm371_vm2, %v529_v23  ;;  %v539_v20 = vld [vmem:[%s5793_s6 + $0x2e8] sm:$0xff]  ;;  %v480_v23 = vld [vmem:[%s5793_s6 + $0x110] sm:$0xff] }
 0x13d   : > { %3504 = vmatprep.mubr.msk.f32.mxu0 %vm371_vm2, %v470_v26  ;;  %3594 = vmatprep.mubr.msk.f32.mxu1 %vm371_vm2, %v530_v27  ;;  %v540_v26 = vld [vmem:[%s5793_s6 + $0x2f0] sm:$0xff]  ;;  %v4706_v27 = vpop.permute.xlu1 %914 }
 0x13e   : > { %5818 = vst [vmem:[#allocation29_spill] sm:$0xff] %v4706_v27 }
 0x140   : > { %3505 = vmatmul.mubr.msk.f32.gmra.mrb[26].mxu0 %vm371_vm2, %v471_v28  ;;  %3595 = vmatmul.mubr.msk.f32.gmra.mrb[24].mxu1 %vm371_vm2, %v531_v29  ;;  %v4708_v28 = vpop.permute.xlu0 %919  ;;  %v481_v29 = vld [vmem:[%s5793_s6 + $0x118] sm:$0xff] }
 0x141   : > { %3507 = vmatprep.mubr.msk.f32.mxu0 %vm371_vm2, %v472_v36  ;;  %3597 = vmatprep.mubr.msk.f32.mxu1 %vm371_vm2, %v532_v39  ;;  %5819 = vst [vmem:[#allocation30_spill] sm:$0xff] %v4708_v28  ;;  %v541_v36 = vld [vmem:[%s5793_s6 + $0x2f8] sm:$0xff]  ;;  %v482_v39 = vld [vmem:[%s5793_s6 + $0x120] sm:$0xff] }
 0x144   : > { %3508 = vmatmul.mubr.msk.f32.gmra.mrb[28].mxu0 %vm371_vm2, %v473_v42  ;;  %3598 = vmatmul.mubr.msk.f32.gmra.mrb[26].mxu1 %vm371_vm2, %v533_v43  ;;  %v542_v42 = vld [vmem:[%s5793_s6 + $0x300] sm:$0xff]  ;;  %v483_v43 = vld [vmem:[%s5793_s6 + $0x128] sm:$0xff] }
 0x145   : > { %3510 = vmatprep.mubr.msk.f32.mxu0 %vm371_vm2, %v474_v48  ;;  %3600 = vmatprep.mubr.msk.f32.mxu1 %vm371_vm2, %v534_v49  ;;  %v543_v48 = vld [vmem:[%s5793_s6 + $0x308] sm:$0xff]  ;;  %v4736_v49 = vpop.permute.xlu1 %924 }
 0x146   : > { %5820 = vst [vmem:[#allocation31_spill] sm:$0xff] %v4736_v49 }
 0x148   : > { %3511 = vmatmul.mubr.msk.f32.gmra.mrb[30].mxu0 %vm371_vm2, %v475_v58  ;;  %3601 = vmatmul.mubr.msk.f32.gmra.mrb[28].mxu1 %vm371_vm2, %v535_v59  ;;  %v4738_v58 = vpop.permute.xlu0 %929  ;;  %v484_v59 = vld [vmem:[%s5793_s6 + $0x130] sm:$0xff] }
 0x149   : > { %3513 = vmatprep.mubr.msk.f32.mxu0 %vm371_vm2, %v476_v62  ;;  %3603 = vmatprep.mubr.msk.f32.mxu1 %vm371_vm2, %v536_v63  ;;  %5821 = vst [vmem:[#allocation32_spill] sm:$0xff] %v4738_v58  ;;  %v544_v62 = vld [vmem:[%s5793_s6 + $0x310] sm:$0xff]  ;;  %v485_v63 = vld [vmem:[%s5793_s6 + $0x138] sm:$0xff] }
 0x14c   : > { %3514 = vmatmul.mubr.msk.f32.gmra.mrb[32].mxu0 %vm371_vm2, %v477_v4  ;;  %3604 = vmatmul.mubr.msk.f32.gmra.mrb[30].mxu1 %vm371_vm2, %v537_v5  ;;  %v545_v4 = vld [vmem:[%s5793_s6 + $0x318] sm:$0xff]  ;;  %v486_v5 = vld [vmem:[%s5793_s6 + $0x140] sm:$0xff] }
 0x14d   : > { %3516 = vmatprep.mubr.msk.f32.mxu0 %vm371_vm2, %v478_v15  ;;  %3606 = vmatprep.mubr.msk.f32.mxu1 %vm371_vm2, %v538_v16  ;;  %v546_v15 = vld [vmem:[%s5793_s6 + $0x320] sm:$0xff]  ;;  %v4762_v16 = vpop.permute.xlu1 %934 }
 0x14e   : > { %5822 = vst [vmem:[#allocation33_spill] sm:$0xff] %v4762_v16 }
 0x150   : > { %3517 = vmatmul.mubr.msk.f32.gmra.mrb[34].mxu0 %vm371_vm2, %v479_v17  ;;  %3607 = vmatmul.mubr.msk.f32.gmra.mrb[32].mxu1 %vm371_vm2, %v539_v20  ;;  %v4764_v17 = vpop.permute.xlu0 %939  ;;  %v487_v20 = vld [vmem:[%s5793_s6 + $0x148] sm:$0xff] }
 0x151   : > { %3519 = vmatprep.mubr.msk.f32.mxu0 %vm371_vm2, %v480_v23  ;;  %3609 = vmatprep.mubr.msk.f32.mxu1 %vm371_vm2, %v540_v26  ;;  %5823 = vst [vmem:[#allocation34_spill] sm:$0xff] %v4764_v17  ;;  %v547_v23 = vld [vmem:[%s5793_s6 + $0x328] sm:$0xff]  ;;  %v488_v26 = vld [vmem:[%s5793_s6 + $0x150] sm:$0xff] }
 0x154   : > { %3520 = vmatmul.mubr.msk.f32.gmra.mrb[36].mxu0 %vm371_vm2, %v481_v29  ;;  %3610 = vmatmul.mubr.msk.f32.gmra.mrb[34].mxu1 %vm371_vm2, %v541_v36  ;;  %v548_v29 = vld [vmem:[%s5793_s6 + $0x330] sm:$0xff]  ;;  %v489_v36 = vld [vmem:[%s5793_s6 + $0x158] sm:$0xff] }
 0x155   : > { %3522 = vmatprep.mubr.msk.f32.mxu0 %vm371_vm2, %v482_v39  ;;  %3612 = vmatprep.mubr.msk.f32.mxu1 %vm371_vm2, %v542_v42  ;;  %v549_v39 = vld [vmem:[%s5793_s6 + $0x338] sm:$0xff]  ;;  %v4792_v42 = vpop.permute.xlu1 %944 }
 0x156   : > { %5824 = vst [vmem:[#allocation35_spill] sm:$0xff] %v4792_v42 }
 0x158   : > { %3523 = vmatmul.mubr.msk.f32.gmra.mrb[38].mxu0 %vm371_vm2, %v483_v43  ;;  %3613 = vmatmul.mubr.msk.f32.gmra.mrb[36].mxu1 %vm371_vm2, %v543_v48  ;;  %v4794_v43 = vpop.permute.xlu0 %949  ;;  %v490_v48 = vld [vmem:[%s5793_s6 + $0x160] sm:$0xff] }
 0x159   : > { %3525 = vmatprep.mubr.msk.f32.mxu0 %vm371_vm2, %v484_v59  ;;  %3615 = vmatprep.mubr.msk.f32.mxu1 %vm371_vm2, %v544_v62  ;;  %5825 = vst [vmem:[#allocation36_spill] sm:$0xff] %v4794_v43  ;;  %v550_v59 = vld [vmem:[%s5793_s6 + $0x340] sm:$0xff]  ;;  %v491_v62 = vld [vmem:[%s5793_s6 + $0x168] sm:$0xff] }
 0x15c   : > { %3526 = vmatmul.mubr.msk.f32.gmra.mrb[40].mxu0 %vm371_vm2, %v485_v63  ;;  %3616 = vmatmul.mubr.msk.f32.gmra.mrb[38].mxu1 %vm371_vm2, %v545_v4  ;;  %v551_v63 = vld [vmem:[%s5793_s6 + $0x348] sm:$0xff]  ;;  %v492_v4 = vld [vmem:[%s5793_s6 + $0x170] sm:$0xff] }
 0x15d   : > { %3528 = vmatprep.mubr.msk.f32.mxu0 %vm371_vm2, %v486_v5  ;;  %3618 = vmatprep.mubr.msk.f32.mxu1 %vm371_vm2, %v546_v15  ;;  %v552_v5 = vld [vmem:[%s5793_s6 + $0x350] sm:$0xff]  ;;  %v4818_v15 = vpop.permute.xlu1 %954 }
 0x15e   : > { %5826 = vst [vmem:[#allocation37_spill] sm:$0xff] %v4818_v15 }
 0x160   : > { %3529 = vmatmul.mubr.msk.f32.gmra.mrb[42].mxu0 %vm371_vm2, %v487_v20  ;;  %3619 = vmatmul.mubr.msk.f32.gmra.mrb[40].mxu1 %vm371_vm2, %v547_v23  ;;  %v4820_v20 = vpop.permute.xlu0 %959  ;;  %v493_v23 = vld [vmem:[%s5793_s6 + $0x178] sm:$0xff] }
 0x161   : > { %3531 = vmatprep.mubr.msk.f32.mxu0 %vm371_vm2, %v488_v26  ;;  %3621 = vmatprep.mubr.msk.f32.mxu1 %vm371_vm2, %v548_v29  ;;  %5827 = vst [vmem:[#allocation38_spill] sm:$0xff] %v4820_v20  ;;  %v553_v26 = vld [vmem:[%s5793_s6 + $0x358] sm:$0xff]  ;;  %v494_v29 = vld [vmem:[%s5793_s6 + $0x180] sm:$0xff] }
 0x164   : > { %3532 = vmatmul.mubr.msk.f32.gmra.mrb[44].mxu0 %vm371_vm2, %v489_v36  ;;  %3622 = vmatmul.mubr.msk.f32.gmra.mrb[42].mxu1 %vm371_vm2, %v549_v39  ;;  %v554_v36 = vld [vmem:[%s5793_s6 + $0x360] sm:$0xff]  ;;  %v495_v39 = vld [vmem:[%s5793_s6 + $0x188] sm:$0xff] }
 0x165   : > { %3534 = vmatprep.mubr.msk.f32.mxu0 %vm371_vm2, %v490_v48  ;;  %3624 = vmatprep.mubr.msk.f32.mxu1 %vm371_vm2, %v550_v59  ;;  %v555_v48 = vld [vmem:[%s5793_s6 + $0x368] sm:$0xff]  ;;  %v4848_v59 = vpop.permute.xlu1 %964 }
 0x166   : > { %5828 = vst [vmem:[#allocation39_spill] sm:$0xff] %v4848_v59 }
 0x168   : > { %3535 = vmatmul.mubr.msk.f32.gmra.mrb[46].mxu0 %vm371_vm2, %v491_v62  ;;  %3625 = vmatmul.mubr.msk.f32.gmra.mrb[44].mxu1 %vm371_vm2, %v551_v63  ;;  %v4850_v62 = vpop.permute.xlu0 %969  ;;  %v496_v63 = vld [vmem:[%s5793_s6 + $0x190] sm:$0xff] }
 0x169   : > { %3537 = vmatprep.mubr.msk.f32.mxu0 %vm371_vm2, %v492_v4  ;;  %3627 = vmatprep.mubr.msk.f32.mxu1 %vm371_vm2, %v552_v5  ;;  %5829 = vst [vmem:[#allocation40_spill] sm:$0xff] %v4850_v62  ;;  %v556_v4 = vld [vmem:[%s5793_s6 + $0x370] sm:$0xff]  ;;  %v497_v5 = vld [vmem:[%s5793_s6 + $0x198] sm:$0xff] }
 0x16c   : > { %3538 = vmatmul.mubr.msk.f32.gmra.mrb[48].mxu0 %vm371_vm2, %v493_v23  ;;  %3628 = vmatmul.mubr.msk.f32.gmra.mrb[46].mxu1 %vm371_vm2, %v553_v26  ;;  %v557_v23 = vld [vmem:[%s5793_s6 + $0x378] sm:$0xff]  ;;  %v498_v26 = vld [vmem:[%s5793_s6 + $0x1a0] sm:$0xff] }
 0x16d   : > { %3540 = vmatprep.mubr.msk.f32.mxu0 %vm371_vm2, %v494_v29  ;;  %3630 = vmatprep.mubr.msk.f32.mxu1 %vm371_vm2, %v554_v36  ;;  %v558_v29 = vld [vmem:[%s5793_s6 + $0x380] sm:$0xff]  ;;  %v4874_v36 = vpop.permute.xlu1 %974 }
 0x16e   : > { %5830 = vst [vmem:[#allocation41_spill] sm:$0xff] %v4874_v36  ;;  %v573_v36 = vld [vmem:[%s5793_s6 + $0x3f8] sm:$0xff] }
 0x170   : > { %3541 = vmatmul.mubr.msk.f32.gmra.mrb[50].mxu0 %vm371_vm2, %v495_v39  ;;  %3631 = vmatmul.mubr.msk.f32.gmra.mrb[48].mxu1 %vm371_vm2, %v555_v48  ;;  %v4876_v39 = vpop.permute.xlu0 %979  ;;  %v499_v48 = vld [vmem:[%s5793_s6 + $0x1a8] sm:$0xff] }
 0x171   : > { %3543 = vmatprep.mubr.msk.f32.mxu0 %vm371_vm2, %v496_v63  ;;  %3633 = vmatprep.mubr.msk.f32.mxu1 %vm371_vm2, %v556_v4  ;;  %5831 = vst [vmem:[#allocation42_spill] sm:$0xff] %v4876_v39  ;;  %v559_v63 = vld [vmem:[%s5793_s6 + $0x388] sm:$0xff]  ;;  %v500_v4 = vld [vmem:[%s5793_s6 + $0x1b0] sm:$0xff] }
 0x174   : > { %3544 = vmatmul.mubr.msk.f32.gmra.mrb[52].mxu0 %vm371_vm2, %v497_v5  ;;  %3634 = vmatmul.mubr.msk.f32.gmra.mrb[50].mxu1 %vm371_vm2, %v557_v23  ;;  %v560_v5 = vld [vmem:[%s5793_s6 + $0x390] sm:$0xff]  ;;  %v501_v23 = vld [vmem:[%s5793_s6 + $0x1b8] sm:$0xff]  ;;  %v4906_v7 = vpop.permute.xlu0 %989 }
 0x175   : > { %3546 = vmatprep.mubr.msk.f32.mxu0 %vm371_vm2, %v498_v26  ;;  %3636 = vmatprep.mubr.msk.f32.mxu1 %vm371_vm2, %v558_v29  ;;  %v561_v26 = vld [vmem:[%s5793_s6 + $0x398] sm:$0xff]  ;;  %v4904_v29 = vpop.permute.xlu1 %984  ;;  %5833 = vst [vmem:[#allocation44_spill] sm:$0xff] %v4906_v7 }
 0x176   : > { %5832 = vst [vmem:[#allocation43_spill] sm:$0xff] %v4904_v29  ;;  %v504_v29 = vld [vmem:[%s5793_s6 + $0x1d0] sm:$0xff]  ;;  %v565_v7 = vld [vmem:[%s5793_s6 + $0x3b8] sm:$0xff] }
 0x178   : > { %3547 = vmatmul.mubr.msk.f32.gmra.mrb[54].mxu0 %vm371_vm2, %v499_v48  ;;  %3637 = vmatmul.mubr.msk.f32.gmra.mrb[52].mxu1 %vm371_vm2, %v559_v63  ;;  %v502_v48 = vld [vmem:[%s5793_s6 + $0x1c0] sm:$0xff] }
 0x179   : > { %3549 = vmatprep.mubr.msk.f32.mxu0 %vm371_vm2, %v500_v4  ;;  %3639 = vmatprep.mubr.msk.f32.mxu1 %vm371_vm2, %v560_v5  ;;  %v562_v63 = vld [vmem:[%s5793_s6 + $0x3a0] sm:$0xff]  ;;  %v503_v4 = vld [vmem:[%s5793_s6 + $0x1c8] sm:$0xff] }
 0x17a   : > { %v563_v5 = vld [vmem:[%s5793_s6 + $0x3a8] sm:$0xff] }
 0x17c   : > { %3550 = vmatmul.mubr.msk.f32.gmra.mrb[56].mxu0 %vm371_vm2, %v501_v23  ;;  %3640 = vmatmul.mubr.msk.f32.gmra.mrb[54].mxu1 %vm371_vm2, %v561_v26  ;;  %v564_v23 = vld [vmem:[%s5793_s6 + $0x3b0] sm:$0xff]  ;;  %v4930_v26 = vpop.permute.xlu1 %994 }
 0x17d   : > { %3552 = vmatprep.mubr.msk.f32.mxu0 %vm371_vm2, %v502_v48  ;;  %3642 = vmatprep.mubr.msk.f32.mxu1 %vm371_vm2, %v562_v63  ;;  %5834 = vst [vmem:[#allocation45_spill] sm:$0xff] %v4930_v26  ;;  %v4932_v48 = vpop.permute.xlu0 %999  ;;  %v505_v63 = vld [vmem:[%s5793_s6 + $0x1d8] sm:$0xff]  ;;  %v566_v26 = vld [vmem:[%s5793_s6 + $0x3c0] sm:$0xff] }
 0x17e   : > { %5835 = vst [vmem:[#allocation46_spill] sm:$0xff] %v4932_v48 }
 0x180   : > { %3553 = vmatmul.mubr.msk.f32.gmra.mrb[58].mxu0 %vm371_vm2, %v503_v4  ;;  %3643 = vmatmul.mubr.msk.f32.gmra.mrb[56].mxu1 %vm371_vm2, %v563_v5  ;;  %v1005_v4 = vpop.permute.xlu1 %1004 }
 0x181   : > { %3555 = vmatprep.mubr.msk.f32.mxu0 %vm371_vm2, %v504_v29  ;;  %3645 = vmatprep.mubr.msk.f32.mxu1 %vm371_vm2, %v564_v23  ;;  %v567_v29 = vld [vmem:[%s5793_s6 + $0x3c8] sm:$0xff]  ;;  %v1010_v5 = vpop.permute.xlu0 %1009  ;;  %v568_v23 = vld [vmem:[%s5793_s6 + $0x3d0] sm:$0xff] }
 0x184   : > { %3556 = vmatmul.mubr.msk.f32.gmra.mrb[60].mxu0 %vm371_vm2, %v505_v63  ;;  %3646 = vmatmul.mubr.msk.f32.gmra.mrb[58].mxu1 %vm371_vm2, %v565_v7  ;;  %v569_v7 = vld [vmem:[%s5793_s6 + $0x3d8] sm:$0xff]  ;;  %v1015_v63 = vpop.permute.xlu1 %1014 }
 0x185   : > { %3648 = vmatprep.mubr.msk.f32.mxu1 %vm371_vm2, %v566_v26  ;;  %v570_v26 = vld [vmem:[%s5793_s6 + $0x3e0] sm:$0xff]  ;;  %v1020_v48 = vpop.permute.xlu0 %1019 }
 0x188   : > { %3649 = vmatmul.mubr.msk.f32.gmra.mrb[60].mxu1 %vm371_vm2, %v567_v29  ;;  %v571_v29 = vld [vmem:[%s5793_s6 + $0x3e8] sm:$0xff]  ;;  %v1025_v39 = vpop.permute.xlu1 %1024 }
 0x189   : > { %3651 = vmatprep.mubr.msk.f32.mxu1 %vm371_vm2, %v568_v23  ;;  %v572_v23 = vld [vmem:[%s5793_s6 + $0x3f0] sm:$0xff] }
 0x18c   : > { %3652 = vmatmul.mubr.msk.f32.gmra.mrb[62].mxu1 %vm371_vm2, %v569_v7  ;;  %v1030_v7 = vpop.permute.xlu0 %1029 }
 0x18d   : > { %3654 = vmatprep.mubr.msk.f32.mxu1 %vm371_vm2, %v570_v26  ;;  %v1035_v26 = vpop.permute.xlu1 %1034 }
 0x190   : > { %3655 = vmatmul.mubr.msk.f32.gmra.mrb[64].mxu1 %vm371_vm2, %v571_v29  ;;  %v1040_v59 = vpop.permute.xlu0 %1039 }
 0x191   : > { %3657 = vmatprep.mubr.msk.f32.mxu1 %vm371_vm2, %v572_v23  ;;  %v4978_v62 = vpop.permute.xlu1 %1044 }
 0x194   : > { %3658 = vmatmul.mubr.msk.f32.gmra.mrb[66].mxu1 %vm371_vm2, %v573_v36  ;;  %v1050_v15 = vpop.permute.xlu0 %1049 }
 0x195   : > { %v4980_v20 = vpop.permute.xlu1 %1054 }
 0x198   : > { %v4982_v42 = vpop.permute.xlu0 %1059 }
 0x199   : > { %v4984_v29 = vpop.permute.xlu1 %1064 }
 0x19c   : > { %v4986_v23 = vpop.permute.xlu0 %1069 }
 0x19d   : > { %v4988_v43 = vpop.permute.xlu1 %1074 }
 0x1a0   : > { %v4990_v16 = vpop.permute.xlu0 %1079 }
 0x1a1   : > { %v4992_v17 = vpop.permute.xlu1 %1084 }
 0x1a4   : > { %v4994_v36 = vpop.permute.xlu0 %1089 }
 0x1a5   : > { %v4996_v49 = vpop.permute.xlu1 %1094 }
 0x1a8   : > { %v4998_v58 = vpop.permute.xlu0 %1099 }
 0x1a9   : > { %v5000_v27 = vpop.permute.xlu1 %1104 }
 0x1ac   : > { %v5002_v28 = vpop.permute.xlu0 %1109 }
 0x1ad   : > { %v5004_v9 = vpop.permute.xlu1 %1114 }
 0x1b0   : > { %v5006_v14 = vpop.permute.xlu0 %1119 }
 0x1b1   : > { %v5008_v52 = vpop.permute.xlu1 %1124 }
 0x1b2   : > { %5836 = vst [vmem:[#allocation47_spill] sm:$0xff] %v5008_v52 }
 0x1b4   : > { %v5010_v57 = vpop.permute.xlu0 %1129 }
 0x1b5   : > { %v5012_v32 = vpop.permute.xlu1 %1134 }
 0x1b6   : > { %5837 = vst [vmem:[#allocation48_spill] sm:$0xff] %v5012_v32 }
 0x1b8   : > { %v5014_v33 = vpop.permute.xlu0 %1139 }
 0x1b9   : > { %5838 = vst [vmem:[#allocation49_spill] sm:$0xff] %v5014_v33  ;;  %v5016_v18 = vpop.permute.xlu1 %1144 }
 0x1ba   : > { %5839 = vst [vmem:[#allocation50_spill] sm:$0xff] %v5016_v18 }
 0x1bc   : > { %v5018_v19 = vpop.permute.xlu0 %1149 }
 0x1bd   : > { %5840 = vst [vmem:[#allocation51_spill] sm:$0xff] %v5018_v19  ;;  %v5020_v2 = vpop.permute.xlu1 %1154 }
 0x1be   : > { %5841 = vst [vmem:[#allocation52_spill] sm:$0xff] %v5020_v2 }
 0x1c0   : > { %v5022_v3 = vpop.permute.xlu0 %1159 }
 0x1c1   : > { %5842 = vst [vmem:[#allocation53_spill] sm:$0xff] %v5022_v3  ;;  %v5034_v18 = vpop.permute.xlu1 %1164 }
 0x1c4   : > { %v5036_v19 = vpop.permute.xlu0 %1169 }
 0x1e3   : > { %v3470_v46 = vpop.f32.mrb[2].mxu0  ;;  %v3560_v47 = vpop.f32.mrb[0].mxu1 }
 0x1e4   : > { %v5025_v24 = vadd.f32 %v3470_v46, %v4212_v30  ;;  %v5027_v25 = vadd.f32 %v3560_v47, %v1010_v5  ;;  %v1792_v10 = vpop.f32.mrb[3].mxu0  ;;  %v2092_v13 = vpop.f32.mrb[1].mxu1 }
 0x1e5   : > { %v5030_v32 = vadd.f32 %v1792_v10, %v4214_v31  ;;  %v5032_v33 = vadd.f32 %v2092_v13, %v1005_v4 }
 0x1e6   : > { %5843 = vst [vmem:[#allocation54_spill] sm:$0xff] %v5025_v24  ;;  %5844 = vst [vmem:[#allocation55_spill] sm:$0xff] %v5027_v25 }
 0x1e7   : > { %5845 = vst [vmem:[#allocation56_spill] sm:$0xff] %v5032_v33  ;;  %v3473_v2 = vpop.f32.mrb[4].mxu0  ;;  %v3563_v3 = vpop.f32.mrb[2].mxu1 }
 0x1e8   : > { %v5039_v52 = vadd.f32 %v3473_v2, %v4224_v35  ;;  %v5041_v30 = vadd.f32 %v3563_v3, %v1020_v48  ;;  %v1802_v46 = vpop.f32.mrb[5].mxu0  ;;  %v2102_v47 = vpop.f32.mrb[3].mxu1 }
 0x1e9   : > { %v5044_v5 = vadd.f32 %v1802_v46, %v4222_v34  ;;  %v5046_v31 = vadd.f32 %v2102_v47, %v1015_v63  ;;  %v5058_v3 = vpop.permute.xlu1 %1174  ;;  %v5060_v34 = vpop.permute.xlu0 %1179 }
 0x1ea   : > { %5846 = vst [vmem:[#allocation57_spill] sm:$0xff] %v5041_v30 }
 0x1eb   : > { %5847 = vst [vmem:[#allocation58_spill] sm:$0xff] %v5046_v31  ;;  %v3476_v10 = vpop.f32.mrb[6].mxu0  ;;  %v3566_v13 = vpop.f32.mrb[4].mxu1 }
 0x1ec   : > { %v5049_v4 = vadd.f32 %v3476_v10, %v4240_v41  ;;  %v5051_v25 = vadd.f32 %v3566_v13, %v1030_v7  ;;  %v1812_v33 = vpop.f32.mrb[7].mxu0  ;;  %v2112_v24 = vpop.f32.mrb[5].mxu1 }
 0x1ed   : > { %v5054_v35 = vadd.f32 %v1812_v33, %v4238_v40  ;;  %v5056_v2 = vadd.f32 %v2112_v24, %v1025_v39 }
 0x1ee   : > { %5848 = vst [vmem:[#allocation59_spill] sm:$0xff] %v5051_v25 }
 0x1ef   : > { %5849 = vst [vmem:[#allocation60_spill] sm:$0xff] %v5056_v2  ;;  %v3479_v48 = vpop.f32.mrb[8].mxu0  ;;  %v3569_v63 = vpop.f32.mrb[6].mxu1 }
 0x1f0   : > { %v5063_v46 = vadd.f32 %v3479_v48, %v4250_v45  ;;  %v5065_v41 = vadd.f32 %v3569_v63, %v1040_v59  ;;  %v1822_v7 = vpop.f32.mrb[9].mxu0  ;;  %v2122_v47 = vpop.f32.mrb[7].mxu1 }
 0x1f1   : > { %v5068_v10 = vadd.f32 %v1822_v7, %v4248_v44  ;;  %v5070_v40 = vadd.f32 %v2122_v47, %v1035_v26  ;;  %v5083_v48 = vpop.permute.xlu1 %1184  ;;  %v5085_v44 = vpop.permute.xlu0 %1189 }
 0x1f2   : > { %5850 = vst [vmem:[#allocation61_spill] sm:$0xff] %v5065_v41 }
 0x1f3   : > { %5851 = vst [vmem:[#allocation62_spill] sm:$0xff] %v5070_v40  ;;  %v3482_v24 = vpop.f32.mrb[10].mxu0  ;;  %v3572_v33 = vpop.f32.mrb[8].mxu1 }
 0x1f4   : > { %v5073_v39 = vadd.f32 %v3482_v24, %v4266_v51  ;;  %v5075_v13 = vadd.f32 %v3572_v33, %v1050_v15  ;;  %v1832_v30 = vpop.f32.mrb[11].mxu0  ;;  %v2132_v31 = vpop.f32.mrb[9].mxu1 }
 0x1f5   : > { %v5078_v45 = vadd.f32 %v1832_v30, %v4264_v50  ;;  %v5081_v59 = vadd.f32 %v2132_v31, %v4978_v62 }
 0x1f6   : > { %5852 = vst [vmem:[#allocation63_spill] sm:$0xff] %v5075_v13  ;;  %v5887_v13 = vld [vmem:[#allocation17_spill] sm:$0xff] }
 0x1f7   : > { %5853 = vst [vmem:[#allocation64_spill] sm:$0xff] %v5081_v59  ;;  %v3485_v26 = vpop.f32.mrb[12].mxu0  ;;  %v3575_v63 = vpop.f32.mrb[10].mxu1  ;;  %v5891_v59 = vld [vmem:[#allocation20_spill] sm:$0xff] }
 0x1f8   : > { %v5088_v7 = vadd.f32 %v3485_v26, %v4276_v55  ;;  %v5091_v51 = vadd.f32 %v3575_v63, %v4982_v42  ;;  %v1842_v15 = vpop.f32.mrb[13].mxu0  ;;  %v2142_v47 = vpop.f32.mrb[11].mxu1 }
 0x1f9   : > { %v5094_v50 = vadd.f32 %v1842_v15, %v4274_v54  ;;  %v5097_v62 = vadd.f32 %v2142_v47, %v4980_v20  ;;  %v5111_v54 = vpop.permute.xlu1 %1194  ;;  %v5113_v20 = vpop.permute.xlu0 %1199 }
 0x1fa   : > { %5854 = vst [vmem:[#allocation65_spill] sm:$0xff] %v5091_v51 }
 0x1fb   : > { %5855 = vst [vmem:[#allocation66_spill] sm:$0xff] %v5097_v62  ;;  %v3488_v30 = vpop.f32.mrb[14].mxu0  ;;  %v3578_v31 = vpop.f32.mrb[12].mxu1 }
 0x1fc   : > { %v5100_v24 = vadd.f32 %v3488_v30, %v4292_v61  ;;  %v5103_v33 = vadd.f32 %v3578_v31, %v4986_v23  ;;  %v1852_v55 = vpop.f32.mrb[15].mxu0  ;;  %v2152_v26 = vpop.f32.mrb[13].mxu1 }
 0x1fd   : > { %v5106_v42 = vadd.f32 %v1852_v55, %v4290_v60  ;;  %v5109_v63 = vadd.f32 %v2152_v26, %v4984_v29 }
 0x1fe   : > { %5856 = vst [vmem:[#allocation67_spill] sm:$0xff] %v5103_v33 }
 0x1ff   : > { %5857 = vst [vmem:[#allocation68_spill] sm:$0xff] %v5109_v63  ;;  %v3491_v15 = vpop.f32.mrb[16].mxu0  ;;  %v3581_v47 = vpop.f32.mrb[14].mxu1 }
 0x200   : > { %v5116_v61 = vadd.f32 %v3491_v15, %v4302_v1  ;;  %v5119_v23 = vadd.f32 %v3581_v47, %v4990_v16  ;;  %v1862_v30 = vpop.f32.mrb[17].mxu0  ;;  %v2162_v31 = vpop.f32.mrb[15].mxu1 }
 0x201   : > { %v5122_v60 = vadd.f32 %v1862_v30, %v4300_v0  ;;  %v5125_v29 = vadd.f32 %v2162_v31, %v4988_v43  ;;  %v5139_v0 = vpop.permute.xlu1 %1204  ;;  %v5141_v43 = vpop.permute.xlu0 %1209 }
 0x202   : > { %5858 = vst [vmem:[#allocation69_spill] sm:$0xff] %v5119_v23 }
 0x203   : > { %5859 = vst [vmem:[#allocation70_spill] sm:$0xff] %v5125_v29  ;;  %v3494_v55 = vpop.f32.mrb[18].mxu0  ;;  %v3584_v26 = vpop.f32.mrb[16].mxu1  ;;  %v5878_v29 = vld [vmem:[#allocation51_spill] sm:$0xff] }
 0x204   : > { %v5128_v33 = vadd.f32 %v3494_v55, %v4318_v8  ;;  %v5131_v63 = vadd.f32 %v3584_v26, %v4994_v36  ;;  %v1872_v1 = vpop.f32.mrb[19].mxu0  ;;  %v2172_v15 = vpop.f32.mrb[17].mxu1 }
 0x205   : > { %v5134_v16 = vadd.f32 %v1872_v1, %v4316_v6  ;;  %v5137_v47 = vadd.f32 %v2172_v15, %v4992_v17 }
 0x206   : > { %5860 = vst [vmem:[#allocation71_spill] sm:$0xff] %v5131_v63 }
 0x207   : > { %5861 = vst [vmem:[#allocation72_spill] sm:$0xff] %v5137_v47  ;;  %v3497_v30 = vpop.f32.mrb[20].mxu0  ;;  %v3587_v31 = vpop.f32.mrb[18].mxu1 }
 0x208   : > { %v5144_v8 = vadd.f32 %v3497_v30, %v4328_v12  ;;  %v5147_v36 = vadd.f32 %v3587_v31, %v4998_v58  ;;  %v1882_v55 = vpop.f32.mrb[21].mxu0  ;;  %v2182_v26 = vpop.f32.mrb[19].mxu1 }
 0x209   : > { %v5150_v6 = vadd.f32 %v1882_v55, %v4326_v11  ;;  %v5153_v17 = vadd.f32 %v2182_v26, %v4996_v49  ;;  %v5167_v11 = vpop.permute.xlu1 %1214  ;;  %v5169_v49 = vpop.permute.xlu0 %1219 }
 0x20a   : > { %5862 = vst [vmem:[#allocation73_spill] sm:$0xff] %v5147_v36 }
 0x20b   : > { %5863 = vst [vmem:[#allocation74_spill] sm:$0xff] %v5153_v17  ;;  %v3500_v1 = vpop.f32.mrb[22].mxu0  ;;  %v3590_v15 = vpop.f32.mrb[20].mxu1 }
 0x20c   : > { %v5156_v63 = vadd.f32 %v3500_v1, %v4345_v22  ;;  %v5159_v47 = vadd.f32 %v3590_v15, %v5002_v28  ;;  %v1892_v12 = vpop.f32.mrb[23].mxu0  ;;  %v2192_v30 = vpop.f32.mrb[21].mxu1 }
 0x20d   : > { %v5162_v58 = vadd.f32 %v1892_v12, %v4343_v21  ;;  %v5165_v31 = vadd.f32 %v2192_v30, %v5000_v27 }
 0x20e   : > { %5864 = vst [vmem:[#allocation75_spill] sm:$0xff] %v5159_v47  ;;  %v5874_v47 = vld [vmem:[#allocation13_spill] sm:$0xff] }
 0x20f   : > { %5865 = vst [vmem:[#allocation76_spill] sm:$0xff] %v5165_v31  ;;  %v3503_v55 = vpop.f32.mrb[24].mxu0  ;;  %v3593_v26 = vpop.f32.mrb[22].mxu1  ;;  %v5877_v31 = vld [vmem:[#allocation16_spill] sm:$0xff] }
 0x210   : > { %v5172_v22 = vadd.f32 %v3503_v55, %v4383_v38  ;;  %v5175_v28 = vadd.f32 %v3593_v26, %v5006_v14  ;;  %v1902_v1 = vpop.f32.mrb[25].mxu0  ;;  %v2202_v15 = vpop.f32.mrb[23].mxu1  ;;  %v5869_v26 = vld [vmem:[#allocation47_spill] sm:$0xff] }
 0x211   : > { %v5178_v21 = vadd.f32 %v1902_v1, %v4381_v37  ;;  %v5181_v27 = vadd.f32 %v2202_v15, %v5004_v9  ;;  %v5195_v37 = vpop.permute.xlu1 %1224  ;;  %v5197_v9 = vpop.permute.xlu0 %1229 }
 0x212   : > { %5866 = vst [vmem:[#allocation77_spill] sm:$0xff] %v5175_v28 }
 0x213   : > { %5867 = vst [vmem:[#allocation78_spill] sm:$0xff] %v5181_v27  ;;  %v3506_v12 = vpop.f32.mrb[26].mxu0  ;;  %v3596_v30 = vpop.f32.mrb[24].mxu1  ;;  %v5871_v27 = vld [vmem:[#allocation14_spill] sm:$0xff] }
 0x214   : > { %v5184_v36 = vadd.f32 %v3506_v12, %v4417_v56  ;;  %v5187_v17 = vadd.f32 %v3596_v30, %v5010_v57  ;;  %v1912_v38 = vpop.f32.mrb[27].mxu0  ;;  %v2212_v55 = vpop.f32.mrb[25].mxu1  ;;  %v5872_v12 = vld [vmem:[#allocation49_spill] sm:$0xff] }
 0x215   : > { %v5190_v14 = vadd.f32 %v1912_v38, %v4415_v53  ;;  %v5193_v28 = vadd.f32 %v2212_v55, %v5869_v26  ;;  %v5875_v38 = vld [vmem:[#allocation48_spill] sm:$0xff] }
 0x216   : > { %5868 = vst [vmem:[#allocation79_spill] sm:$0xff] %v5187_v17 }
 0x217   : > { %5870 = vst [vmem:[#allocation47_spill] sm:$0xff] %v5193_v28  ;;  %v3509_v1 = vpop.f32.mrb[28].mxu0  ;;  %v3599_v15 = vpop.f32.mrb[26].mxu1 }
 0x218   : > { %v5200_v56 = vadd.f32 %v3509_v1, %v5871_v27  ;;  %v5203_v57 = vadd.f32 %v3599_v15, %v5872_v12  ;;  %v1922_v30 = vpop.f32.mrb[29].mxu0  ;;  %v2222_v17 = vpop.f32.mrb[27].mxu1  ;;  %v5880_v15 = vld [vmem:[#allocation15_spill] sm:$0xff] }
 0x219   : > { %v5206_v53 = vadd.f32 %v1922_v30, %v5874_v47  ;;  %v5209_v55 = vadd.f32 %v2222_v17, %v5875_v38  ;;  %v5223_v47 = vpop.permute.xlu1 %1234  ;;  %v5225_v17 = vpop.permute.xlu0 %1239 }
 0x21a   : > { %5873 = vst [vmem:[#allocation14_spill] sm:$0xff] %v5203_v57  ;;  %v5881_v57 = vld [vmem:[#allocation50_spill] sm:$0xff] }
 0x21b   : > { %5876 = vst [vmem:[#allocation49_spill] sm:$0xff] %v5209_v55  ;;  %v3512_v26 = vpop.f32.mrb[30].mxu0  ;;  %v3602_v28 = vpop.f32.mrb[28].mxu1  ;;  %v5883_v55 = vld [vmem:[#allocation18_spill] sm:$0xff] }
 0x21c   : > { %v5212_v23 = vadd.f32 %v3512_v26, %v5877_v31  ;;  %v5215_v51 = vadd.f32 %v3602_v28, %v5878_v29  ;;  %v1932_v27 = vpop.f32.mrb[31].mxu0  ;;  %v2232_v1 = vpop.f32.mrb[29].mxu1  ;;  %v5885_v26 = vld [vmem:[#allocation53_spill] sm:$0xff] }
 0x21d   : > { %v5218_v12 = vadd.f32 %v1932_v27, %v5880_v15  ;;  %v5221_v62 = vadd.f32 %v2232_v1, %v5881_v57  ;;  %v5889_v15 = vld [vmem:[#allocation52_spill] sm:$0xff] }
 0x21e   : > { %5879 = vst [vmem:[#allocation13_spill] sm:$0xff] %v5215_v51 }
 0x21f   : > { %5882 = vst [vmem:[#allocation48_spill] sm:$0xff] %v5221_v62  ;;  %v3515_v30 = vpop.f32.mrb[32].mxu0  ;;  %v3605_v38 = vpop.f32.mrb[30].mxu1 }
 0x220   : > { %v5228_v31 = vadd.f32 %v3515_v30, %v5883_v55  ;;  %v5231_v29 = vadd.f32 %v3605_v38, %v5885_v26  ;;  %v1942_v28 = vpop.f32.mrb[33].mxu0  ;;  %v2242_v51 = vpop.f32.mrb[31].mxu1  ;;  %v5893_v38 = vld [vmem:[#allocation19_spill] sm:$0xff] }
 0x221   : > { %v5234_v27 = vadd.f32 %v1942_v28, %v5887_v13  ;;  %v5237_v57 = vadd.f32 %v2242_v51, %v5889_v15  ;;  %v5251_v13 = vpop.permute.xlu1 %1244  ;;  %v5253_v51 = vpop.permute.xlu0 %1249 }
 0x222   : > { %5884 = vst [vmem:[#allocation16_spill] sm:$0xff] %v5228_v31  ;;  %5886 = vst [vmem:[#allocation51_spill] sm:$0xff] %v5231_v29 }
 0x223   : > { %5888 = vst [vmem:[#allocation15_spill] sm:$0xff] %v5234_v27  ;;  %5890 = vst [vmem:[#allocation50_spill] sm:$0xff] %v5237_v57  ;;  %v3518_v1 = vpop.f32.mrb[34].mxu0  ;;  %v3608_v62 = vpop.f32.mrb[32].mxu1  ;;  %v5895_v57 = vld [vmem:[#allocation22_spill] sm:$0xff] }
 0x224   : > { %v5240_v41 = vadd.f32 %v3518_v1, %v5891_v59  ;;  %v5243_v40 = vadd.f32 %v3608_v62, %v5036_v19  ;;  %v1952_v55 = vpop.f32.mrb[35].mxu0  ;;  %v2252_v30 = vpop.f32.mrb[33].mxu1 }
 0x225   : > { %v5246_v26 = vadd.f32 %v1952_v55, %v5893_v38  ;;  %v5249_v29 = vadd.f32 %v2252_v30, %v5034_v18 }
 0x226   : > { %5892 = vst [vmem:[#allocation18_spill] sm:$0xff] %v5243_v40  ;;  %v5897_v40 = vld [vmem:[#allocation21_spill] sm:$0xff] }
 0x227   : > { %5894 = vst [vmem:[#allocation53_spill] sm:$0xff] %v5249_v29  ;;  %v3521_v28 = vpop.f32.mrb[36].mxu0  ;;  %v3611_v15 = vpop.f32.mrb[34].mxu1  ;;  %v5899_v29 = vld [vmem:[#allocation24_spill] sm:$0xff] }
 0x228   : > { %v5256_v59 = vadd.f32 %v3521_v28, %v5895_v57  ;;  %v5259_v19 = vadd.f32 %v3611_v15, %v5060_v34  ;;  %v1962_v62 = vpop.f32.mrb[37].mxu0  ;;  %v2262_v1 = vpop.f32.mrb[35].mxu1  ;;  %v5901_v34 = vld [vmem:[#allocation23_spill] sm:$0xff] }
 0x229   : > { %v5262_v55 = vadd.f32 %v1962_v62, %v5897_v40  ;;  %v5265_v18 = vadd.f32 %v2262_v1, %v5058_v3  ;;  %v5279_v40 = vpop.permute.xlu1 %1254  ;;  %v1260_v3 = vpop.permute.xlu0 %1259 }
 0x22a   : > { %5896 = vst [vmem:[#allocation17_spill] sm:$0xff] %v5259_v19 }
 0x22b   : > { %5898 = vst [vmem:[#allocation52_spill] sm:$0xff] %v5265_v18  ;;  %v3524_v30 = vpop.f32.mrb[38].mxu0  ;;  %v3614_v38 = vpop.f32.mrb[36].mxu1  ;;  %v5903_v18 = vld [vmem:[#allocation26_spill] sm:$0xff] }
 0x22c   : > { %v5268_v25 = vadd.f32 %v3524_v30, %v5899_v29  ;;  %v5271_v2 = vadd.f32 %v3614_v38, %v5085_v44  ;;  %v1972_v57 = vpop.f32.mrb[39].mxu0  ;;  %v2272_v28 = vpop.f32.mrb[37].mxu1  ;;  %v5906_v38 = vld [vmem:[#allocation25_spill] sm:$0xff] }
 0x22d   : > { %v5274_v15 = vadd.f32 %v1972_v57, %v5901_v34  ;;  %v5277_v19 = vadd.f32 %v2272_v28, %v5083_v48  ;;  %v5908_v34 = vld [vmem:[#allocation28_spill] sm:$0xff] }
 0x22e   : > { %5900 = vst [vmem:[#allocation20_spill] sm:$0xff] %v5271_v2 }
 0x22f   : > { %5902 = vst [vmem:[#allocation19_spill] sm:$0xff] %v5277_v19  ;;  %v3527_v62 = vpop.f32.mrb[40].mxu0  ;;  %v3617_v1 = vpop.f32.mrb[38].mxu1 }
 0x230   : > { %v5282_v31 = vadd.f32 %v3527_v62, %v5903_v18  ;;  %v5285_v29 = vadd.f32 %v3617_v1, %v5113_v20  ;;  %v1982_v44 = vpop.f32.mrb[41].mxu0  ;;  %v2282_v30 = vpop.f32.mrb[39].mxu1  ;;  %v5911_v20 = vld [vmem:[#allocation27_spill] sm:$0xff] }
 0x231   : > { %v5288_v2 = vadd.f32 %v1982_v44, %v5906_v38  ;;  %v5291_v57 = vadd.f32 %v2282_v30, %v5111_v54  ;;  %v1265_v44 = vpop.permute.xlu1 %1264  ;;  %v1270_v38 = vpop.permute.xlu0 %1269 }
 0x232   : > { %5904 = vst [vmem:[#allocation22_spill] sm:$0xff] %v5282_v31  ;;  %5905 = vst [vmem:[#allocation21_spill] sm:$0xff] %v5285_v29 }
 0x233   : > { %5907 = vst [vmem:[#allocation24_spill] sm:$0xff] %v5291_v57  ;;  %v3530_v48 = vpop.f32.mrb[42].mxu0  ;;  %v3620_v28 = vpop.f32.mrb[40].mxu1  ;;  %v5913_v57 = vld [vmem:[#allocation30_spill] sm:$0xff] }
 0x234   : > { %v5294_v19 = vadd.f32 %v3530_v48, %v5908_v34  ;;  %v5297_v27 = vadd.f32 %v3620_v28, %v5141_v43  ;;  %v1992_v18 = vpop.f32.mrb[43].mxu0  ;;  %v2292_v62 = vpop.f32.mrb[41].mxu1  ;;  %v5916_v34 = vld [vmem:[#allocation29_spill] sm:$0xff] }
 0x235   : > { %v5300_v1 = vadd.f32 %v1992_v18, %v5911_v20  ;;  %v5303_v29 = vadd.f32 %v2292_v62, %v5139_v0  ;;  %v5918_v20 = vld [vmem:[#allocation32_spill] sm:$0xff] }
 0x236   : > { %5909 = vst [vmem:[#allocation23_spill] sm:$0xff] %v5294_v19  ;;  %5910 = vst [vmem:[#allocation26_spill] sm:$0xff] %v5297_v27 }
 0x237   : > { %5912 = vst [vmem:[#allocation25_spill] sm:$0xff] %v5303_v29  ;;  %v3533_v54 = vpop.f32.mrb[44].mxu0  ;;  %v3623_v30 = vpop.f32.mrb[42].mxu1 }
 0x238   : > { %v5306_v31 = vadd.f32 %v3533_v54, %v5913_v57  ;;  %v5309_v48 = vadd.f32 %v3623_v30, %v5169_v49  ;;  %v2002_v43 = vpop.f32.mrb[45].mxu0  ;;  %v2302_v28 = vpop.f32.mrb[43].mxu1  ;;  %v5921_v49 = vld [vmem:[#allocation31_spill] sm:$0xff] }
 0x239   : > { %v5312_v27 = vadd.f32 %v2002_v43, %v5916_v34  ;;  %v5315_v18 = vadd.f32 %v2302_v28, %v5167_v11  ;;  %v1275_v43 = vpop.permute.xlu1 %1274  ;;  %v1280_v34 = vpop.permute.xlu0 %1279 }
 0x23a   : > { %5914 = vst [vmem:[#allocation28_spill] sm:$0xff] %v5306_v31  ;;  %5915 = vst [vmem:[#allocation27_spill] sm:$0xff] %v5309_v48 }
 0x23b   : > { %5917 = vst [vmem:[#allocation30_spill] sm:$0xff] %v5315_v18  ;;  %v3536_v0 = vpop.f32.mrb[46].mxu0  ;;  %v3626_v62 = vpop.f32.mrb[44].mxu1  ;;  %v5923_v18 = vld [vmem:[#allocation34_spill] sm:$0xff] }
 0x23c   : > { %v5318_v29 = vadd.f32 %v3536_v0, %v5918_v20  ;;  %v5321_v19 = vadd.f32 %v3626_v62, %v5197_v9  ;;  %v2012_v57 = vpop.f32.mrb[47].mxu0  ;;  %v2312_v54 = vpop.f32.mrb[45].mxu1  ;;  %v5926_v20 = vld [vmem:[#allocation33_spill] sm:$0xff] }
 0x23d   : > { %v5324_v30 = vadd.f32 %v2012_v57, %v5921_v49  ;;  %v5327_v48 = vadd.f32 %v2312_v54, %v5195_v37  ;;  %v5928_v49 = vld [vmem:[#allocation36_spill] sm:$0xff] }
 0x23e   : > { %5919 = vst [vmem:[#allocation29_spill] sm:$0xff] %v5318_v29  ;;  %5920 = vst [vmem:[#allocation32_spill] sm:$0xff] %v5321_v19 }
 0x23f   : > { %5922 = vst [vmem:[#allocation31_spill] sm:$0xff] %v5327_v48  ;;  %v3539_v11 = vpop.f32.mrb[48].mxu0  ;;  %v3629_v28 = vpop.f32.mrb[46].mxu1 }
 0x240   : > { %v5330_v31 = vadd.f32 %v3539_v11, %v5923_v18  ;;  %v5333_v0 = vadd.f32 %v3629_v28, %v5225_v17  ;;  %v2022_v9 = vpop.f32.mrb[49].mxu0  ;;  %v2322_v62 = vpop.f32.mrb[47].mxu1  ;;  %v5931_v17 = vld [vmem:[#allocation35_spill] sm:$0xff] }
 0x241   : > { %v5336_v19 = vadd.f32 %v2022_v9, %v5926_v20  ;;  %v5339_v57 = vadd.f32 %v2322_v62, %v5223_v47  ;;  %v1285_v9 = vpop.permute.xlu1 %1284  ;;  %v1290_v20 = vpop.permute.xlu0 %1289 }
 0x242   : > { %5924 = vst [vmem:[#allocation34_spill] sm:$0xff] %v5330_v31  ;;  %5925 = vst [vmem:[#allocation80_spill] sm:$0xff] %v5333_v0 }
 0x243   : > { %5927 = vst [vmem:[#allocation33_spill] sm:$0xff] %v5339_v57  ;;  %v3542_v37 = vpop.f32.mrb[50].mxu0  ;;  %v3632_v54 = vpop.f32.mrb[48].mxu1  ;;  %v5934_v57 = vld [vmem:[#allocation38_spill] sm:$0xff] }
 0x244   : > { %v5342_v48 = vadd.f32 %v3542_v37, %v5928_v49  ;;  %v5345_v29 = vadd.f32 %v3632_v54, %v5253_v51  ;;  %v2032_v18 = vpop.f32.mrb[51].mxu0  ;;  %v2332_v11 = vpop.f32.mrb[49].mxu1  ;;  %v5937_v54 = vld [vmem:[#allocation37_spill] sm:$0xff] }
 0x245   : > { %v5348_v28 = vadd.f32 %v2032_v18, %v5931_v17  ;;  %v5351_v0 = vadd.f32 %v2332_v11, %v5251_v13  ;;  %v5939_v11 = vld [vmem:[#allocation40_spill] sm:$0xff] }
 0x246   : > { %5929 = vst [vmem:[#allocation36_spill] sm:$0xff] %v5342_v48  ;;  %5930 = vst [vmem:[#allocation81_spill] sm:$0xff] %v5345_v29 }
 0x247   : > { %5932 = vst [vmem:[#allocation35_spill] sm:$0xff] %v5348_v28  ;;  %5933 = vst [vmem:[#allocation82_spill] sm:$0xff] %v5351_v0  ;;  %v3545_v47 = vpop.f32.mrb[52].mxu0  ;;  %v3635_v62 = vpop.f32.mrb[50].mxu1 }
 0x248   : > { %v5354_v31 = vadd.f32 %v3545_v47, %v5934_v57  ;;  %v5356_v37 = vadd.f32 %v3635_v62, %v1260_v3  ;;  %v2042_v49 = vpop.f32.mrb[53].mxu0  ;;  %v2342_v51 = vpop.f32.mrb[51].mxu1  ;;  %v5942_v47 = vld [vmem:[#allocation39_spill] sm:$0xff] }
 0x249   : > { %v5359_v29 = vadd.f32 %v2042_v49, %v5937_v54  ;;  %v5362_v18 = vadd.f32 %v2342_v51, %v5279_v40  ;;  %v1300_v49 = vpop.permute.xlu0 %1299  ;;  %v5945_v40 = vld [vmem:[#allocation42_spill] sm:$0xff] }
 0x24a   : > { %5935 = vst [vmem:[#allocation38_spill] sm:$0xff] %v5354_v31  ;;  %5936 = vst [vmem:[#allocation83_spill] sm:$0xff] %v5356_v37  ;;  %v1295_v37 = vpop.permute.xlu1 %1294 }
 0x24b   : > { %5938 = vst [vmem:[#allocation37_spill] sm:$0xff] %v5362_v18  ;;  %v3548_v17 = vpop.f32.mrb[54].mxu0  ;;  %v3638_v13 = vpop.f32.mrb[52].mxu1 }
 0x24c   : > { %v5365_v0 = vadd.f32 %v3548_v17, %v5939_v11  ;;  %v5367_v48 = vadd.f32 %v3638_v13, %v1270_v38  ;;  %v2052_v28 = vpop.f32.mrb[55].mxu0  ;;  %v2352_v57 = vpop.f32.mrb[53].mxu1  ;;  %v5948_v38 = vld [vmem:[#allocation41_spill] sm:$0xff] }
 0x24d   : > { %v5370_v3 = vadd.f32 %v2052_v28, %v5942_v47  ;;  %v5372_v62 = vadd.f32 %v2352_v57, %v1265_v44  ;;  %v5950_v44 = vld [vmem:[#allocation44_spill] sm:$0xff] }
 0x24e   : > { %5940 = vst [vmem:[#allocation40_spill] sm:$0xff] %v5365_v0  ;;  %5941 = vst [vmem:[#allocation84_spill] sm:$0xff] %v5367_v48 }
 0x24f   : > { %5943 = vst [vmem:[#allocation39_spill] sm:$0xff] %v5370_v3  ;;  %5944 = vst [vmem:[#allocation85_spill] sm:$0xff] %v5372_v62  ;;  %v3551_v54 = vpop.f32.mrb[56].mxu0  ;;  %v3641_v31 = vpop.f32.mrb[54].mxu1 }
 0x250   : > { %v5375_v51 = vadd.f32 %v3551_v54, %v5945_v40  ;;  %v5377_v18 = vadd.f32 %v3641_v31, %v1280_v34  ;;  %v2062_v17 = vpop.f32.mrb[57].mxu0  ;;  %v2362_v11 = vpop.f32.mrb[55].mxu1  ;;  %v5953_v40 = vld [vmem:[#allocation43_spill] sm:$0xff] }
 0x251   : > { %v5380_v13 = vadd.f32 %v2062_v17, %v5948_v38  ;;  %v5382_v48 = vadd.f32 %v2362_v11, %v1275_v43  ;;  %v1310_v54 = vpop.permute.xlu0 %1309  ;;  %v5956_v43 = vld [vmem:[#allocation46_spill] sm:$0xff] }
 0x252   : > { %5946 = vst [vmem:[#allocation42_spill] sm:$0xff] %v5375_v51  ;;  %5947 = vst [vmem:[#allocation86_spill] sm:$0xff] %v5377_v18  ;;  %v1305_v18 = vpop.permute.xlu1 %1304 }
 0x253   : > { %5949 = vst [vmem:[#allocation41_spill] sm:$0xff] %v5382_v48  ;;  %v3554_v28 = vpop.f32.mrb[58].mxu0  ;;  %v3644_v47 = vpop.f32.mrb[56].mxu1 }
 0x254   : > { %v5385_v57 = vadd.f32 %v3554_v28, %v5950_v44  ;;  %v5387_v62 = vadd.f32 %v3644_v47, %v1290_v20  ;;  %v2072_v0 = vpop.f32.mrb[59].mxu0  ;;  %v2372_v3 = vpop.f32.mrb[57].mxu1  ;;  %v5959_v20 = vld [vmem:[#allocation45_spill] sm:$0xff] }
 0x255   : > { %v5390_v31 = vadd.f32 %v2072_v0, %v5953_v40  ;;  %v5392_v34 = vadd.f32 %v2372_v3, %v1285_v9 }
 0x256   : > { %5951 = vst [vmem:[#allocation44_spill] sm:$0xff] %v5385_v57  ;;  %5952 = vst [vmem:[#allocation87_spill] sm:$0xff] %v5387_v62  ;;  %v1320_v57 = vpop.permute.xlu0 %1319  ;;  %v1315_v40 = vpop.permute.xlu1 %1314 }
 0x257   : > { %5954 = vst [vmem:[#allocation43_spill] sm:$0xff] %v5390_v31  ;;  %5955 = vst [vmem:[#allocation88_spill] sm:$0xff] %v5392_v34  ;;  %v3557_v17 = vpop.f32.mrb[60].mxu0  ;;  %v3647_v38 = vpop.f32.mrb[58].mxu1 }
 0x258   : > { %v5395_v11 = vadd.f32 %v3557_v17, %v5956_v43  ;;  %v5397_v48 = vadd.f32 %v3647_v38, %v1300_v49  ;;  %v2082_v28 = vpop.f32.mrb[61].mxu0  ;;  %v2382_v44 = vpop.f32.mrb[59].mxu1 }
 0x259   : > { %v5400_v47 = vadd.f32 %v2082_v28, %v5959_v20  ;;  %v5402_v62 = vadd.f32 %v2382_v44, %v1295_v37 }
 0x25a   : > { %5957 = vst [vmem:[#allocation46_spill] sm:$0xff] %v5395_v11  ;;  %5958 = vst [vmem:[#allocation89_spill] sm:$0xff] %v5397_v48  ;;  %v1330_v38 = vpop.permute.xlu0 %1329  ;;  %v1325_v48 = vpop.permute.xlu1 %1324 }
 0x25b   : > { %5960 = vst [vmem:[#allocation45_spill] sm:$0xff] %v5400_v47  ;;  %5961 = vst [vmem:[#allocation90_spill] sm:$0xff] %v5402_v62  ;;  %v3650_v0 = vpop.f32.mrb[60].mxu1 }
 0x25c   : > { %v5404_v9 = vadd.f32 %v3650_v0, %v1310_v54  ;;  %v2392_v3 = vpop.f32.mrb[61].mxu1 }
 0x25d   : > { %v5406_v34 = vadd.f32 %v2392_v3, %v1305_v18 }
 0x25e   : > { %5962 = vst [vmem:[#allocation91_spill] sm:$0xff] %v5404_v9  ;;  %v1340_v62 = vpop.permute.xlu0 %1339  ;;  %v1335_v0 = vpop.permute.xlu1 %1334 }
 0x25f   : > { %5963 = vst [vmem:[#allocation92_spill] sm:$0xff] %v5406_v34  ;;  %v3653_v31 = vpop.f32.mrb[62].mxu1 }
 0x260   : > { %v5408_v17 = vadd.f32 %v3653_v31, %v1320_v57  ;;  %v2402_v49 = vpop.f32.mrb[63].mxu1 }
 0x261   : > { %v5410_v43 = vadd.f32 %v2402_v49, %v1315_v40 }
 0x262   : > { %5964 = vst [vmem:[#allocation93_spill] sm:$0xff] %v5408_v17 }
 0x263   : > { %5965 = vst [vmem:[#allocation94_spill] sm:$0xff] %v5410_v43  ;;  %v3656_v28 = vpop.f32.mrb[64].mxu1 }
 0x264   : > { %v5412_v20 = vadd.f32 %v3656_v28, %v1330_v38  ;;  %v2412_v37 = vpop.f32.mrb[65].mxu1 }
 0x265   : > { %v5414_v44 = vadd.f32 %v2412_v37, %v1325_v48 }
 0x266   : > { %5966 = vst [vmem:[#allocation95_spill] sm:$0xff] %v5412_v20 }
 0x267   : > { %5967 = vst [vmem:[#allocation96_spill] sm:$0xff] %v5414_v44  ;;  %v3659_v54 = vpop.f32.mrb[66].mxu1 }
 0x268   : > { %v5416_v9 = vadd.f32 %v3659_v54, %v1340_v62  ;;  %v2422_v18 = vpop.f32.mrb[67].mxu1 }
 0x269   : > { %v5418_v3 = vadd.f32 %v2422_v18, %v1335_v0 }
 0x26a   : > { %5968 = vst [vmem:[#allocation97_spill] sm:$0xff] %v5416_v9 }
 0x26b   : > { %5969 = vst [vmem:[#allocation98_spill] sm:$0xff] %v5418_v3 }
 0x26c LB: >> { %s2439_s30 = sld [smem:[#allocation7 + %s3832_s1]]  ;;  %vm2443_vm4 = vcmask 253952   ;;  %s2442_s13 = scalar_lea.vmem [#allocation4], %s3832_s1  ;;  %s3832_s1 = sphi %s3830_s1, %s2437_s1  }
 0x26d   : >> { %s2437_s1 = sadd.s32 1, %s3832_s1  }
 0x26e   : >> { %p2434_p1 = scmp.ge.s32.totalorder %s2437_s1, 128  }
 0x26f   : > { %s3834_s14 = smov (%p2434_p1), 0  }
 0x270   : > { %2436 = sbr.rel (!%p2434_p1) target bundleno = 620 (0x26c), region = 113 }
 0x272   : >> { %s2440_s12 = scalar_lea.vmem [#allocation2], %s2439_s30 }
 0x273   : >> { %v2441_v57 = vld [vmem:[%s2440_s12] sm:$0x1] }
 0x274   : >> { %2444 = vst.msk [vmem:[%s2442_s13] sm:$0x1] %vm2443_vm4, %v2441_v57 }
 0x27b   : > { %v2445_v48 = vld [vmem:[#allocation4] sm:$0xff]  ;;  %v2446_v62 = vld [vmem:[#allocation4 + $0x8] sm:$0xff]  ;;  %v2447_v31 = vld [vmem:[#allocation4 + $0x10] sm:$0xff] }
 0x27c   : > { %2461 = vxpose.xlu0.b32.start [1/16] (narrow) %v2445_v48, 32  ;;  %v2448_v40 = vld [vmem:[#allocation4 + $0x18] sm:$0xff]  ;;  %v2449_v49 = vld [vmem:[#allocation4 + $0x20] sm:$0xff]  ;;  %v2450_v38 = vld [vmem:[#allocation4 + $0x28] sm:$0xff] }
 0x27d   : > { %v2451_v28 = vld [vmem:[#allocation4 + $0x30] sm:$0xff]  ;;  %v2452_v37 = vld [vmem:[#allocation4 + $0x38] sm:$0xff]  ;;  %v2453_v54 = vld [vmem:[#allocation4 + $0x40] sm:$0xff] }
 0x27e   : > { %v2454_v0 = vld [vmem:[#allocation4 + $0x48] sm:$0xff]  ;;  %v2455_v18 = vld [vmem:[#allocation4 + $0x50] sm:$0xff]  ;;  %v2456_v57 = vld [vmem:[#allocation4 + $0x58] sm:$0xff] }
 0x27f   : > { %v2457_v48 = vld [vmem:[#allocation4 + $0x60] sm:$0xff] }
 0x280   : > { %2462 = vxpose.xlu0.b32.cont [2/16] (narrow) %v2446_v62, 32  ;;  %v2458_v62 = vld [vmem:[#allocation4 + $0x68] sm:$0xff] }
 0x284   : > { %2463 = vxpose.xlu0.b32.cont [3/16] (narrow) %v2447_v31, 32  ;;  %v2459_v31 = vld [vmem:[#allocation4 + $0x70] sm:$0xff] }
 0x288   : > { %2464 = vxpose.xlu0.b32.cont [4/16] (narrow) %v2448_v40, 32  ;;  %v2460_v40 = vld [vmem:[#allocation4 + $0x78] sm:$0xff] }
 0x28c   : > { %2465 = vxpose.xlu0.b32.cont [5/16] (narrow) %v2449_v49, 32  ;;  %v2493_v49 = vlaneseq }
 0x290   : > { %2466 = vxpose.xlu0.b32.cont [6/16] (narrow) %v2450_v38, 32  ;;  %v2494_v38 = vshrl.u32 %v2493_v49, 7 }
 0x292   : > { %v5437_v20 = vsub.s32 3, %v2494_v38  ;;  %v5440_v47 = vsub.s32 4, %v2494_v38 }
 0x294   : > { %2467 = vxpose.xlu0.b32.cont [7/16] (narrow) %v2451_v28, 32  ;;  %v5421_v28 = vsub.s32 0, %v2494_v38 }
 0x298   : > { %2468 = vxpose.xlu0.b32.cont [8/16] (narrow) %v2452_v37, 32  ;;  %v5423_v37 = vsub.s32 1, %v2494_v38 }
 0x29c   : > { %2469 = vxpose.xlu0.b32.cont [9/16] (narrow) %v2453_v54, 32 }
 0x2a0   : > { %2470 = vxpose.xlu0.b32.cont [10/16] (narrow) %v2454_v0, 32 }
 0x2a4   : > { %2471 = vxpose.xlu0.b32.cont [11/16] (narrow) %v2455_v18, 32 }
 0x2a8   : > { %2472 = vxpose.xlu0.b32.cont [12/16] (narrow) %v2456_v57, 32  ;;  %v5427_v57 = vsub.s32 2, %v2494_v38 }
 0x2ac   : > { %2473 = vxpose.xlu0.b32.cont [13/16] (narrow) %v2457_v48, 32 }
 0x2b0   : > { %2474 = vxpose.xlu0.b32.cont [14/16] (narrow) %v2458_v62, 32  ;;  %v5970_v62 = vld [vmem:[#allocation54_spill] sm:$0xff] }
 0x2b4   : > { %2475 = vxpose.xlu0.b32.cont [15/16] (narrow) %v2459_v31, 32 }
 0x2b8   : > { %2476 = vxpose.xlu0.b32.end [16/16] (narrow) %v2460_v40, 32 }
 0x2fc   : > { %v2477_v54 = vpop.trf.xlu0 }
 0x2fd   : > { %v2496_v0 = vrot.slane %v2477_v54, %v5421_v28  ;;  %v2508_v18 = vrot.slane %v2477_v54, %v5423_v37  ;;  %v2520_v44 = vrot.slane %v2477_v54, %v5427_v57 }
 0x2ff   : > { %v2497_v48 = vmul.f32 %v2496_v0, %v5030_v32  ;;  %v2498_v9 = vmul.f32 %v2496_v0, %v5970_v62  ;;  %v2499_v31 = vmul.f32 %v2496_v0, %v5044_v5  ;;  %v2509_v40 = vmul.f32 %v2508_v18, %v5054_v35 }
 0x300   : > { %v2500_v49 = vmul.f32 %v2496_v0, %v5039_v52  ;;  %v2510_v17 = vmul.f32 %v2508_v18, %v5049_v4  ;;  %v2511_v3 = vmul.f32 %v2508_v18, %v5068_v10  ;;  %v2512_v43 = vmul.f32 %v2508_v18, %v5063_v46 }
 0x301   : > { %v2513_v34 = vadd.f32 %v2509_v40, %v2497_v48  ;;  %v2521_v5 = vmul.f32 %v2520_v44, %v5078_v45  ;;  %v2532_v52 = vrot.slane %v2477_v54, %v5437_v20  ;;  %v2522_v4 = vmul.f32 %v2520_v44, %v5073_v39 }
 0x302   : > { %v2514_v32 = vadd.f32 %v2510_v17, %v2498_v9  ;;  %v2515_v11 = vadd.f32 %v2511_v3, %v2499_v31  ;;  %v2516_v62 = vadd.f32 %v2512_v43, %v2500_v49  ;;  %v2523_v35 = vmul.f32 %v2520_v44, %v5094_v50 }
 0x303   : > { %v2524_v46 = vmul.f32 %v2520_v44, %v5088_v7  ;;  %v2525_v10 = vadd.f32 %v2521_v5, %v2513_v34  ;;  %v5447_v48 = vsub.s32 5, %v2494_v38  ;;  %v2533_v9 = vmul.f32 %v2532_v52, %v5106_v42  ;;  %v5463_v5 = vpop.trf.xlu0 }
 0x304   : > { %v2526_v0 = vadd.f32 %v2522_v4, %v2514_v32  ;;  %v2527_v18 = vadd.f32 %v2523_v35, %v2515_v11  ;;  %v2544_v17 = vrot.slane %v2477_v54, %v5440_v47  ;;  %v2534_v45 = vmul.f32 %v2532_v52, %v5100_v24 }
 0x305   : > { %v2528_v51 = vadd.f32 %v2524_v46, %v2516_v62  ;;  %v2535_v43 = vmul.f32 %v2532_v52, %v5122_v60  ;;  %v2536_v39 = vmul.f32 %v2532_v52, %v5116_v61  ;;  %v2537_v3 = vadd.f32 %v2533_v9, %v2525_v10 }
 0x306   : > { %v2538_v50 = vadd.f32 %v2534_v45, %v2526_v0  ;;  %v5454_v34 = vsub.s32 6, %v2494_v38  ;;  %v2545_v11 = vmul.f32 %v2544_v17, %v5134_v16  ;;  %v2556_v44 = vrot.slane %v2477_v54, %v5447_v48 }
 0x307   : > { %v2539_v31 = vadd.f32 %v2535_v43, %v2527_v18  ;;  %v2540_v7 = vadd.f32 %v2536_v39, %v2528_v51  ;;  %v2546_v42 = vmul.f32 %v2544_v17, %v5128_v33  ;;  %v2547_v40 = vmul.f32 %v2544_v17, %v5150_v6 }
 0x308   : > { %v2548_v24 = vmul.f32 %v2544_v17, %v5144_v8  ;;  %v2549_v49 = vadd.f32 %v2545_v11, %v2537_v3  ;;  %v2557_v62 = vmul.f32 %v2556_v44, %v5162_v58  ;;  %v2568_v51 = vrot.slane %v2477_v54, %v5454_v34 }
 0x309   : > { %v2550_v60 = vadd.f32 %v2546_v42, %v2538_v50  ;;  %v2551_v32 = vadd.f32 %v2547_v40, %v2539_v31  ;;  %v5465_v52 = vsub.s32 7, %v2494_v38  ;;  %v2558_v16 = vmul.f32 %v2556_v44, %v5156_v63  ;;  %v5972_v42 = vld [vmem:[#allocation22_spill] sm:$0xff] }
 0x30a   : > { %v2552_v61 = vadd.f32 %v2548_v24, %v2540_v7  ;;  %v2559_v33 = vmul.f32 %v2556_v44, %v5178_v21  ;;  %v2560_v6 = vmul.f32 %v2556_v44, %v5172_v22  ;;  %v2561_v4 = vadd.f32 %v2557_v62, %v2549_v49  ;;  %v5971_v7 = vld [vmem:[#allocation15_spill] sm:$0xff]  ;;  %v5976_v62 = vld [vmem:[#allocation29_spill] sm:$0xff] }
 0x30b   : > { %v2562_v8 = vadd.f32 %v2558_v16, %v2550_v60  ;;  %v2592_v10 = vrot.slane %v5463_v5, %v5421_v28  ;;  %v2569_v58 = vmul.f32 %v2568_v51, %v5190_v14  ;;  %v2580_v0 = vrot.slane %v2477_v54, %v5465_v52 }
 0x30c   : > { %v2563_v35 = vadd.f32 %v2559_v33, %v2551_v32  ;;  %v2564_v46 = vadd.f32 %v2560_v6, %v2552_v61  ;;  %v2570_v38 = vmul.f32 %v2568_v51, %v5184_v36  ;;  %v2571_v18 = vmul.f32 %v2568_v51, %v5206_v53  ;;  %v5500_v61 = vpop.trf.xlu0 }
 0x30d   : > { %v2572_v63 = vmul.f32 %v2568_v51, %v5200_v56  ;;  %v2604_v22 = vrot.slane %v5463_v5, %v5423_v37  ;;  %v2573_v21 = vadd.f32 %v2569_v58, %v2561_v4  ;;  %v2616_v9 = vrot.slane %v5463_v5, %v5427_v57  ;;  %v5977_v4 = vld [vmem:[#allocation34_spill] sm:$0xff] }
 0x30e   : > { %v2628_v17 = vrot.slane %v5463_v5, %v5437_v20  ;;  %v2574_v45 = vadd.f32 %v2570_v38, %v2562_v8  ;;  %v2575_v14 = vadd.f32 %v2571_v18, %v2563_v35  ;;  %v2593_v54 = vmul.f32 %v2592_v10, %v5246_v26 }
 0x30f   : > { %v2576_v43 = vadd.f32 %v2572_v63, %v2564_v46  ;;  %v2594_v36 = vmul.f32 %v2592_v10, %v5240_v41  ;;  %v2595_v53 = vmul.f32 %v2592_v10, %v5262_v55  ;;  %v2596_v56 = vmul.f32 %v2592_v10, %v5256_v59  ;;  %v5973_v55 = vld [vmem:[#allocation23_spill] sm:$0xff]  ;;  %v5974_v59 = vld [vmem:[#allocation16_spill] sm:$0xff] }
 0x310   : > { %v2581_v39 = vmul.f32 %v2580_v0, %v5218_v12  ;;  %v2605_v3 = vmul.f32 %v2604_v22, %v5274_v15  ;;  %v2606_v50 = vmul.f32 %v2604_v22, %v5268_v25  ;;  %v2582_v31 = vmul.f32 %v2580_v0, %v5212_v23  ;;  %v5975_v25 = vld [vmem:[#allocation28_spill] sm:$0xff] }
 0x311   : > { %v2583_v11 = vmul.f32 %v2580_v0, %v5971_v7  ;;  %v2607_v44 = vmul.f32 %v2604_v22, %v5288_v2  ;;  %v2608_v26 = vmul.f32 %v2604_v22, %v5972_v42  ;;  %v2617_v41 = vmul.f32 %v2616_v9, %v5300_v1 }
 0x312   : > { %v2585_v40 = vadd.f32 %v2581_v39, %v2573_v21  ;;  %v2618_v24 = vmul.f32 %v2616_v9, %v5973_v55  ;;  %v2584_v49 = vmul.f32 %v2580_v0, %v5974_v59  ;;  %v2586_v12 = vadd.f32 %v2582_v31, %v2574_v45  ;;  %v5982_v31 = vld [vmem:[#allocation40_spill] sm:$0xff] }
 0x313   : > { %v2587_v60 = vadd.f32 %v2583_v11, %v2575_v14  ;;  %v2619_v15 = vmul.f32 %v2616_v9, %v5312_v27  ;;  %v2620_v32 = vmul.f32 %v2616_v9, %v5975_v25  ;;  %v2629_v23 = vmul.f32 %v2628_v17, %v5324_v30  ;;  %v5979_v14 = vld [vmem:[#allocation36_spill] sm:$0xff]  ;;  %v5986_v25 = vld [vmem:[#allocation45_spill] sm:$0xff] }
 0x314   : > { %v2597_v2 = vadd.f32 %v2593_v54, %v2585_v40  ;;  %v2630_v51 = vmul.f32 %v2628_v17, %v5976_v62  ;;  %v2588_v16 = vadd.f32 %v2584_v49, %v2576_v43  ;;  %v2598_v1 = vadd.f32 %v2594_v36, %v2586_v12  ;;  %v5983_v40 = vld [vmem:[#allocation42_spill] sm:$0xff]  ;;  %v5985_v12 = vld [vmem:[#allocation44_spill] sm:$0xff] }
 0x315   : > { %v2599_v33 = vadd.f32 %v2595_v53, %v2587_v60  ;;  %v2631_v6 = vmul.f32 %v2628_v17, %v5336_v19  ;;  %v5505_v8 = vmul.f32 %v2628_v17, %v5977_v4  ;;  %v2640_v27 = vrot.slane %v5463_v5, %v5440_v47  ;;  %v5978_v17 = vld [vmem:[#allocation35_spill] sm:$0xff]  ;;  %v5980_v53 = vld [vmem:[#allocation38_spill] sm:$0xff] }
 0x316   : > { %v2609_v35 = vadd.f32 %v2605_v3, %v2597_v2  ;;  %v2652_v30 = vrot.slane %v5463_v5, %v5447_v48  ;;  %v2664_v46 = vrot.slane %v5463_v5, %v5454_v34  ;;  %v2688_v10 = vrot.slane %v5500_v61, %v5421_v28  ;;  %v5981_v3 = vld [vmem:[#allocation39_spill] sm:$0xff]  ;;  %v5987_v2 = vld [vmem:[#allocation46_spill] sm:$0xff] }
 0x317   : > { %v2610_v58 = vadd.f32 %v2606_v50, %v2598_v1  ;;  %v2700_v19 = vrot.slane %v5500_v61, %v5423_v37  ;;  %v2712_v0 = vrot.slane %v5500_v61, %v5427_v57  ;;  %v2611_v38 = vadd.f32 %v2607_v44, %v2599_v33  ;;  %v5990_v33 = vld [vmem:[#allocation62_spill] sm:$0xff] }
 0x318   : > { %v2621_v18 = vadd.f32 %v2617_v41, %v2609_v35  ;;  %v5521_v63 = vrot.slane %v5500_v61, %v5437_v20  ;;  %v5525_v22 = vrot.slane %v5500_v61, %v5440_v47  ;;  %v2600_v21 = vadd.f32 %v2596_v56, %v2588_v16  ;;  %v5988_v16 = vld [vmem:[#allocation60_spill] sm:$0xff] }
 0x319   : > { %v2622_v9 = vadd.f32 %v2618_v24, %v2610_v58  ;;  %v2641_v45 = vmul.f32 %v2640_v27, %v5978_v17  ;;  %v2642_v43 = vmul.f32 %v2640_v27, %v5979_v14  ;;  %v2643_v54 = vmul.f32 %v2640_v27, %v5359_v29  ;;  %v5984_v24 = vld [vmem:[#allocation43_spill] sm:$0xff] }
 0x31a   : > { %v2633_v36 = vadd.f32 %v2629_v23, %v2621_v18  ;;  %v2644_v39 = vmul.f32 %v2640_v27, %v5980_v53  ;;  %v2653_v50 = vmul.f32 %v2652_v30, %v5981_v3  ;;  %v2654_v7 = vmul.f32 %v2652_v30, %v5982_v31  ;;  %v5991_v27 = vld [vmem:[#allocation61_spill] sm:$0xff]  ;;  %v5993_v18 = vld [vmem:[#allocation64_spill] sm:$0xff]  ;;  %v5994_v17 = vld [vmem:[#allocation55_spill] sm:$0xff] }
 0x31b   : > { %v2634_v11 = vadd.f32 %v2630_v51, %v2622_v9  ;;  %v2655_v44 = vmul.f32 %v2652_v30, %v5380_v13  ;;  %v2623_v42 = vadd.f32 %v2619_v15, %v2611_v38  ;;  %v2676_v56 = vrot.slane %v5463_v5, %v5465_v52  ;;  %v5989_v15 = vld [vmem:[#allocation59_spill] sm:$0xff]  ;;  %v5997_v31 = vld [vmem:[#allocation65_spill] sm:$0xff] }
 0x31c   : > { %v2645_v41 = vadd.f32 %v2641_v45, %v2633_v36  ;;  %v2656_v55 = vmul.f32 %v2652_v30, %v5983_v40  ;;  %v2665_v59 = vmul.f32 %v2664_v46, %v5984_v24  ;;  %v2612_v29 = vadd.f32 %v2608_v26, %v2600_v21  ;;  %v5992_v26 = vld [vmem:[#allocation56_spill] sm:$0xff]  ;;  %v5995_v14 = vld [vmem:[#allocation63_spill] sm:$0xff]  ;;  %v5996_v36 = vld [vmem:[#allocation66_spill] sm:$0xff]  ;;  %v5555_v24 = vpop.trf.xlu0 }
 0x31d   : > { %v2646_v49 = vadd.f32 %v2642_v43, %v2634_v11  ;;  %v2666_v60 = vmul.f32 %v2664_v46, %v5985_v12  ;;  %v2667_v23 = vmul.f32 %v2664_v46, %v5986_v25  ;;  %v2668_v62 = vmul.f32 %v2664_v46, %v5987_v2 }
 0x31e   : > { %v2657_v51 = vadd.f32 %v2653_v50, %v2645_v41  ;;  %v2689_v13 = vmul.f32 %v2688_v10, %v5988_v16  ;;  %v2690_v1 = vmul.f32 %v2688_v10, %v5989_v15  ;;  %v2691_v4 = vmul.f32 %v2688_v10, %v5990_v33  ;;  %v5999_v41 = vld [vmem:[#allocation67_spill] sm:$0xff] }
 0x31f   : > { %v2658_v5 = vadd.f32 %v2654_v7, %v2646_v49  ;;  %v5545_v35 = vmul.f32 %v2688_v10, %v5991_v27  ;;  %v2677_v58 = vmul.f32 %v2676_v56, %v5992_v26  ;;  %v2635_v38 = vadd.f32 %v2631_v6, %v2623_v42  ;;  %v5998_v10 = vld [vmem:[#allocation68_spill] sm:$0xff]  ;;  %v6000_v42 = vld [vmem:[#allocation70_spill] sm:$0xff]  ;;  %v6004_v26 = vld [vmem:[#allocation71_spill] sm:$0xff] }
 0x320   : > { %v2669_v30 = vadd.f32 %v2665_v59, %v2657_v51  ;;  %v2701_v21 = vmul.f32 %v2700_v19, %v5993_v18  ;;  %v2624_v9 = vadd.f32 %v2620_v32, %v2612_v29  ;;  %v2678_v46 = vmul.f32 %v2676_v56, %v5994_v17  ;;  %v6001_v59 = vld [vmem:[#allocation69_spill] sm:$0xff]  ;;  %v6002_v51 = vld [vmem:[#allocation58_spill] sm:$0xff] }
 0x321   : > { %v2670_v45 = vadd.f32 %v2666_v60, %v2658_v5  ;;  %v2702_v43 = vmul.f32 %v2700_v19, %v5995_v14  ;;  %v2703_v53 = vmul.f32 %v2700_v19, %v5996_v36  ;;  %v2647_v50 = vadd.f32 %v2643_v54, %v2635_v38  ;;  %v6003_v5 = vld [vmem:[#allocation72_spill] sm:$0xff]  ;;  %v6007_v17 = vld [vmem:[#allocation57_spill] sm:$0xff]  ;;  %v6008_v14 = vld [vmem:[#allocation75_spill] sm:$0xff] }
 0x322   : > { %v2681_v3 = vadd.f32 %v2677_v58, %v2669_v30  ;;  %v2704_v7 = vmul.f32 %v2700_v19, %v5997_v31  ;;  %v2713_v11 = vmul.f32 %v2712_v0, %v5998_v10  ;;  %v2714_v40 = vmul.f32 %v2712_v0, %v5999_v41  ;;  %v6010_v10 = vld [vmem:[#allocation19_spill] sm:$0xff] }
 0x323   : > { %v2682_v6 = vadd.f32 %v2678_v46, %v2670_v45  ;;  %v2715_v32 = vmul.f32 %v2712_v0, %v6000_v42  ;;  %v2716_v29 = vmul.f32 %v2712_v0, %v6001_v59  ;;  %v2659_v12 = vadd.f32 %v2655_v44, %v2647_v50  ;;  %v6012_v42 = vld [vmem:[#allocation25_spill] sm:$0xff] }
 0x324   : > { %v2693_v49 = vadd.f32 %v2689_v13, %v2681_v3  ;;  %v5561_v60 = vrot.slane %v5500_v61, %v5447_v48  ;;  %v5565_v19 = vrot.slane %v5500_v61, %v5454_v34  ;;  %v2636_v25 = vadd.f32 %v5505_v8, %v2624_v9  ;;  %v6009_v3 = vld [vmem:[#allocation48_spill] sm:$0xff] }
 0x325   : > { %v2694_v54 = vadd.f32 %v2690_v1, %v2682_v6  ;;  %v5570_v2 = vrot.slane %v5555_v24, %v5421_v28  ;;  %v2679_v16 = vmul.f32 %v2676_v56, %v6002_v51  ;;  %v2671_v13 = vadd.f32 %v2667_v23, %v2659_v12 }
 0x326   : > { %v2705_v0 = vadd.f32 %v2701_v21, %v2693_v49  ;;  %v5575_v44 = vrot.slane %v5555_v24, %v5423_v37  ;;  %v5579_v15 = vrot.slane %v5555_v24, %v5427_v57  ;;  %v2648_v1 = vadd.f32 %v2644_v39, %v2636_v25  ;;  %v6005_v39 = vld [vmem:[#allocation76_spill] sm:$0xff]  ;;  %v6013_v49 = vld [vmem:[#allocation74_spill] sm:$0xff]  ;;  %v6015_v25 = vld [vmem:[#allocation13_spill] sm:$0xff] }
 0x327   : > { %v2706_v33 = vadd.f32 %v2702_v43, %v2694_v54  ;;  %v5583_v8 = vrot.slane %v5555_v24, %v5437_v20  ;;  %v2725_v27 = vmul.f32 %v5521_v63, %v6003_v5  ;;  %v2683_v30 = vadd.f32 %v2679_v16, %v2671_v13  ;;  %v6006_v20 = vld [vmem:[#allocation47_spill] sm:$0xff]  ;;  %v6016_v13 = vld [vmem:[#allocation53_spill] sm:$0xff] }
 0x328   : > { %v2717_v28 = vadd.f32 %v2713_v11, %v2705_v0  ;;  %v5589_v23 = vrot.slane %v5555_v24, %v5440_v47  ;;  %v2726_v57 = vmul.f32 %v5521_v63, %v6004_v26  ;;  %v2660_v58 = vadd.f32 %v2656_v55, %v2648_v1  ;;  %v6014_v54 = vld [vmem:[#allocation31_spill] sm:$0xff] }
 0x329   : > { %v2718_v37 = vadd.f32 %v2714_v40, %v2706_v33  ;;  %v2737_v18 = vmul.f32 %v5525_v22, %v6005_v39  ;;  %v2749_v21 = vmul.f32 %v5561_v60, %v6006_v20  ;;  %v2695_v9 = vadd.f32 %v2691_v4, %v2683_v30  ;;  %v6011_v4 = vld [vmem:[#allocation79_spill] sm:$0xff] }
 0x32a   : > { %v2729_v38 = vadd.f32 %v2725_v27, %v2717_v28  ;;  %v2680_v46 = vmul.f32 %v2676_v56, %v6007_v17  ;;  %v2738_v47 = vmul.f32 %v5525_v22, %v6008_v14  ;;  %v2672_v43 = vadd.f32 %v2668_v62, %v2660_v58  ;;  %v6017_v28 = vld [vmem:[#allocation78_spill] sm:$0xff] }
 0x32b   : > { %v2730_v45 = vadd.f32 %v2726_v57, %v2718_v37  ;;  %v2761_v50 = vmul.f32 %v5565_v19, %v6009_v3  ;;  %v2772_v55 = vrot.slane %v5500_v61, %v5465_v52  ;;  %v2707_v31 = vadd.f32 %v2703_v53, %v2695_v9  ;;  %v6018_v27 = vld [vmem:[#allocation18_spill] sm:$0xff]  ;;  %v6019_v37 = vld [vmem:[#allocation20_spill] sm:$0xff] }
 0x32c   : > { %v2741_v36 = vadd.f32 %v2737_v18, %v2729_v38  ;;  %v2785_v11 = vmul.f32 %v5570_v2, %v6010_v10  ;;  %v2750_v56 = vmul.f32 %v5561_v60, %v6011_v4  ;;  %v2684_v40 = vadd.f32 %v2680_v46, %v2672_v43  ;;  %v6020_v38 = vld [vmem:[#allocation82_spill] sm:$0xff]  ;;  %v6026_v4 = vld [vmem:[#allocation77_spill] sm:$0xff] }
 0x32d   : > { %v2742_v41 = vadd.f32 %v2738_v47, %v2730_v45  ;;  %v2797_v62 = vmul.f32 %v5575_v44, %v6012_v42  ;;  %v2719_v59 = vadd.f32 %v2715_v32, %v2707_v31  ;;  %v2727_v12 = vmul.f32 %v5521_v63, %v6013_v49  ;;  %v6023_v45 = vld [vmem:[#allocation73_spill] sm:$0xff]  ;;  %v6025_v31 = vld [vmem:[#allocation26_spill] sm:$0xff] }
 0x32e   : > { %v2753_v6 = vadd.f32 %v2749_v21, %v2741_v36  ;;  %v2809_v61 = vmul.f32 %v5579_v15, %v6014_v54  ;;  %v2762_v51 = vmul.f32 %v5565_v19, %v6015_v25  ;;  %v2696_v16 = vadd.f32 %v5545_v35, %v2684_v40  ;;  %v6021_v35 = vld [vmem:[#allocation49_spill] sm:$0xff]  ;;  %v6024_v36 = vld [vmem:[#allocation50_spill] sm:$0xff] }
 0x32f   : > { %v2754_v53 = vadd.f32 %v2750_v56, %v2742_v41  ;;  %v2773_v33 = vmul.f32 %v2772_v55, %v6016_v13  ;;  %v2731_v1 = vadd.f32 %v2727_v12, %v2719_v59  ;;  %v2739_v5 = vmul.f32 %v5525_v22, %v6017_v28  ;;  %v6022_v21 = vld [vmem:[#allocation85_spill] sm:$0xff]  ;;  %v6029_v59 = vld [vmem:[#allocation32_spill] sm:$0xff]  ;;  %v6030_v54 = vld [vmem:[#allocation14_spill] sm:$0xff] }
 0x330   : > { %v2765_v0 = vadd.f32 %v2761_v50, %v2753_v6  ;;  %v2774_v30 = vmul.f32 %v2772_v55, %v6018_v27  ;;  %v2786_v26 = vmul.f32 %v5570_v2, %v6019_v37  ;;  %v2708_v57 = vadd.f32 %v2704_v7, %v2696_v16  ;;  %v6028_v6 = vld [vmem:[#allocation24_spill] sm:$0xff]  ;;  %v6034_v27 = vld [vmem:[#allocation30_spill] sm:$0xff] }
 0x331   : > { %v2766_v32 = vadd.f32 %v2762_v51, %v2754_v53  ;;  %v2821_v39 = vmul.f32 %v5583_v8, %v6020_v38  ;;  %v2743_v18 = vadd.f32 %v2739_v5, %v2731_v1  ;;  %v2751_v20 = vmul.f32 %v5561_v60, %v6021_v35  ;;  %v6032_v1 = vld [vmem:[#allocation51_spill] sm:$0xff]  ;;  %v6037_v38 = vld [vmem:[#allocation88_spill] sm:$0xff] }
 0x332   : > { %v2777_v58 = vadd.f32 %v2773_v33, %v2765_v0  ;;  %v2833_v9 = vmul.f32 %v5589_v23, %v6022_v21  ;;  %v2720_v46 = vadd.f32 %v2716_v29, %v2708_v57  ;;  %v2728_v14 = vmul.f32 %v5521_v63, %v6023_v45  ;;  %v6027_v63 = vld [vmem:[#allocation52_spill] sm:$0xff]  ;;  %v6031_v0 = vld [vmem:[#allocation81_spill] sm:$0xff]  ;;  %v6039_v21 = vld [vmem:[#allocation87_spill] sm:$0xff] }
 0x333   : > { %v2778_v17 = vadd.f32 %v2774_v30, %v2766_v32  ;;  %v5633_v7 = vrot.slane %v5555_v24, %v5447_v48  ;;  %v2755_v43 = vadd.f32 %v2751_v20, %v2743_v18  ;;  %v2763_v3 = vmul.f32 %v5565_v19, %v6024_v36  ;;  %v6033_v32 = vld [vmem:[#allocation84_spill] sm:$0xff] }
 0x334   : > { %v2789_v47 = vadd.f32 %v2785_v11, %v2777_v58  ;;  %v2798_v10 = vmul.f32 %v5575_v44, %v6025_v31  ;;  %v2732_v41 = vadd.f32 %v2728_v14, %v2720_v46  ;;  %v2740_v29 = vmul.f32 %v5525_v22, %v6026_v4  ;;  %v6040_v14 = vld [vmem:[#allocation92_spill] sm:$0xff]  ;;  %v6043_v31 = vld [vmem:[#allocation27_spill] sm:$0xff] }
 0x335   : > { %v2790_v50 = vadd.f32 %v2786_v26, %v2778_v17  ;;  %v2767_v40 = vadd.f32 %v2763_v3, %v2755_v43  ;;  %v2775_v11 = vmul.f32 %v2772_v55, %v6027_v63  ;;  %v2787_v48 = vmul.f32 %v5570_v2, %v6028_v6  ;;  %v6036_v26 = vld [vmem:[#allocation21_spill] sm:$0xff]  ;;  %v6044_v4 = vld [vmem:[#allocation91_spill] sm:$0xff]  ;;  %v6046_v6 = vld [vmem:[#allocation80_spill] sm:$0xff] }
 0x336   : > { %v2801_v56 = vadd.f32 %v2797_v62, %v2789_v47  ;;  %v2810_v49 = vmul.f32 %v5579_v15, %v6029_v59  ;;  %v2744_v12 = vadd.f32 %v2740_v29, %v2732_v41  ;;  %v2752_v53 = vmul.f32 %v5561_v60, %v6030_v54  ;;  %v6041_v43 = vld [vmem:[#allocation37_spill] sm:$0xff] }
 0x337   : > { %v2802_v42 = vadd.f32 %v2798_v10, %v2790_v50  ;;  %v2856_v51 = vrot.slane %v5555_v24, %v5454_v34  ;;  %v2868_v22 = vrot.slane %v5555_v24, %v5465_v52  ;;  %v2779_v62 = vadd.f32 %v2775_v11, %v2767_v40  ;;  %v6035_v52 = vld [vmem:[#allocation17_spill] sm:$0xff] }
 0x338   : > { %v2813_v25 = vadd.f32 %v2809_v61, %v2801_v56  ;;  %v2822_v13 = vmul.f32 %v5583_v8, %v6031_v0  ;;  %v2756_v33 = vadd.f32 %v2752_v53, %v2744_v12  ;;  %v2764_v28 = vmul.f32 %v5565_v19, %v6032_v1  ;;  %v6045_v40 = vld [vmem:[#allocation41_spill] sm:$0xff]  ;;  %v6047_v12 = vld [vmem:[#allocation90_spill] sm:$0xff] }
 0x339   : > { %v2814_v16 = vadd.f32 %v2810_v49, %v2802_v42  ;;  %v2834_v60 = vmul.f32 %v5589_v23, %v6033_v32  ;;  %v2791_v61 = vadd.f32 %v2787_v48, %v2779_v62  ;;  %v2799_v34 = vmul.f32 %v5575_v44, %v6034_v27  ;;  %v6049_v62 = vld [vmem:[#allocation95_spill] sm:$0xff] }
 0x33a   : > { %v2825_v5 = vadd.f32 %v2821_v39, %v2813_v25  ;;  %v2768_v37 = vadd.f32 %v2764_v28, %v2756_v33  ;;  %v2776_v24 = vmul.f32 %v2772_v55, %v6035_v52  ;;  %v2788_v57 = vmul.f32 %v5570_v2, %v6036_v26  ;;  %v6038_v39 = vld [vmem:[#allocation33_spill] sm:$0xff]  ;;  %v6048_v25 = vld [vmem:[#allocation83_spill] sm:$0xff]  ;;  %v6051_v28 = vld [vmem:[#allocation86_spill] sm:$0xff] }
 0x33b   : > { %v2826_v30 = vadd.f32 %v2822_v13, %v2814_v16  ;;  %v2845_v18 = vmul.f32 %v5633_v7, %v6037_v38  ;;  %v2803_v19 = vadd.f32 %v2799_v34, %v2791_v61  ;;  %v2811_v35 = vmul.f32 %v5579_v15, %v6038_v39  ;;  %v6050_v13 = vld [vmem:[#allocation94_spill] sm:$0xff]  ;;  %v6052_v61 = vld [vmem:[#allocation89_spill] sm:$0xff] }
 0x33c   : > { %v2837_v58 = vadd.f32 %v2833_v9, %v2825_v5  ;;  %v2846_v17 = vmul.f32 %v5633_v7, %v6039_v21  ;;  %v2780_v46 = vadd.f32 %v2776_v24, %v2768_v37  ;;  %v2857_v47 = vmul.f32 %v2856_v51, %v6040_v14  ;;  %v6042_v9 = vld [vmem:[#allocation96_spill] sm:$0xff]  ;;  %v6053_v34 = vld [vmem:[#allocation98_spill] sm:$0xff]  ;;  %v6054_v37 = vld [vmem:[#allocation93_spill] sm:$0xff] }
 0x33d   : > { %v2838_v20 = vadd.f32 %v2834_v60, %v2826_v30  ;;  %v2815_v55 = vadd.f32 %v2811_v35, %v2803_v19  ;;  %v2823_v2 = vmul.f32 %v5583_v8, %v6041_v43  ;;  %v2869_v36 = vmul.f32 %v2868_v22, %v6042_v9 }
 0x33e   : > { %v2849_v45 = vadd.f32 %v2845_v18, %v2837_v58  ;;  %v2792_v50 = vadd.f32 %v2788_v57, %v2780_v46  ;;  %v2800_v10 = vmul.f32 %v5575_v44, %v6043_v31  ;;  %v2858_v29 = vmul.f32 %v2856_v51, %v6044_v4  ;;  %v6055_v57 = vld [vmem:[#allocation97_spill] sm:$0xff] }
 0x33f   : > { %v2850_v3 = vadd.f32 %v2846_v17, %v2838_v20  ;;  %v2827_v56 = vadd.f32 %v2823_v2, %v2815_v55  ;;  %v2835_v63 = vmul.f32 %v5589_v23, %v6045_v40  ;;  %v2812_v48 = vmul.f32 %v5579_v15, %v6046_v6 }
 0x340   : > { %v2861_v41 = vadd.f32 %v2857_v47, %v2849_v45  ;;  %v2804_v11 = vadd.f32 %v2800_v10, %v2792_v50  ;;  %v2847_v54 = vmul.f32 %v5633_v7, %v6047_v12  ;;  %v2824_v44 = vmul.f32 %v5583_v8, %v6048_v25 }
 0x341   : > { %v2862_v59 = vadd.f32 %v2858_v29, %v2850_v3  ;;  %v2839_v49 = vadd.f32 %v2835_v63, %v2827_v56  ;;  %v2870_v16 = vmul.f32 %v2868_v22, %v6049_v62  ;;  %v2859_v33 = vmul.f32 %v2856_v51, %v6050_v13 }
 0x342   : > { %v2873_v42 = vadd.f32 %v2869_v36, %v2861_v41  ;;  %v2816_v53 = vadd.f32 %v2812_v48, %v2804_v11  ;;  %v2836_v15 = vmul.f32 %v5589_v23, %v6051_v28  ;;  %v2848_v27 = vmul.f32 %v5633_v7, %v6052_v61 }
 0x343   : > { %v2851_v0 = vadd.f32 %v2847_v54, %v2839_v49  ;;  %v2874_v5 = vadd.f32 %v2870_v16, %v2862_v59  ;;  %v2871_v30 = vmul.f32 %v2868_v22, %v6053_v34  ;;  %v2860_v52 = vmul.f32 %v2856_v51, %v6054_v37 }
 0x344   : > { %2877 = vxpose.xlu1.b32.start [1/4] (short) %v2873_v42, 128  ;;  %v2828_v1 = vadd.f32 %v2824_v44, %v2816_v53  ;;  %v2872_v58 = vmul.f32 %v2868_v22, %v6055_v57 }
 0x345   : > { %v2863_v32 = vadd.f32 %v2859_v33, %v2851_v0 }
 0x346   : > { %v2840_v60 = vadd.f32 %v2836_v15, %v2828_v1 }
 0x347   : > { %v2875_v24 = vadd.f32 %v2871_v30, %v2863_v32 }
 0x348   : > { %2878 = vxpose.xlu1.b32.cont [2/4] (short) %v2874_v5, 128  ;;  %v2852_v8 = vadd.f32 %v2848_v27, %v2840_v60 }
 0x34a   : > { %v2864_v26 = vadd.f32 %v2860_v52, %v2852_v8 }
 0x34c   : > { %2879 = vxpose.xlu1.b32.cont [3/4] (short) %v2875_v24, 128  ;;  %v2876_v38 = vadd.f32 %v2872_v58, %v2864_v26 }
 0x350   : > { %2880 = vxpose.xlu1.b32.end [4/4] (short) %v2876_v38, 128 }
 0x3c4   : > { %v2893_v23 = vpop.trf.xlu1 }
 0x3c5   : > { %2910 = vst.msk [vmem:[#allocation5] sm:$0xff] %vm358_vm1, %v2893_v23 }
 0x3c8   : > { %v2894_v18 = vpop.trf.xlu1 }
 0x3c9   : > { %2911 = vst.msk [vmem:[#allocation5 + $0x8] sm:$0xff] %vm358_vm1, %v2894_v18 }
 0x3cc   : > { %v2895_v7 = vpop.trf.xlu1 }
 0x3cd   : > { %2912 = vst.msk [vmem:[#allocation5 + $0x10] sm:$0xff] %vm358_vm1, %v2895_v7 }
 0x3d0   : > { %v2896_v19 = vpop.trf.xlu1 }
 0x3d1   : > { %2913 = vst.msk [vmem:[#allocation5 + $0x18] sm:$0xff] %vm358_vm1, %v2896_v19 }
 0x3d4   : > { %v2897_v51 = vpop.trf.xlu1 }
 0x3d5   : > { %2914 = vst.msk [vmem:[#allocation5 + $0x20] sm:$0xff] %vm358_vm1, %v2897_v51 }
 0x3d8   : > { %v2898_v39 = vpop.trf.xlu1 }
 0x3d9   : > { %2915 = vst.msk [vmem:[#allocation5 + $0x28] sm:$0xff] %vm358_vm1, %v2898_v39 }
 0x3dc   : > { %v2899_v22 = vpop.trf.xlu1 }
 0x3dd   : > { %2916 = vst.msk [vmem:[#allocation5 + $0x30] sm:$0xff] %vm358_vm1, %v2899_v22 }
 0x3e0   : > { %v2900_v35 = vpop.trf.xlu1 }
 0x3e1   : > { %2917 = vst.msk [vmem:[#allocation5 + $0x38] sm:$0xff] %vm358_vm1, %v2900_v35 }
 0x3e4   : > { %v2901_v20 = vpop.trf.xlu1 }
 0x3e5   : > { %2918 = vst.msk [vmem:[#allocation5 + $0x40] sm:$0xff] %vm358_vm1, %v2901_v20 }
 0x3e8   : > { %v2902_v21 = vpop.trf.xlu1 }
 0x3e9   : > { %2919 = vst.msk [vmem:[#allocation5 + $0x48] sm:$0xff] %vm358_vm1, %v2902_v21 }
 0x3ec   : > { %v2903_v17 = vpop.trf.xlu1 }
 0x3ed   : > { %2920 = vst.msk [vmem:[#allocation5 + $0x50] sm:$0xff] %vm358_vm1, %v2903_v17 }
 0x3f0   : > { %v2904_v46 = vpop.trf.xlu1 }
 0x3f1   : > { %2921 = vst.msk [vmem:[#allocation5 + $0x58] sm:$0xff] %vm358_vm1, %v2904_v46 }
 0x3f4   : > { %v2905_v45 = vpop.trf.xlu1 }
 0x3f5   : > { %2922 = vst.msk [vmem:[#allocation5 + $0x60] sm:$0xff] %vm358_vm1, %v2905_v45 }
 0x3f8   : > { %v2906_v14 = vpop.trf.xlu1 }
 0x3f9   : > { %2923 = vst.msk [vmem:[#allocation5 + $0x68] sm:$0xff] %vm358_vm1, %v2906_v14 }
 0x3fc   : > { %v2907_v47 = vpop.trf.xlu1 }
 0x3fd   : > { %2924 = vst.msk [vmem:[#allocation5 + $0x70] sm:$0xff] %vm358_vm1, %v2907_v47 }
 0x400   : > { %v2908_v55 = vpop.trf.xlu1 }
 0x401   : > { %2925 = vst.msk [vmem:[#allocation5 + $0x78] sm:$0xff] %vm358_vm1, %v2908_v55 }
 0x402 LB: >> { %s2933_s15 = sld [smem:[#allocation8 + %s3836_s14]]  ;;  %s2936_s16 = scalar_lea.vmem [#allocation5], %s3836_s14  ;;  %s3836_s14 = sphi %s3834_s14, %s2931_s14  }
 0x403   : >> { %s2931_s14 = sadd.s32 1, %s3836_s14  }
 0x404   : >> { %p2928_p2 = scmp.ge.s32.totalorder %s2931_s14, 128  }
 0x405   : > { %v2980_v36 = vld [vmem:[%s5795_s8] sm:$0xff] (%p2928_p2)  ;;  %v2981_v3 = vld [vmem:[%s5795_s8 + $0x8] sm:$0xff] (%p2928_p2)  ;;  %v2982_v50 = vld [vmem:[%s5795_s8 + $0x10] sm:$0xff] (%p2928_p2)  ;;  %v6056_v31 = vmov (%p2928_p2), 0   ;;  %s3843_s19 = smov (%p2928_p2), [#allocation9]   ;;  %p5749_p3 = scmp.eq.s32.totalorder (%p2928_p2), %s3178_s28, 3 }
 0x406   : > { %2930 = sbr.rel (!%p2928_p2) target bundleno = 1026 (0x402), region = 124  ;;  %3740 = vset.pattern.permute.xlu0 (%p2928_p2), %v6056_v31  ;;  %3741 = vset.pattern.permute.xlu1 (%p2928_p2), %v6056_v31  ;;  %v3674_v10 = vpack.c.bf16 (%p2928_p2), %v2981_v3, %v2980_v36  ;;  %v2983_v41 = vld [vmem:[%s5795_s8 + $0x18] sm:$0xff] (%p2928_p2)  ;;  %v2976_v4 = vld [vmem:[#allocation2] sm:$0xff] (%p2928_p2)  ;;  %v2950_v40 = vld [vmem:[%s5797_s10 + $0x10] sm:$0xff] (%p2928_p2)  ;;  %s3110_s20 = sshll.u32 (%p2928_p2), %s3843_s19, 4  ;;  %s3111_s20 = int_to_ptr.vmem [resolvable:$true] %s3110_s20 }
 0x407   : > { %v3678_v29 = vpack.c.bf16 (%p2928_p2), %v2983_v41, %v2982_v50  ;;  %3668 = vmatprep.mubr.msk.f32.mxu0 (%p2928_p2), %vm358_vm1, %v2976_v4  ;;  %v2948_v56 = vld [vmem:[%s5797_s10] sm:$0xff] (%p2928_p2)  ;;  %2964 = vperm.xlu1 (%p2928_p2), %3741, %v2950_v40   ;;  %v2949_v63 = vld [vmem:[%s5797_s10 + $0x8] sm:$0xff] (%p2928_p2)  ;;  %v2951_v11 = vld [vmem:[%s5797_s10 + $0x18] sm:$0xff] (%p2928_p2)  ;;  %s3766_s22 = scalar_lea.vmem (%p2928_p2), %s3111_s20, 512  ;;  %p3773_p7 = scmp.lt.s32.totalorder (%p2928_p2), %s3111_s20, %s3111_s20 }
 0x408   : >> { %v2937_v43 = vld [vmem:[%s2936_s16] sm:$0x1]  ;;  %s2934_s17 = scalar_lea.vmem [#allocation3], %s2933_s15  ;;  %3675 = vmatprep.subr.bf16.mxu0 (%p2928_p2), %v3674_v10  ;;  %2954 = vperm.xlu0 (%p2928_p2), %3740, %v2948_v56   ;;  %v2977_v6 = vld [vmem:[#allocation2 + $0x8] sm:$0xff] (%p2928_p2)  ;;  %v2978_v48 = vld [vmem:[#allocation2 + $0x10] sm:$0xff] (%p2928_p2)  ;;  %p3767_p4 = scmp.ne.s32.totalorder (%p2928_p2), %s3111_s20, %s3766_s22 }
 0x409   : >> { %v2935_v2 = vld [vmem:[%s2934_s17] sm:$0x1]  ;;  %3677 = vmatpush3.bf16.msra.mxu0 (%p2928_p2), %v3674_v10  ;;  %v2979_v42 = vld [vmem:[#allocation2 + $0x18] sm:$0xff] (%p2928_p2)  ;;  %p3774_p8 = scmp.lt.s32.totalorder (%p2928_p2), %s3766_s22, %s3766_s22 }
 0x40a   : >> { %v2938_v9 = vadd.f32 %v2937_v43, %v2935_v2  ;;  %3679 = vmatprep.subr.bf16.mxu0 (%p2928_p2), %v3678_v29  ;;  %v3316_v13 = vld [vmem:[%s5796_s9] ss:$0 sm:$0xff] (%p2928_p2)  ;;  %p3768_p5 = pnand (%p2928_p2), %p3767_p4, %p5749_p3 }
 0x40b   : > { %2969 = vperm.xlu1 (%p2928_p2), %3741, %v2951_v11   ;;  %p3775_p9 = por (%p2928_p2), %p3774_p8, %p3773_p7 }
 0x40c   : >> { %2940 = vst.msk [vmem:[%s2934_s17] sm:$0x1] %vm2443_vm4, %v2938_v9  ;;  %2959 = vperm.xlu0 (%p2928_p2), %3740, %v2949_v63   ;;  %p3769_p6 = pneg (%p2928_p2), %p3768_p5 }
 0x40d   : > { %3681 = vmatpush3.bf16.msra.mxu0 %v3678_v29 }
 0x40e   : > { %p3776_p10 = pnand %p3775_p9, %p3769_p6 }
 0x410   : > { %3669 = vmatmul.mubr.msk.f32.vlgmr.msra.gmra.mrb[62].mxu0 %vm358_vm1, %v2977_v6 }
 0x411   : > { %3671 = vmatprep.mubr.msk.f32.mxu0 %vm358_vm1, %v2978_v48 }
 0x413   : > { %v2945_v54 = vld [vmem:[#allocation3 + $0x8] sm:$0xff]  ;;  %v2944_v53 = vld [vmem:[#allocation3] sm:$0xff]  ;;  %v2947_v16 = vld [vmem:[#allocation3 + $0x18] sm:$0xff] }
 0x414   : > { %3672 = vmatmul.mubr.msk.f32.gmra.mrb[64].mxu0 %vm358_vm1, %v2979_v42  ;;  %v2946_v33 = vld [vmem:[#allocation3 + $0x10] sm:$0xff] }
 0x486   : > { %v2965_v49 = vpop.permute.xlu1 %2964 }
 0x487   : > { %v2955_v59 = vpop.permute.xlu0 %2954  ;;  %v2974_v60 = vmul.f32 %v2965_v49, %v2946_v33 }
 0x488   : > { %v2972_v44 = vmul.f32 %v2955_v59, %v2944_v53 }
 0x48a   : > { %v2970_v62 = vpop.permute.xlu1 %2969 }
 0x48b   : > { %v2960_v12 = vpop.permute.xlu0 %2959  ;;  %v2975_v5 = vmul.f32 %v2970_v62, %v2947_v16 }
 0x48c   : > { %v2973_v25 = vmul.f32 %v2960_v12, %v2945_v54 }
 0x4e3   : > { %v3670_v0 = vpop.f32.mrb[62].mxu0 }
 0x4e4   : > { %v3068_v1 = vadd.f32 %v3670_v0, %v2973_v25  ;;  %v3062_v28 = vpop.f32.mrb[63].mxu0 }
 0x4e5   : > { %v3063_v15 = vadd.f32 %v3062_v28, %v2972_v44 }
 0x4e6   : > { %v3089_v32 = vadd.f32 %v3316_v13, %v3068_v1 }
 0x4e7   : > { %v3088_v61 = vadd.f32 %v3316_v13, %v3063_v15  ;;  %v3673_v27 = vpop.f32.mrb[64].mxu0 }
 0x4e8   : > { %v3093_v34 = vmax.f32 %v3089_v32, 0.0  ;;  %v3078_v30 = vadd.f32 %v3673_v27, %v2975_v5  ;;  %v3072_v8 = vpop.f32.mrb[65].mxu0 }
 0x4e9   : > { %v3092_v37 = vmax.f32 %v3088_v61, 0.0  ;;  %v3073_v52 = vadd.f32 %v3072_v8, %v2974_v60 }
 0x4ea   : > { %3097 = vst.msk [vmem:[#allocation2 + $0x8] sm:$0xff] %vm358_vm1, %v3093_v34  ;;  %3101 = vst.msk [vmem:[#allocation9 + $0x8] sm:$0xff] %vm358_vm1, %v3093_v34  ;;  %v3091_v24 = vadd.f32 %v3316_v13, %v3078_v30 }
 0x4eb   : > { %3096 = vst.msk [vmem:[#allocation2] sm:$0xff] %vm358_vm1, %v3092_v37  ;;  %3100 = vst.msk [vmem:[#allocation9] sm:$0xff] %vm358_vm1, %v3092_v37  ;;  %v3090_v26 = vadd.f32 %v3316_v13, %v3073_v52 }
 0x4ec   : > { %v3095_v57 = vmax.f32 %v3091_v24, 0.0 }
 0x4ed   : > { %v3094_v58 = vmax.f32 %v3090_v26, 0.0 }
 0x4ee   : > { %3099 = vst.msk [vmem:[#allocation2 + $0x18] sm:$0xff] %vm358_vm1, %v3095_v57  ;;  %3103 = vst.msk [vmem:[#allocation9 + $0x18] sm:$0xff] %vm358_vm1, %v3095_v57 }
 0x4ef   : > { %3098 = vst.msk [vmem:[#allocation2 + $0x10] sm:$0xff] %vm358_vm1, %v3094_v58  ;;  %3102 = vst.msk [vmem:[#allocation9 + $0x10] sm:$0xff] %vm358_vm1, %v3094_v58 }
 0x4f0   : > { %3779 = shalt.err (!%p3776_p10)
}
 0x4f1   : > { %s3780_s24 = scalar_lea.hbm %s5798_s11, 512 }
 0x4f2   : > { %p3781_p11 = scmp.ne.s32.totalorder %s5798_s11, %s3780_s24  ;;  %p3786_p0 = scmp.lt.u32.totalorder %s3780_s24, %s5798_s11 }
 0x4f4   : > { %p3782_p12 = pnand %p3781_p11, %p5749_p3 }
 0x4f6   : > { %p3783_p13 = pneg %p3782_p12 }
 0x4f8   : > { %p3788_p1 = pnand %p3786_p0, %p3783_p13 }
 0x4fa   : > { %3791 = shalt.err (!%p3788_p1)
}
 0x4fb   : > { %s3844_s12 = smov 128   ;;  %s3845_s13 = smov 8  }
 0x4fc   : > { %3685 = dma.vmem_to_hbm [thread:$0]  (%p5749_p3), %s3111_s20, 512, %s5798_s11, [#allocation10], %s3844_s12, %s3844_s12, %s3845_s13  }
 0x4fd   : > { %3815 = dma.done.wait (%p5749_p3), [#allocation10], 512  }
 0x4fe   : > { %3817 = vsyncadd (%p5749_p3), [#allocation10], 4294966784 }
 0x4ff PF: > { %s32_s27 = sadd.s32 1, %s3828_s27   ;;  %s6058_s1 = smov %s3824_s26 }
 0x500   : > { %p29_p2 = scmp.ge.s32.totalorder %s32_s27, 6   ;;  %s6059_s26 = smov %s6061_s29 }
 0x502   :  { %31 = sbr.rel (!%p29_p2) target bundleno = 27 (0x1b), region = 135 }
 0x509   :  { %3126 = vsyncpa [#allocation10], 1 }
 0x50a   :  { %3128 = vsyncpa [#allocation10 + $0x1], 1 }

</bundles_post_ra>
